<compile_context>
chip_gen: v7x
topology: tpu7x:2x2x1
jax: 0.10.0
libtpu: 0.0.40
codegen_flags: <defaults>
</compile_context>

<pallas_src>
import jax
import jax.numpy as jnp
from jax import lax
from jax.experimental import pallas as pl
from jax.experimental.pallas import tpu as pltpu


_VMEM_SPEC = pl.BlockSpec(memory_space=pltpu.MemorySpace.VMEM)


# ---------------------------------------------------------------------------
# Kernel 1: build G = [H, U, H*U, H*Ht]  (elementwise, one lane-dense store)
# ---------------------------------------------------------------------------
def _g_kernel(h_ref, u_ref, ht_ref, g_ref):
    H = h_ref[...]
    U = u_ref[...]
    Ht = ht_ref[...]
    g_ref[...] = jnp.concatenate([H, U, H * U, H * Ht], axis=2)


def build_G(H, U_toggler, H_toggler):
    B, T, D2 = H.shape
    return pl.pallas_call(
        _g_kernel,
        in_specs=[_VMEM_SPEC, _VMEM_SPEC, _VMEM_SPEC],
        out_specs=_VMEM_SPEC,
        out_shape=jax.ShapeDtypeStruct((B, T, 4 * D2), H.dtype),
    )(H, U_toggler, H_toggler)


# ---------------------------------------------------------------------------
# Kernel 2: fused bidirectional LSTM layer (time-major, flattened [T*B, Din])
#   x_ref:     [T*B, Din]   f32   (time-major, rows ordered (t0 b0, t0 b1, ...))
#   wih_ref:   [Din, 8H]    bf16  (fwd 4H | bwd 4H, pre-transposed)
#   whh_f_ref: [H,   4H]    bf16
#   whh_b_ref: [H,   4H]    bf16
#   b_ref:     [1,   8H]    f32   (b_ih + b_hh, fwd | bwd)
#   out_ref:   [T*B, 2H]    f32   (fwd hidden | bwd hidden, PyTorch layout)
#   gx_ref:    [T*B, 8H]    f32   VMEM scratch (hoisted input projection)
# PyTorch gate order inside each 4H block: i, f, g, o
# ---------------------------------------------------------------------------
def _make_bilstm_kernel(T, B, Hh):
    H4 = 4 * Hh

    def kernel(x_ref, wih_ref, whh_f_ref, whh_b_ref, b_ref, out_ref, gx_ref):
        # (1) Hoisted input projection: ONE MXU matmul for all T steps and
        #     both directions; bias added once.  bf16 operands, f32 accumulate.
        x = x_ref[...].astype(jnp.bfloat16)                           # [T*B, Din]
        gx_ref[...] = (
            jnp.dot(x, wih_ref[...], preferred_element_type=jnp.float32)
            + b_ref[...]
        )                                                             # [T*B, 8H]

        # Recurrent weights loaded once (hoisted out of the time loop).
        whh_f = whh_f_ref[...]
        whh_b = whh_b_ref[...]

        def cell(pre, h, c, whh):
            # pre: [B, 4H] f32 ; h, c: [B, H] f32 (carried in vregs)
            g = pre + jnp.dot(h.astype(jnp.bfloat16), whh,
                              preferred_element_type=jnp.float32)
            sg = jax.nn.sigmoid(g)                  # one EUP pass covers i, f, o
            gg = jnp.tanh(g[:, 2 * Hh:3 * Hh])      # tanh only on the "g" slice
            c_new = sg[:, Hh:2 * Hh] * c + sg[:, 0:Hh] * gg
            h_new = sg[:, 3 * Hh:4 * Hh] * jnp.tanh(c_new)
            return h_new, c_new

        # (2) Recurrence: fully unrolled at trace time (T static, equivalent to
        #     fori_loop(..., unroll=True)); fwd and bwd interleaved per step so
        #     both independent recurrences fill the VPU/EUP/MXU slots; (h, c)
        #     never round-trip through VMEM.
        zero = jnp.zeros((B, Hh), jnp.float32)
        h_f = c_f = zero
        h_b = c_b = zero
        for t in range(T):
            tb = T - 1 - t
            h_f, c_f = cell(gx_ref[t * B:(t + 1) * B, 0:H4], h_f, c_f, whh_f)
            h_b, c_b = cell(gx_ref[tb * B:(tb + 1) * B, H4:2 * H4], h_b, c_b, whh_b)
            out_ref[t * B:(t + 1) * B, 0:Hh] = h_f
            out_ref[tb * B:(tb + 1) * B, Hh:2 * Hh] = h_b

    return kernel


def bilstm_layer_tm(x_tm, layer_params, hidden):
    """x_tm: [T, B, Din] time-major f32 -> [T, B, 2*hidden] f32 (fused fwd+bwd)."""
    T, B, Din = x_tm.shape
    wih, whh_f, whh_b, bias = layer_params
    x2 = x_tm.reshape(T * B, Din)                    # free row-major reshape in XLA
    out2 = pl.pallas_call(
        _make_bilstm_kernel(T, B, hidden),
        in_specs=[_VMEM_SPEC] * 5,
        out_specs=_VMEM_SPEC,
        out_shape=jax.ShapeDtypeStruct((T * B, 2 * hidden), jnp.float32),
        scratch_shapes=[pltpu.VMEM((T * B, 8 * hidden), jnp.float32)],
    )(x2, wih, whh_f, whh_b, bias)
    return out2.reshape(T, B, 2 * hidden)


# ---------------------------------------------------------------------------
# Parameter init (deterministic, PyTorch-style U(-1/sqrt(H), 1/sqrt(H)))
# Returns (kernel_params, ref_params) built from the SAME raw weights.
# ---------------------------------------------------------------------------
def init_lstm_params(key, h_size):
    k = 1.0 / float(h_size) ** 0.5
    dims_in = [8 * h_size, 2 * h_size]          # layer 0 input, layer 1 input
    keys = jax.random.split(key, len(dims_in) * 2 * 4)
    ki = 0
    kernel_layers, ref_layers = [], []
    for din in dims_in:
        dirs = []
        for _ in range(2):                      # forward, backward
            w_ih = jax.random.uniform(keys[ki], (4 * h_size, din), jnp.float32, -k, k); ki += 1
            w_hh = jax.random.uniform(keys[ki], (4 * h_size, h_size), jnp.float32, -k, k); ki += 1
            b_ih = jax.random.uniform(keys[ki], (4 * h_size,), jnp.float32, -k, k); ki += 1
            b_hh = jax.random.uniform(keys[ki], (4 * h_size,), jnp.float32, -k, k); ki += 1
            dirs.append((w_ih, w_hh, b_ih, b_hh))
        (wif, whf, bif, bhf), (wib, whb, bib, bhb) = dirs
        # Kernel pack: fwd|bwd combined input-projection weight (bf16 MXU
        # operands), per-direction recurrent weights (bf16), f32 fused bias.
        wih_comb = jnp.concatenate([wif.T, wib.T], axis=1).astype(jnp.bfloat16)   # [Din, 8H]
        bias_comb = jnp.concatenate([bif + bhf, bib + bhb]).reshape(1, -1)         # [1, 8H] f32
        kernel_layers.append((wih_comb,
                              whf.T.astype(jnp.bfloat16),
                              whb.T.astype(jnp.bfloat16),
                              bias_comb))
        # Pure-f32 reference pack (per direction).
        ref_layers.append(((wif.T, whf.T, (bif + bhf).reshape(1, -1)),
                           (wib.T, whb.T, (bib + bhb).reshape(1, -1))))
    return kernel_layers, ref_layers


# ---------------------------------------------------------------------------
# Forward (type == 'concat' branch)
# ---------------------------------------------------------------------------
def modeling_layer_forward(U_toggler, H_toggler, H, kernel_params, h_size):
    G = build_G(H, U_toggler, H_toggler)          # [B, T, 8*h_size] (returned)
    x_tm = jnp.transpose(G, (1, 0, 2))            # -> time-major ONCE
    for layer in kernel_params:
        x_tm = bilstm_layer_tm(x_tm, layer, h_size)
        # TODO(synk): inter-layer dropout is a no-op in inference/eval mode.
    M = jnp.transpose(x_tm, (1, 0, 2))            # -> batch-first ONCE
    return G, M                                    # M: [B, T, 2*h_size]


# ---------------------------------------------------------------------------
# Pure-JAX f32 reference (for sanity checking the kernels)
# ---------------------------------------------------------------------------
def _ref_lstm_direction(x_tm, w_ih_t, w_hh_t, bias, hidden):
    B = x_tm.shape[1]

    def step(carry, x_t):
        h, c = carry
        gates = x_t @ w_ih_t + h @ w_hh_t + bias
        i = jax.nn.sigmoid(gates[:, :hidden])
        f = jax.nn.sigmoid(gates[:, hidden:2 * hidden])
        g = jnp.tanh(gates[:, 2 * hidden:3 * hidden])
        o = jax.nn.sigmoid(gates[:, 3 * hidden:])
        c = f * c + i * g
        h = o * jnp.tanh(c)
        return (h, c), h

    init = (jnp.zeros((B, hidden), jnp.float32), jnp.zeros((B, hidden), jnp.float32))
    _, ys = lax.scan(step, init, x_tm)
    return ys


def ref_forward(U_toggler, H_toggler, H, ref_params, h_size):
    G = jnp.concatenate([H, U_toggler, H * U_toggler, H * H_toggler], axis=2)
    x = G
    for fwd, bwd in ref_params:
        x_tm = jnp.transpose(x, (1, 0, 2))
        out_f = _ref_lstm_direction(x_tm, *fwd, h_size)
        out_b = _ref_lstm_direction(x_tm[::-1], *bwd, h_size)[::-1]
        x = jnp.transpose(jnp.concatenate([out_f, out_b], axis=-1), (1, 0, 2))
    return G, x


# ---------------------------------------------------------------------------
if __name__ == "__main__":
    B, T, h_size = 2, 8, 16          # LSTM input size = 8*h_size = 128
    D2 = 2 * h_size                  # H / U_toggler / H_toggler feature dim

    key = jax.random.PRNGKey(0)
    k_h, k_u, k_ht, k_p = jax.random.split(key, 4)
    H = jax.random.normal(k_h, (B, T, D2), jnp.float32)
    U_toggler = jax.random.normal(k_u, (B, T, D2), jnp.float32)
    H_toggler = jax.random.normal(k_ht, (B, T, D2), jnp.float32)

    kernel_params, ref_params = init_lstm_params(k_p, h_size)

    fwd = jax.jit(modeling_layer_forward, static_argnums=(4,))
    G, M = fwd(U_toggler, H_toggler, H, kernel_params, h_size)
    G = jax.block_until_ready(G)
    M = jax.block_until_ready(M)

    assert G.shape == (B, T, 8 * h_size)
    assert M.shape == (B, T, 2 * h_size)

    # Sanity check vs pure-f32 JAX reference.
    G_ref, M_ref = ref_forward(U_toggler, H_toggler, H, ref_params, h_size)
    assert jnp.allclose(G, G_ref, atol=1e-5, rtol=1e-5)
    # Kernel uses bf16 MXU operands (f32 accumulation) per the perf guidance,
    # so allow bf16-level deviation from the f32 reference.
    assert jnp.allclose(M, M_ref, atol=5e-2, rtol=5e-2), \
        float(jnp.max(jnp.abs(M - M_ref)))

    print("KERNEL_OK")
</pallas_src>

<mosaic_0001>
module attributes {stable_mosaic.version = 11 : i64} {
  func.func @_g_kernel(%arg0: memref<2x8x32xf32, #tpu.memory_space<vmem>>, %arg1: memref<2x8x32xf32, #tpu.memory_space<vmem>>, %arg2: memref<2x8x32xf32, #tpu.memory_space<vmem>>, %arg3: memref<2x8x128xf32, #tpu.memory_space<vmem>>) attributes {dimension_semantics = [], scalar_prefetch = 0 : i64, scratch_operands = 0 : i64, tpu.core_type = #tpu.core_type<tc>} {
    %c0 = arith.constant 0 : index
    %c0_0 = arith.constant 0 : index
    %c0_1 = arith.constant 0 : index
    %0 = vector.load %arg0[%c0, %c0_0, %c0_1] : memref<2x8x32xf32, #tpu.memory_space<vmem>>, vector<2x8x32xf32>
    %c0_2 = arith.constant 0 : index
    %c0_3 = arith.constant 0 : index
    %c0_4 = arith.constant 0 : index
    %1 = vector.load %arg1[%c0_2, %c0_3, %c0_4] : memref<2x8x32xf32, #tpu.memory_space<vmem>>, vector<2x8x32xf32>
    %c0_5 = arith.constant 0 : index
    %c0_6 = arith.constant 0 : index
    %c0_7 = arith.constant 0 : index
    %2 = vector.load %arg2[%c0_5, %c0_6, %c0_7] : memref<2x8x32xf32, #tpu.memory_space<vmem>>, vector<2x8x32xf32>
    %3 = arith.mulf %0, %1 : vector<2x8x32xf32>
    %4 = arith.mulf %0, %2 : vector<2x8x32xf32>
    %5 = tpu.concatenate %0, %1, %3, %4 in 2 : vector<2x8x32xf32>, vector<2x8x32xf32>, vector<2x8x32xf32>, vector<2x8x32xf32> -> vector<2x8x128xf32>
    %c0_8 = arith.constant 0 : index
    %c0_9 = arith.constant 0 : index
    %c0_10 = arith.constant 0 : index
    %6 = vector.load %arg3[%c0_8, %c0_9, %c0_10] : memref<2x8x128xf32, #tpu.memory_space<vmem>>, vector<2x8x128xf32>
    tpu.vector_store %arg3[%c0_8, %c0_9, %c0_10], %5 {strides = array<i32>} : memref<2x8x128xf32, #tpu.memory_space<vmem>>, vector<2x8x128xf32>,
    return
  }
}

module attributes {stable_mosaic.version = 11 : i64} {
  func.func @kernel(%arg0: memref<16x32xf32, #tpu.memory_space<vmem>>, %arg1: memref<32x128xbf16, #tpu.memory_space<vmem>>, %arg2: memref<16x64xbf16, #tpu.memory_space<vmem>>, %arg3: memref<16x64xbf16, #tpu.memory_space<vmem>>, %arg4: memref<1x128xf32, #tpu.memory_space<vmem>>, %arg5: memref<16x32xf32, #tpu.memory_space<vmem>>, %arg6: memref<16x128xf32, #tpu.memory_space<vmem>>) attributes {dimension_semantics = [], scalar_prefetch = 0 : i64, scratch_operands = 1 : i64, tpu.core_type = #tpu.core_type<tc>} {
    %c0 = arith.constant 0 : index
    %c0_0 = arith.constant 0 : index
    %0 = vector.load %arg0[%c0, %c0_0] : memref<16x32xf32, #tpu.memory_space<vmem>>, vector<16x32xf32>
    %1 = arith.truncf %0 : vector<16x32xf32> to vector<16x32xbf16>
    %c0_1 = arith.constant 0 : index
    %c0_2 = arith.constant 0 : index
    %2 = vector.load %arg1[%c0_1, %c0_2] : memref<32x128xbf16, #tpu.memory_space<vmem>>, vector<32x128xbf16>
    %cst = arith.constant dense<0.000000e+00> : vector<16x128xf32>
    %3 = tpu.matmul %1, %2, %cst {dimension_numbers = #tpu.dot_dimension_numbers<[1], [0], [0], [1], [0, 0, 1, 1], [], []>} : vector<16x32xbf16>, vector<32x128xbf16>, vector<16x128xf32> -> vector<16x128xf32>
    %c0_3 = arith.constant 0 : index
    %c0_4 = arith.constant 0 : index
    %4 = vector.load %arg4[%c0_3, %c0_4] : memref<1x128xf32, #tpu.memory_space<vmem>>, vector<1x128xf32>
    %5 = vector.broadcast %4 : vector<1x128xf32> to vector<16x128xf32>
    %6 = arith.addf %3, %5 : vector<16x128xf32>
    %c0_5 = arith.constant 0 : index
    %c0_6 = arith.constant 0 : index
    %7 = vector.load %arg6[%c0_5, %c0_6] : memref<16x128xf32, #tpu.memory_space<vmem>>, vector<16x128xf32>
    tpu.vector_store %arg6[%c0_5, %c0_6], %6 {strides = array<i32>} : memref<16x128xf32, #tpu.memory_space<vmem>>, vector<16x128xf32>,
    %c0_7 = arith.constant 0 : index
    %c0_8 = arith.constant 0 : index
    %8 = vector.load %arg2[%c0_7, %c0_8] : memref<16x64xbf16, #tpu.memory_space<vmem>>, vector<16x64xbf16>
    %c0_9 = arith.constant 0 : index
    %c0_10 = arith.constant 0 : index
    %9 = vector.load %arg3[%c0_9, %c0_10] : memref<16x64xbf16, #tpu.memory_space<vmem>>, vector<16x64xbf16>
    %cst_11 = arith.constant 0.000000e+00 : f32
    %10 = vector.broadcast %cst_11 : f32 to vector<2x16xf32>
    %c0_12 = arith.constant 0 : index
    %c0_13 = arith.constant 0 : index
    %11 = vector.load %arg6[%c0_12, %c0_13] : memref<16x128xf32, #tpu.memory_space<vmem>>, vector<2x64xf32>
    %12 = arith.truncf %10 : vector<2x16xf32> to vector<2x16xbf16>
    %cst_14 = arith.constant dense<0.000000e+00> : vector<2x64xf32>
    %13 = tpu.matmul %12, %8, %cst_14 {dimension_numbers = #tpu.dot_dimension_numbers<[1], [0], [0], [1], [0, 0, 1, 1], [], []>} : vector<2x16xbf16>, vector<16x64xbf16>, vector<2x64xf32> -> vector<2x64xf32>
    %14 = arith.addf %11, %13 : vector<2x64xf32>
    %15 = arith.negf %14 : vector<2x64xf32>
    %16 = math.exp %15 : vector<2x64xf32>
    %cst_15 = arith.constant 1.000000e+00 : f32
    %17 = vector.broadcast %cst_15 : f32 to vector<2x64xf32>
    %18 = arith.addf %17, %16 : vector<2x64xf32>
    %19 = arith.divf %17, %18 : vector<2x64xf32>
    %20 = vector.extract_strided_slice %14 {offsets = [0, 32], sizes = [2, 16], strides = [1, 1]} : vector<2x64xf32> to vector<2x16xf32>
    %21 = math.tanh %20 : vector<2x16xf32>
    %22 = vector.extract_strided_slice %19 {offsets = [0, 16], sizes = [2, 16], strides = [1, 1]} : vector<2x64xf32> to vector<2x16xf32>
    %23 = arith.mulf %22, %10 : vector<2x16xf32>
    %24 = vector.extract_strided_slice %19 {offsets = [0, 0], sizes = [2, 16], strides = [1, 1]} : vector<2x64xf32> to vector<2x16xf32>
    %25 = arith.mulf %24, %21 : vector<2x16xf32>
    %26 = arith.addf %23, %25 : vector<2x16xf32>
    %27 = vector.extract_strided_slice %19 {offsets = [0, 48], sizes = [2, 16], strides = [1, 1]} : vector<2x64xf32> to vector<2x16xf32>
    %28 = math.tanh %26 : vector<2x16xf32>
    %29 = arith.mulf %27, %28 : vector<2x16xf32>
    %c14 = arith.constant 14 : index
    %c64 = arith.constant 64 : index
    %30 = vector.load %arg6[%c14, %c64] : memref<16x128xf32, #tpu.memory_space<vmem>>, vector<2x64xf32>
    %31 = arith.truncf %10 : vector<2x16xf32> to vector<2x16xbf16>
    %cst_16 = arith.constant dense<0.000000e+00> : vector<2x64xf32>
    %32 = tpu.matmul %31, %9, %cst_16 {dimension_numbers = #tpu.dot_dimension_numbers<[1], [0], [0], [1], [0, 0, 1, 1], [], []>} : vector<2x16xbf16>, vector<16x64xbf16>, vector<2x64xf32> -> vector<2x64xf32>
    %33 = arith.addf %30, %32 : vector<2x64xf32>
    %34 = arith.negf %33 : vector<2x64xf32>
    %35 = math.exp %34 : vector<2x64xf32>
    %cst_17 = arith.constant 1.000000e+00 : f32
    %36 = vector.broadcast %cst_17 : f32 to vector<2x64xf32>
    %37 = arith.addf %36, %35 : vector<2x64xf32>
    %38 = arith.divf %36, %37 : vector<2x64xf32>
    %39 = vector.extract_strided_slice %33 {offsets = [0, 32], sizes = [2, 16], strides = [1, 1]} : vector<2x64xf32> to vector<2x16xf32>
    %40 = math.tanh %39 : vector<2x16xf32>
    %41 = vector.extract_strided_slice %38 {offsets = [0, 16], sizes = [2, 16], strides = [1, 1]} : vector<2x64xf32> to vector<2x16xf32>
    %42 = arith.mulf %41, %10 : vector<2x16xf32>
    %43 = vector.extract_strided_slice %38 {offsets = [0, 0], sizes = [2, 16], strides = [1, 1]} : vector<2x64xf32> to vector<2x16xf32>
    %44 = arith.mulf %43, %40 : vector<2x16xf32>
    %45 = arith.addf %42, %44 : vector<2x16xf32>
    %46 = vector.extract_strided_slice %38 {offsets = [0, 48], sizes = [2, 16], strides = [1, 1]} : vector<2x64xf32> to vector<2x16xf32>
    %47 = math.tanh %45 : vector<2x16xf32>
    %48 = arith.mulf %46, %47 : vector<2x16xf32>
    %c0_18 = arith.constant 0 : index
    %c0_19 = arith.constant 0 : index
    %49 = vector.load %arg5[%c0_18, %c0_19] : memref<16x32xf32, #tpu.memory_space<vmem>>, vector<2x16xf32>
    tpu.vector_store %arg5[%c0_18, %c0_19], %29 {strides = array<i32>} : memref<16x32xf32, #tpu.memory_space<vmem>>, vector<2x16xf32>,
    %c14_20 = arith.constant 14 : index
    %c16 = arith.constant 16 : index
    %50 = vector.load %arg5[%c14_20, %c16] : memref<16x32xf32, #tpu.memory_space<vmem>>, vector<2x16xf32>
    tpu.vector_store %arg5[%c14_20, %c16], %48 {strides = array<i32>} : memref<16x32xf32, #tpu.memory_space<vmem>>, vector<2x16xf32>,
    %c2 = arith.constant 2 : index
    %c0_21 = arith.constant 0 : index
    %51 = vector.load %arg6[%c2, %c0_21] : memref<16x128xf32, #tpu.memory_space<vmem>>, vector<2x64xf32>
    %52 = arith.truncf %29 : vector<2x16xf32> to vector<2x16xbf16>
    %cst_22 = arith.constant dense<0.000000e+00> : vector<2x64xf32>
    %53 = tpu.matmul %52, %8, %cst_22 {dimension_numbers = #tpu.dot_dimension_numbers<[1], [0], [0], [1], [0, 0, 1, 1], [], []>} : vector<2x16xbf16>, vector<16x64xbf16>, vector<2x64xf32> -> vector<2x64xf32>
    %54 = arith.addf %51, %53 : vector<2x64xf32>
    %55 = arith.negf %54 : vector<2x64xf32>
    %56 = math.exp %55 : vector<2x64xf32>
    %cst_23 = arith.constant 1.000000e+00 : f32
    %57 = vector.broadcast %cst_23 : f32 to vector<2x64xf32>
    %58 = arith.addf %57, %56 : vector<2x64xf32>
    %59 = arith.divf %57, %58 : vector<2x64xf32>
    %60 = vector.extract_strided_slice %54 {offsets = [0, 32], sizes = [2, 16], strides = [1, 1]} : vector<2x64xf32> to vector<2x16xf32>
    %61 = math.tanh %60 : vector<2x16xf32>
    %62 = vector.extract_strided_slice %59 {offsets = [0, 16], sizes = [2, 16], strides = [1, 1]} : vector<2x64xf32> to vector<2x16xf32>
    %63 = arith.mulf %62, %26 : vector<2x16xf32>
    %64 = vector.extract_strided_slice %59 {offsets = [0, 0], sizes = [2, 16], strides = [1, 1]} : vector<2x64xf32> to vector<2x16xf32>
    %65 = arith.mulf %64, %61 : vector<2x16xf32>
    %66 = arith.addf %63, %65 : vector<2x16xf32>
    %67 = vector.extract_strided_slice %59 {offsets = [0, 48], sizes = [2, 16], strides = [1, 1]} : vector<2x64xf32> to vector<2x16xf32>
    %68 = math.tanh %66 : vector<2x16xf32>
    %69 = arith.mulf %67, %68 : vector<2x16xf32>
    %c12 = arith.constant 12 : index
    %c64_24 = arith.constant 64 : index
    %70 = vector.load %arg6[%c12, %c64_24] : memref<16x128xf32, #tpu.memory_space<vmem>>, vector<2x64xf32>
    %71 = arith.truncf %48 : vector<2x16xf32> to vector<2x16xbf16>
    %cst_25 = arith.constant dense<0.000000e+00> : vector<2x64xf32>
    %72 = tpu.matmul %71, %9, %cst_25 {dimension_numbers = #tpu.dot_dimension_numbers<[1], [0], [0], [1], [0, 0, 1, 1], [], []>} : vector<2x16xbf16>, vector<16x64xbf16>, vector<2x64xf32> -> vector<2x64xf32>
    %73 = arith.addf %70, %72 : vector<2x64xf32>
    %74 = arith.negf %73 : vector<2x64xf32>
    %75 = math.exp %74 : vector<2x64xf32>
    %cst_26 = arith.constant 1.000000e+00 : f32
    %76 = vector.broadcast %cst_26 : f32 to vector<2x64xf32>
    %77 = arith.addf %76, %75 : vector<2x64xf32>
    %78 = arith.divf %76, %77 : vector<2x64xf32>
    %79 = vector.extract_strided_slice %73 {offsets = [0, 32], sizes = [2, 16], strides = [1, 1]} : vector<2x64xf32> to vector<2x16xf32>
    %80 = math.tanh %79 : vector<2x16xf32>
    %81 = vector.extract_strided_slice %78 {offsets = [0, 16], sizes = [2, 16], strides = [1, 1]} : vector<2x64xf32> to vector<2x16xf32>
    %82 = arith.mulf %81, %45 : vector<2x16xf32>
    %83 = vector.extract_strided_slice %78 {offsets = [0, 0], sizes = [2, 16], strides = [1, 1]} : vector<2x64xf32> to vector<2x16xf32>
    %84 = arith.mulf %83, %80 : vector<2x16xf32>
    %85 = arith.addf %82, %84 : vector<2x16xf32>
    %86 = vector.extract_strided_slice %78 {offsets = [0, 48], sizes = [2, 16], strides = [1, 1]} : vector<2x64xf32> to vector<2x16xf32>
    %87 = math.tanh %85 : vector<2x16xf32>
    %88 = arith.mulf %86, %87 : vector<2x16xf32>
    %c2_27 = arith.constant 2 : index
    %c0_28 = arith.constant 0 : index
    %89 = vector.load %arg5[%c2_27, %c0_28] : memref<16x32xf32, #tpu.memory_space<vmem>>, vector<2x16xf32>
    tpu.vector_store %arg5[%c2_27, %c0_28], %69 {strides = array<i32>} : memref<16x32xf32, #tpu.memory_space<vmem>>, vector<2x16xf32>,
    %c12_29 = arith.constant 12 : index
    %c16_30 = arith.constant 16 : index
    %90 = vector.load %arg5[%c12_29, %c16_30] : memref<16x32xf32, #tpu.memory_space<vmem>>, vector<2x16xf32>
    tpu.vector_store %arg5[%c12_29, %c16_30], %88 {strides = array<i32>} : memref<16x32xf32, #tpu.memory_space<vmem>>, vector<2x16xf32>,
    %c4 = arith.constant 4 : index
    %c0_31 = arith.constant 0 : index
    %91 = vector.load %arg6[%c4, %c0_31] : memref<16x128xf32, #tpu.memory_space<vmem>>, vector<2x64xf32>
    %92 = arith.truncf %69 : vector<2x16xf32> to vector<2x16xbf16>
    %cst_32 = arith.constant dense<0.000000e+00> : vector<2x64xf32>
    %93 = tpu.matmul %92, %8, %cst_32 {dimension_numbers = #tpu.dot_dimension_numbers<[1], [0], [0], [1], [0, 0, 1, 1], [], []>} : vector<2x16xbf16>, vector<16x64xbf16>, vector<2x64xf32> -> vector<2x64xf32>
    %94 = arith.addf %91, %93 : vector<2x64xf32>
    %95 = arith.negf %94 : vector<2x64xf32>
    %96 = math.exp %95 : vector<2x64xf32>
    %cst_33 = arith.constant 1.000000e+00 : f32
    %97 = vector.broadcast %cst_33 : f32 to vector<2x64xf32>
    %98 = arith.addf %97, %96 : vector<2x64xf32>
    %99 = arith.divf %97, %98 : vector<2x64xf32>
    %100 = vector.extract_strided_slice %94 {offsets = [0, 32], sizes = [2, 16], strides = [1, 1]} : vector<2x64xf32> to vector<2x16xf32>
    %101 = math.tanh %100 : vector<2x16xf32>
    %102 = vector.extract_strided_slice %99 {offsets = [0, 16], sizes = [2, 16], strides = [1, 1]} : vector<2x64xf32> to vector<2x16xf32>
    %103 = arith.mulf %102, %66 : vector<2x16xf32>
    %104 = vector.extract_strided_slice %99 {offsets = [0, 0], sizes = [2, 16], strides = [1, 1]} : vector<2x64xf32> to vector<2x16xf32>
    %105 = arith.mulf %104, %101 : vector<2x16xf32>
    %106 = arith.addf %103, %105 : vector<2x16xf32>
    %107 = vector.extract_strided_slice %99 {offsets = [0, 48], sizes = [2, 16], strides = [1, 1]} : vector<2x64xf32> to vector<2x16xf32>
    %108 = math.tanh %106 : vector<2x16xf32>
    %109 = arith.mulf %107, %108 : vector<2x16xf32>
    %c10 = arith.constant 10 : index
    %c64_34 = arith.constant 64 : index
    %110 = vector.load %arg6[%c10, %c64_34] : memref<16x128xf32, #tpu.memory_space<vmem>>, vector<2x64xf32>
    %111 = arith.truncf %88 : vector<2x16xf32> to vector<2x16xbf16>
    %cst_35 = arith.constant dense<0.000000e+00> : vector<2x64xf32>
    %112 = tpu.matmul %111, %9, %cst_35 {dimension_numbers = #tpu.dot_dimension_numbers<[1], [0], [0], [1], [0, 0, 1, 1], [], []>} : vector<2x16xbf16>, vector<16x64xbf16>, vector<2x64xf32> -> vector<2x64xf32>
    %113 = arith.addf %110, %112 : vector<2x64xf32>
    %114 = arith.negf %113 : vector<2x64xf32>
    %115 = math.exp %114 : vector<2x64xf32>
    %cst_36 = arith.constant 1.000000e+00 : f32
    %116 = vector.broadcast %cst_36 : f32 to vector<2x64xf32>
    %117 = arith.addf %116, %115 : vector<2x64xf32>
    %118 = arith.divf %116, %117 : vector<2x64xf32>
    %119 = vector.extract_strided_slice %113 {offsets = [0, 32], sizes = [2, 16], strides = [1, 1]} : vector<2x64xf32> to vector<2x16xf32>
    %120 = math.tanh %119 : vector<2x16xf32>
    %121 = vector.extract_strided_slice %118 {offsets = [0, 16], sizes = [2, 16], strides = [1, 1]} : vector<2x64xf32> to vector<2x16xf32>
    %122 = arith.mulf %121, %85 : vector<2x16xf32>
    %123 = vector.extract_strided_slice %118 {offsets = [0, 0], sizes = [2, 16], strides = [1, 1]} : vector<2x64xf32> to vector<2x16xf32>
    %124 = arith.mulf %123, %120 : vector<2x16xf32>
    %125 = arith.addf %122, %124 : vector<2x16xf32>
    %126 = vector.extract_strided_slice %118 {offsets = [0, 48], sizes = [2, 16], strides = [1, 1]} : vector<2x64xf32> to vector<2x16xf32>
    %127 = math.tanh %125 : vector<2x16xf32>
    %128 = arith.mulf %126, %127 : vector<2x16xf32>
    %c4_37 = arith.constant 4 : index
    %c0_38 = arith.constant 0 : index
    %129 = vector.load %arg5[%c4_37, %c0_38] : memref<16x32xf32, #tpu.memory_space<vmem>>, vector<2x16xf32>
    tpu.vector_store %arg5[%c4_37, %c0_38], %109 {strides = array<i32>} : memref<16x32xf32, #tpu.memory_space<vmem>>, vector<2x16xf32>,
    %c10_39 = arith.constant 10 : index
    %c16_40 = arith.constant 16 : index
    %130 = vector.load %arg5[%c10_39, %c16_40] : memref<16x32xf32, #tpu.memory_space<vmem>>, vector<2x16xf32>
    tpu.vector_store %arg5[%c10_39, %c16_40], %128 {strides = array<i32>} : memref<16x32xf32, #tpu.memory_space<vmem>>, vector<2x16xf32>,
    %c6 = arith.constant 6 : index
    %c0_41 = arith.constant 0 : index
    %131 = vector.load %arg6[%c6, %c0_41] : memref<16x128xf32, #tpu.memory_space<vmem>>, vector<2x64xf32>
    %132 = arith.truncf %109 : vector<2x16xf32> to vector<2x16xbf16>
    %cst_42 = arith.constant dense<0.000000e+00> : vector<2x64xf32>
    %133 = tpu.matmul %132, %8, %cst_42 {dimension_numbers = #tpu.dot_dimension_numbers<[1], [0], [0], [1], [0, 0, 1, 1], [], []>} : vector<2x16xbf16>, vector<16x64xbf16>, vector<2x64xf32> -> vector<2x64xf32>
    %134 = arith.addf %131, %133 : vector<2x64xf32>
    %135 = arith.negf %134 : vector<2x64xf32>
    %136 = math.exp %135 : vector<2x64xf32>
    %cst_43 = arith.constant 1.000000e+00 : f32
    %137 = vector.broadcast %cst_43 : f32 to vector<2x64xf32>
    %138 = arith.addf %137, %136 : vector<2x64xf32>
    %139 = arith.divf %137, %138 : vector<2x64xf32>
    %140 = vector.extract_strided_slice %134 {offsets = [0, 32], sizes = [2, 16], strides = [1, 1]} : vector<2x64xf32> to vector<2x16xf32>
    %141 = math.tanh %140 : vector<2x16xf32>
    %142 = vector.extract_strided_slice %139 {offsets = [0, 16], sizes = [2, 16], strides = [1, 1]} : vector<2x64xf32> to vector<2x16xf32>
    %143 = arith.mulf %142, %106 : vector<2x16xf32>
    %144 = vector.extract_strided_slice %139 {offsets = [0, 0], sizes = [2, 16], strides = [1, 1]} : vector<2x64xf32> to vector<2x16xf32>
    %145 = arith.mulf %144, %141 : vector<2x16xf32>
    %146 = arith.addf %143, %145 : vector<2x16xf32>
    %147 = vector.extract_strided_slice %139 {offsets = [0, 48], sizes = [2, 16], strides = [1, 1]} : vector<2x64xf32> to vector<2x16xf32>
    %148 = math.tanh %146 : vector<2x16xf32>
    %149 = arith.mulf %147, %148 : vector<2x16xf32>
    %c8 = arith.constant 8 : index
    %c64_44 = arith.constant 64 : index
    %150 = vector.load %arg6[%c8, %c64_44] : memref<16x128xf32, #tpu.memory_space<vmem>>, vector<2x64xf32>
    %151 = arith.truncf %128 : vector<2x16xf32> to vector<2x16xbf16>
    %cst_45 = arith.constant dense<0.000000e+00> : vector<2x64xf32>
    %152 = tpu.matmul %151, %9, %cst_45 {dimension_numbers = #tpu.dot_dimension_numbers<[1], [0], [0], [1], [0, 0, 1, 1], [], []>} : vector<2x16xbf16>, vector<16x64xbf16>, vector<2x64xf32> -> vector<2x64xf32>
    %153 = arith.addf %150, %152 : vector<2x64xf32>
    %154 = arith.negf %153 : vector<2x64xf32>
    %155 = math.exp %154 : vector<2x64xf32>
    %cst_46 = arith.constant 1.000000e+00 : f32
    %156 = vector.broadcast %cst_46 : f32 to vector<2x64xf32>
    %157 = arith.addf %156, %155 : vector<2x64xf32>
    %158 = arith.divf %156, %157 : vector<2x64xf32>
    %159 = vector.extract_strided_slice %153 {offsets = [0, 32], sizes = [2, 16], strides = [1, 1]} : vector<2x64xf32> to vector<2x16xf32>
    %160 = math.tanh %159 : vector<2x16xf32>
    %161 = vector.extract_strided_slice %158 {offsets = [0, 16], sizes = [2, 16], strides = [1, 1]} : vector<2x64xf32> to vector<2x16xf32>
    %162 = arith.mulf %161, %125 : vector<2x16xf32>
    %163 = vector.extract_strided_slice %158 {offsets = [0, 0], sizes = [2, 16], strides = [1, 1]} : vector<2x64xf32> to vector<2x16xf32>
    %164 = arith.mulf %163, %160 : vector<2x16xf32>
    %165 = arith.addf %162, %164 : vector<2x16xf32>
    %166 = vector.extract_strided_slice %158 {offsets = [0, 48], sizes = [2, 16], strides = [1, 1]} : vector<2x64xf32> to vector<2x16xf32>
    %167 = math.tanh %165 : vector<2x16xf32>
    %168 = arith.mulf %166, %167 : vector<2x16xf32>
    %c6_47 = arith.constant 6 : index
    %c0_48 = arith.constant 0 : index
    %169 = vector.load %arg5[%c6_47, %c0_48] : memref<16x32xf32, #tpu.memory_space<vmem>>, vector<2x16xf32>
    tpu.vector_store %arg5[%c6_47, %c0_48], %149 {strides = array<i32>} : memref<16x32xf32, #tpu.memory_space<vmem>>, vector<2x16xf32>,
    %c8_49 = arith.constant 8 : index
    %c16_50 = arith.constant 16 : index
    %170 = vector.load %arg5[%c8_49, %c16_50] : memref<16x32xf32, #tpu.memory_space<vmem>>, vector<2x16xf32>
    tpu.vector_store %arg5[%c8_49, %c16_50], %168 {strides = array<i32>} : memref<16x32xf32, #tpu.memory_space<vmem>>, vector<2x16xf32>,
    %c8_51 = arith.constant 8 : index
    %c0_52 = arith.constant 0 : index
    %171 = vector.load %arg6[%c8_51, %c0_52] : memref<16x128xf32, #tpu.memory_space<vmem>>, vector<2x64xf32>
    %172 = arith.truncf %149 : vector<2x16xf32> to vector<2x16xbf16>
    %cst_53 = arith.constant dense<0.000000e+00> : vector<2x64xf32>
    %173 = tpu.matmul %172, %8, %cst_53 {dimension_numbers = #tpu.dot_dimension_numbers<[1], [0], [0], [1], [0, 0, 1, 1], [], []>} : vector<2x16xbf16>, vector<16x64xbf16>, vector<2x64xf32> -> vector<2x64xf32>
    %174 = arith.addf %171, %173 : vector<2x64xf32>
    %175 = arith.negf %174 : vector<2x64xf32>
    %176 = math.exp %175 : vector<2x64xf32>
    %cst_54 = arith.constant 1.000000e+00 : f32
    %177 = vector.broadcast %cst_54 : f32 to vector<2x64xf32>
    %178 = arith.addf %177, %176 : vector<2x64xf32>
    %179 = arith.divf %177, %178 : vector<2x64xf32>
    %180 = vector.extract_strided_slice %174 {offsets = [0, 32], sizes = [2, 16], strides = [1, 1]} : vector<2x64xf32> to vector<2x16xf32>
    %181 = math.tanh %180 : vector<2x16xf32>
    %182 = vector.extract_strided_slice %179 {offsets = [0, 16], sizes = [2, 16], strides = [1, 1]} : vector<2x64xf32> to vector<2x16xf32>
    %183 = arith.mulf %182, %146 : vector<2x16xf32>
    %184 = vector.extract_strided_slice %179 {offsets = [0, 0], sizes = [2, 16], strides = [1, 1]} : vector<2x64xf32> to vector<2x16xf32>
    %185 = arith.mulf %184, %181 : vector<2x16xf32>
    %186 = arith.addf %183, %185 : vector<2x16xf32>
    %187 = vector.extract_strided_slice %179 {offsets = [0, 48], sizes = [2, 16], strides = [1, 1]} : vector<2x64xf32> to vector<2x16xf32>
    %188 = math.tanh %186 : vector<2x16xf32>
    %189 = arith.mulf %187, %188 : vector<2x16xf32>
    %c6_55 = arith.constant 6 : index
    %c64_56 = arith.constant 64 : index
    %190 = vector.load %arg6[%c6_55, %c64_56] : memref<16x128xf32, #tpu.memory_space<vmem>>, vector<2x64xf32>
    %191 = arith.truncf %168 : vector<2x16xf32> to vector<2x16xbf16>
    %cst_57 = arith.constant dense<0.000000e+00> : vector<2x64xf32>
    %192 = tpu.matmul %191, %9, %cst_57 {dimension_numbers = #tpu.dot_dimension_numbers<[1], [0], [0], [1], [0, 0, 1, 1], [], []>} : vector<2x16xbf16>, vector<16x64xbf16>, vector<2x64xf32> -> vector<2x64xf32>
    %193 = arith.addf %190, %192 : vector<2x64xf32>
    %194 = arith.negf %193 : vector<2x64xf32>
    %195 = math.exp %194 : vector<2x64xf32>
    %cst_58 = arith.constant 1.000000e+00 : f32
    %196 = vector.broadcast %cst_58 : f32 to vector<2x64xf32>
    %197 = arith.addf %196, %195 : vector<2x64xf32>
    %198 = arith.divf %196, %197 : vector<2x64xf32>
    %199 = vector.extract_strided_slice %193 {offsets = [0, 32], sizes = [2, 16], strides = [1, 1]} : vector<2x64xf32> to vector<2x16xf32>
    %200 = math.tanh %199 : vector<2x16xf32>
    %201 = vector.extract_strided_slice %198 {offsets = [0, 16], sizes = [2, 16], strides = [1, 1]} : vector<2x64xf32> to vector<2x16xf32>
    %202 = arith.mulf %201, %165 : vector<2x16xf32>
    %203 = vector.extract_strided_slice %198 {offsets = [0, 0], sizes = [2, 16], strides = [1, 1]} : vector<2x64xf32> to vector<2x16xf32>
    %204 = arith.mulf %203, %200 : vector<2x16xf32>
    %205 = arith.addf %202, %204 : vector<2x16xf32>
    %206 = vector.extract_strided_slice %198 {offsets = [0, 48], sizes = [2, 16], strides = [1, 1]} : vector<2x64xf32> to vector<2x16xf32>
    %207 = math.tanh %205 : vector<2x16xf32>
    %208 = arith.mulf %206, %207 : vector<2x16xf32>
    %c8_59 = arith.constant 8 : index
    %c0_60 = arith.constant 0 : index
    %209 = vector.load %arg5[%c8_59, %c0_60] : memref<16x32xf32, #tpu.memory_space<vmem>>, vector<2x16xf32>
    tpu.vector_store %arg5[%c8_59, %c0_60], %189 {strides = array<i32>} : memref<16x32xf32, #tpu.memory_space<vmem>>, vector<2x16xf32>,
    %c6_61 = arith.constant 6 : index
    %c16_62 = arith.constant 16 : index
    %210 = vector.load %arg5[%c6_61, %c16_62] : memref<16x32xf32, #tpu.memory_space<vmem>>, vector<2x16xf32>
    tpu.vector_store %arg5[%c6_61, %c16_62], %208 {strides = array<i32>} : memref<16x32xf32, #tpu.memory_space<vmem>>, vector<2x16xf32>,
    %c10_63 = arith.constant 10 : index
    %c0_64 = arith.constant 0 : index
    %211 = vector.load %arg6[%c10_63, %c0_64] : memref<16x128xf32, #tpu.memory_space<vmem>>, vector<2x64xf32>
    %212 = arith.truncf %189 : vector<2x16xf32> to vector<2x16xbf16>
    %cst_65 = arith.constant dense<0.000000e+00> : vector<2x64xf32>
    %213 = tpu.matmul %212, %8, %cst_65 {dimension_numbers = #tpu.dot_dimension_numbers<[1], [0], [0], [1], [0, 0, 1, 1], [], []>} : vector<2x16xbf16>, vector<16x64xbf16>, vector<2x64xf32> -> vector<2x64xf32>
    %214 = arith.addf %211, %213 : vector<2x64xf32>
    %215 = arith.negf %214 : vector<2x64xf32>
    %216 = math.exp %215 : vector<2x64xf32>
    %cst_66 = arith.constant 1.000000e+00 : f32
    %217 = vector.broadcast %cst_66 : f32 to vector<2x64xf32>
    %218 = arith.addf %217, %216 : vector<2x64xf32>
    %219 = arith.divf %217, %218 : vector<2x64xf32>
    %220 = vector.extract_strided_slice %214 {offsets = [0, 32], sizes = [2, 16], strides = [1, 1]} : vector<2x64xf32> to vector<2x16xf32>
    %221 = math.tanh %220 : vector<2x16xf32>
    %222 = vector.extract_strided_slice %219 {offsets = [0, 16], sizes = [2, 16], strides = [1, 1]} : vector<2x64xf32> to vector<2x16xf32>
    %223 = arith.mulf %222, %186 : vector<2x16xf32>
    %224 = vector.extract_strided_slice %219 {offsets = [0, 0], sizes = [2, 16], strides = [1, 1]} : vector<2x64xf32> to vector<2x16xf32>
    %225 = arith.mulf %224, %221 : vector<2x16xf32>
    %226 = arith.addf %223, %225 : vector<2x16xf32>
    %227 = vector.extract_strided_slice %219 {offsets = [0, 48], sizes = [2, 16], strides = [1, 1]} : vector<2x64xf32> to vector<2x16xf32>
    %228 = math.tanh %226 : vector<2x16xf32>
    %229 = arith.mulf %227, %228 : vector<2x16xf32>
    %c4_67 = arith.constant 4 : index
    %c64_68 = arith.constant 64 : index
    %230 = vector.load %arg6[%c4_67, %c64_68] : memref<16x128xf32, #tpu.memory_space<vmem>>, vector<2x64xf32>
    %231 = arith.truncf %208 : vector<2x16xf32> to vector<2x16xbf16>
    %cst_69 = arith.constant dense<0.000000e+00> : vector<2x64xf32>
    %232 = tpu.matmul %231, %9, %cst_69 {dimension_numbers = #tpu.dot_dimension_numbers<[1], [0], [0], [1], [0, 0, 1, 1], [], []>} : vector<2x16xbf16>, vector<16x64xbf16>, vector<2x64xf32> -> vector<2x64xf32>
    %233 = arith.addf %230, %232 : vector<2x64xf32>
    %234 = arith.negf %233 : vector<2x64xf32>
    %235 = math.exp %234 : vector<2x64xf32>
    %cst_70 = arith.constant 1.000000e+00 : f32
    %236 = vector.broadcast %cst_70 : f32 to vector<2x64xf32>
    %237 = arith.addf %236, %235 : vector<2x64xf32>
    %238 = arith.divf %236, %237 : vector<2x64xf32>
    %239 = vector.extract_strided_slice %233 {offsets = [0, 32], sizes = [2, 16], strides = [1, 1]} : vector<2x64xf32> to vector<2x16xf32>
    %240 = math.tanh %239 : vector<2x16xf32>
    %241 = vector.extract_strided_slice %238 {offsets = [0, 16], sizes = [2, 16], strides = [1, 1]} : vector<2x64xf32> to vector<2x16xf32>
    %242 = arith.mulf %241, %205 : vector<2x16xf32>
    %243 = vector.extract_strided_slice %238 {offsets = [0, 0], sizes = [2, 16], strides = [1, 1]} : vector<2x64xf32> to vector<2x16xf32>
    %244 = arith.mulf %243, %240 : vector<2x16xf32>
    %245 = arith.addf %242, %244 : vector<2x16xf32>
    %246 = vector.extract_strided_slice %238 {offsets = [0, 48], sizes = [2, 16], strides = [1, 1]} : vector<2x64xf32> to vector<2x16xf32>
    %247 = math.tanh %245 : vector<2x16xf32>
    %248 = arith.mulf %246, %247 : vector<2x16xf32>
    %c10_71 = arith.constant 10 : index
    %c0_72 = arith.constant 0 : index
    %249 = vector.load %arg5[%c10_71, %c0_72] : memref<16x32xf32, #tpu.memory_space<vmem>>, vector<2x16xf32>
    tpu.vector_store %arg5[%c10_71, %c0_72], %229 {strides = array<i32>} : memref<16x32xf32, #tpu.memory_space<vmem>>, vector<2x16xf32>,
    %c4_73 = arith.constant 4 : index
    %c16_74 = arith.constant 16 : index
    %250 = vector.load %arg5[%c4_73, %c16_74] : memref<16x32xf32, #tpu.memory_space<vmem>>, vector<2x16xf32>
    tpu.vector_store %arg5[%c4_73, %c16_74], %248 {strides = array<i32>} : memref<16x32xf32, #tpu.memory_space<vmem>>, vector<2x16xf32>,
    %c12_75 = arith.constant 12 : index
    %c0_76 = arith.constant 0 : index
    %251 = vector.load %arg6[%c12_75, %c0_76] : memref<16x128xf32, #tpu.memory_space<vmem>>, vector<2x64xf32>
    %252 = arith.truncf %229 : vector<2x16xf32> to vector<2x16xbf16>
    %cst_77 = arith.constant dense<0.000000e+00> : vector<2x64xf32>
    %253 = tpu.matmul %252, %8, %cst_77 {dimension_numbers = #tpu.dot_dimension_numbers<[1], [0], [0], [1], [0, 0, 1, 1], [], []>} : vector<2x16xbf16>, vector<16x64xbf16>, vector<2x64xf32> -> vector<2x64xf32>
    %254 = arith.addf %251, %253 : vector<2x64xf32>
    %255 = arith.negf %254 : vector<2x64xf32>
    %256 = math.exp %255 : vector<2x64xf32>
    %cst_78 = arith.constant 1.000000e+00 : f32
    %257 = vector.broadcast %cst_78 : f32 to vector<2x64xf32>
    %258 = arith.addf %257, %256 : vector<2x64xf32>
    %259 = arith.divf %257, %258 : vector<2x64xf32>
    %260 = vector.extract_strided_slice %254 {offsets = [0, 32], sizes = [2, 16], strides = [1, 1]} : vector<2x64xf32> to vector<2x16xf32>
    %261 = math.tanh %260 : vector<2x16xf32>
    %262 = vector.extract_strided_slice %259 {offsets = [0, 16], sizes = [2, 16], strides = [1, 1]} : vector<2x64xf32> to vector<2x16xf32>
    %263 = arith.mulf %262, %226 : vector<2x16xf32>
    %264 = vector.extract_strided_slice %259 {offsets = [0, 0], sizes = [2, 16], strides = [1, 1]} : vector<2x64xf32> to vector<2x16xf32>
    %265 = arith.mulf %264, %261 : vector<2x16xf32>
    %266 = arith.addf %263, %265 : vector<2x16xf32>
    %267 = vector.extract_strided_slice %259 {offsets = [0, 48], sizes = [2, 16], strides = [1, 1]} : vector<2x64xf32> to vector<2x16xf32>
    %268 = math.tanh %266 : vector<2x16xf32>
    %269 = arith.mulf %267, %268 : vector<2x16xf32>
    %c2_79 = arith.constant 2 : index
    %c64_80 = arith.constant 64 : index
    %270 = vector.load %arg6[%c2_79, %c64_80] : memref<16x128xf32, #tpu.memory_space<vmem>>, vector<2x64xf32>
    %271 = arith.truncf %248 : vector<2x16xf32> to vector<2x16xbf16>
    %cst_81 = arith.constant dense<0.000000e+00> : vector<2x64xf32>
    %272 = tpu.matmul %271, %9, %cst_81 {dimension_numbers = #tpu.dot_dimension_numbers<[1], [0], [0], [1], [0, 0, 1, 1], [], []>} : vector<2x16xbf16>, vector<16x64xbf16>, vector<2x64xf32> -> vector<2x64xf32>
    %273 = arith.addf %270, %272 : vector<2x64xf32>
    %274 = arith.negf %273 : vector<2x64xf32>
    %275 = math.exp %274 : vector<2x64xf32>
    %cst_82 = arith.constant 1.000000e+00 : f32
    %276 = vector.broadcast %cst_82 : f32 to vector<2x64xf32>
    %277 = arith.addf %276, %275 : vector<2x64xf32>
    %278 = arith.divf %276, %277 : vector<2x64xf32>
    %279 = vector.extract_strided_slice %273 {offsets = [0, 32], sizes = [2, 16], strides = [1, 1]} : vector<2x64xf32> to vector<2x16xf32>
    %280 = math.tanh %279 : vector<2x16xf32>
    %281 = vector.extract_strided_slice %278 {offsets = [0, 16], sizes = [2, 16], strides = [1, 1]} : vector<2x64xf32> to vector<2x16xf32>
    %282 = arith.mulf %281, %245 : vector<2x16xf32>
    %283 = vector.extract_strided_slice %278 {offsets = [0, 0], sizes = [2, 16], strides = [1, 1]} : vector<2x64xf32> to vector<2x16xf32>
    %284 = arith.mulf %283, %280 : vector<2x16xf32>
    %285 = arith.addf %282, %284 : vector<2x16xf32>
    %286 = vector.extract_strided_slice %278 {offsets = [0, 48], sizes = [2, 16], strides = [1, 1]} : vector<2x64xf32> to vector<2x16xf32>
    %287 = math.tanh %285 : vector<2x16xf32>
    %288 = arith.mulf %286, %287 : vector<2x16xf32>
    %c12_83 = arith.constant 12 : index
    %c0_84 = arith.constant 0 : index
    %289 = vector.load %arg5[%c12_83, %c0_84] : memref<16x32xf32, #tpu.memory_space<vmem>>, vector<2x16xf32>
    tpu.vector_store %arg5[%c12_83, %c0_84], %269 {strides = array<i32>} : memref<16x32xf32, #tpu.memory_space<vmem>>, vector<2x16xf32>,
    %c2_85 = arith.constant 2 : index
    %c16_86 = arith.constant 16 : index
    %290 = vector.load %arg5[%c2_85, %c16_86] : memref<16x32xf32, #tpu.memory_space<vmem>>, vector<2x16xf32>
    tpu.vector_store %arg5[%c2_85, %c16_86], %288 {strides = array<i32>} : memref<16x32xf32, #tpu.memory_space<vmem>>, vector<2x16xf32>,
    %c14_87 = arith.constant 14 : index
    %c0_88 = arith.constant 0 : index
    %291 = vector.load %arg6[%c14_87, %c0_88] : memref<16x128xf32, #tpu.memory_space<vmem>>, vector<2x64xf32>
    %292 = arith.truncf %269 : vector<2x16xf32> to vector<2x16xbf16>
    %cst_89 = arith.constant dense<0.000000e+00> : vector<2x64xf32>
    %293 = tpu.matmul %292, %8, %cst_89 {dimension_numbers = #tpu.dot_dimension_numbers<[1], [0], [0], [1], [0, 0, 1, 1], [], []>} : vector<2x16xbf16>, vector<16x64xbf16>, vector<2x64xf32> -> vector<2x64xf32>
    %294 = arith.addf %291, %293 : vector<2x64xf32>
    %295 = arith.negf %294 : vector<2x64xf32>
    %296 = math.exp %295 : vector<2x64xf32>
    %cst_90 = arith.constant 1.000000e+00 : f32
    %297 = vector.broadcast %cst_90 : f32 to vector<2x64xf32>
    %298 = arith.addf %297, %296 : vector<2x64xf32>
    %299 = arith.divf %297, %298 : vector<2x64xf32>
    %300 = vector.extract_strided_slice %294 {offsets = [0, 32], sizes = [2, 16], strides = [1, 1]} : vector<2x64xf32> to vector<2x16xf32>
    %301 = math.tanh %300 : vector<2x16xf32>
    %302 = vector.extract_strided_slice %299 {offsets = [0, 16], sizes = [2, 16], strides = [1, 1]} : vector<2x64xf32> to vector<2x16xf32>
    %303 = arith.mulf %302, %266 : vector<2x16xf32>
    %304 = vector.extract_strided_slice %299 {offsets = [0, 0], sizes = [2, 16], strides = [1, 1]} : vector<2x64xf32> to vector<2x16xf32>
    %305 = arith.mulf %304, %301 : vector<2x16xf32>
    %306 = arith.addf %303, %305 : vector<2x16xf32>
    %307 = vector.extract_strided_slice %299 {offsets = [0, 48], sizes = [2, 16], strides = [1, 1]} : vector<2x64xf32> to vector<2x16xf32>
    %308 = math.tanh %306 : vector<2x16xf32>
    %309 = arith.mulf %307, %308 : vector<2x16xf32>
    %c0_91 = arith.constant 0 : index
    %c64_92 = arith.constant 64 : index
    %310 = vector.load %arg6[%c0_91, %c64_92] : memref<16x128xf32, #tpu.memory_space<vmem>>, vector<2x64xf32>
    %311 = arith.truncf %288 : vector<2x16xf32> to vector<2x16xbf16>
    %cst_93 = arith.constant dense<0.000000e+00> : vector<2x64xf32>
    %312 = tpu.matmul %311, %9, %cst_93 {dimension_numbers = #tpu.dot_dimension_numbers<[1], [0], [0], [1], [0, 0, 1, 1], [], []>} : vector<2x16xbf16>, vector<16x64xbf16>, vector<2x64xf32> -> vector<2x64xf32>
    %313 = arith.addf %310, %312 : vector<2x64xf32>
    %314 = arith.negf %313 : vector<2x64xf32>
    %315 = math.exp %314 : vector<2x64xf32>
    %cst_94 = arith.constant 1.000000e+00 : f32
    %316 = vector.broadcast %cst_94 : f32 to vector<2x64xf32>
    %317 = arith.addf %316, %315 : vector<2x64xf32>
    %318 = arith.divf %316, %317 : vector<2x64xf32>
    %319 = vector.extract_strided_slice %313 {offsets = [0, 32], sizes = [2, 16], strides = [1, 1]} : vector<2x64xf32> to vector<2x16xf32>
    %320 = math.tanh %319 : vector<2x16xf32>
    %321 = vector.extract_strided_slice %318 {offsets = [0, 16], sizes = [2, 16], strides = [1, 1]} : vector<2x64xf32> to vector<2x16xf32>
    %322 = arith.mulf %321, %285 : vector<2x16xf32>
    %323 = vector.extract_strided_slice %318 {offsets = [0, 0], sizes = [2, 16], strides = [1, 1]} : vector<2x64xf32> to vector<2x16xf32>
    %324 = arith.mulf %323, %320 : vector<2x16xf32>
    %325 = arith.addf %322, %324 : vector<2x16xf32>
    %326 = vector.extract_strided_slice %318 {offsets = [0, 48], sizes = [2, 16], strides = [1, 1]} : vector<2x64xf32> to vector<2x16xf32>
    %327 = math.tanh %325 : vector<2x16xf32>
    %328 = arith.mulf %326, %327 : vector<2x16xf32>
    %c14_95 = arith.constant 14 : index
    %c0_96 = arith.constant 0 : index
    %329 = vector.load %arg5[%c14_95, %c0_96] : memref<16x32xf32, #tpu.memory_space<vmem>>, vector<2x16xf32>
    tpu.vector_store %arg5[%c14_95, %c0_96], %309 {strides = array<i32>} : memref<16x32xf32, #tpu.memory_space<vmem>>, vector<2x16xf32>,
    %c0_97 = arith.constant 0 : index
    %c16_98 = arith.constant 16 : index
    %330 = vector.load %arg5[%c0_97, %c16_98] : memref<16x32xf32, #tpu.memory_space<vmem>>, vector<2x16xf32>
    tpu.vector_store %arg5[%c0_97, %c16_98], %328 {strides = array<i32>} : memref<16x32xf32, #tpu.memory_space<vmem>>, vector<2x16xf32>,
    return
  }
}

module attributes {stable_mosaic.version = 11 : i64} {
  func.func @kernel(%arg0: memref<16x128xf32, #tpu.memory_space<vmem>>, %arg1: memref<128x128xbf16, #tpu.memory_space<vmem>>, %arg2: memref<16x64xbf16, #tpu.memory_space<vmem>>, %arg3: memref<16x64xbf16, #tpu.memory_space<vmem>>, %arg4: memref<1x128xf32, #tpu.memory_space<vmem>>, %arg5: memref<16x32xf32, #tpu.memory_space<vmem>>, %arg6: memref<16x128xf32, #tpu.memory_space<vmem>>) attributes {dimension_semantics = [], scalar_prefetch = 0 : i64, scratch_operands = 1 : i64, tpu.core_type = #tpu.core_type<tc>} {
    %c0 = arith.constant 0 : index
    %c0_0 = arith.constant 0 : index
    %0 = vector.load %arg0[%c0, %c0_0] : memref<16x128xf32, #tpu.memory_space<vmem>>, vector<16x128xf32>
    %1 = arith.truncf %0 : vector<16x128xf32> to vector<16x128xbf16>
    %c0_1 = arith.constant 0 : index
    %c0_2 = arith.constant 0 : index
    %2 = vector.load %arg1[%c0_1, %c0_2] : memref<128x128xbf16, #tpu.memory_space<vmem>>, vector<128x128xbf16>
    %cst = arith.constant dense<0.000000e+00> : vector<16x128xf32>
    %3 = tpu.matmul %1, %2, %cst {dimension_numbers = #tpu.dot_dimension_numbers<[1], [0], [0], [1], [0, 0, 1, 1], [], []>} : vector<16x128xbf16>, vector<128x128xbf16>, vector<16x128xf32> -> vector<16x128xf32>
    %c0_3 = arith.constant 0 : index
    %c0_4 = arith.constant 0 : index
    %4 = vector.load %arg4[%c0_3, %c0_4] : memref<1x128xf32, #tpu.memory_space<vmem>>, vector<1x128xf32>
    %5 = vector.broadcast %4 : vector<1x128xf32> to vector<16x128xf32>
    %6 = arith.addf %3, %5 : vector<16x128xf32>
    %c0_5 = arith.constant 0 : index
    %c0_6 = arith.constant 0 : index
    %7 = vector.load %arg6[%c0_5, %c0_6] : memref<16x128xf32, #tpu.memory_space<vmem>>, vector<16x128xf32>
    tpu.vector_store %arg6[%c0_5, %c0_6], %6 {strides = array<i32>} : memref<16x128xf32, #tpu.memory_space<vmem>>, vector<16x128xf32>,
    %c0_7 = arith.constant 0 : index
    %c0_8 = arith.constant 0 : index
    %8 = vector.load %arg2[%c0_7, %c0_8] : memref<16x64xbf16, #tpu.memory_space<vmem>>, vector<16x64xbf16>
    %c0_9 = arith.constant 0 : index
    %c0_10 = arith.constant 0 : index
    %9 = vector.load %arg3[%c0_9, %c0_10] : memref<16x64xbf16, #tpu.memory_space<vmem>>, vector<16x64xbf16>
    %cst_11 = arith.constant 0.000000e+00 : f32
    %10 = vector.broadcast %cst_11 : f32 to vector<2x16xf32>
    %c0_12 = arith.constant 0 : index
    %c0_13 = arith.constant 0 : index
    %11 = vector.load %arg6[%c0_12, %c0_13] : memref<16x128xf32, #tpu.memory_space<vmem>>, vector<2x64xf32>
    %12 = arith.truncf %10 : vector<2x16xf32> to vector<2x16xbf16>
    %cst_14 = arith.constant dense<0.000000e+00> : vector<2x64xf32>
    %13 = tpu.matmul %12, %8, %cst_14 {dimension_numbers = #tpu.dot_dimension_numbers<[1], [0], [0], [1], [0, 0, 1, 1], [], []>} : vector<2x16xbf16>, vector<16x64xbf16>, vector<2x64xf32> -> vector<2x64xf32>
    %14 = arith.addf %11, %13 : vector<2x64xf32>
    %15 = arith.negf %14 : vector<2x64xf32>
    %16 = math.exp %15 : vector<2x64xf32>
    %cst_15 = arith.constant 1.000000e+00 : f32
    %17 = vector.broadcast %cst_15 : f32 to vector<2x64xf32>
    %18 = arith.addf %17, %16 : vector<2x64xf32>
    %19 = arith.divf %17, %18 : vector<2x64xf32>
    %20 = vector.extract_strided_slice %14 {offsets = [0, 32], sizes = [2, 16], strides = [1, 1]} : vector<2x64xf32> to vector<2x16xf32>
    %21 = math.tanh %20 : vector<2x16xf32>
    %22 = vector.extract_strided_slice %19 {offsets = [0, 16], sizes = [2, 16], strides = [1, 1]} : vector<2x64xf32> to vector<2x16xf32>
    %23 = arith.mulf %22, %10 : vector<2x16xf32>
    %24 = vector.extract_strided_slice %19 {offsets = [0, 0], sizes = [2, 16], strides = [1, 1]} : vector<2x64xf32> to vector<2x16xf32>
    %25 = arith.mulf %24, %21 : vector<2x16xf32>
    %26 = arith.addf %23, %25 : vector<2x16xf32>
    %27 = vector.extract_strided_slice %19 {offsets = [0, 48], sizes = [2, 16], strides = [1, 1]} : vector<2x64xf32> to vector<2x16xf32>
    %28 = math.tanh %26 : vector<2x16xf32>
    %29 = arith.mulf %27, %28 : vector<2x16xf32>
    %c14 = arith.constant 14 : index
    %c64 = arith.constant 64 : index
    %30 = vector.load %arg6[%c14, %c64] : memref<16x128xf32, #tpu.memory_space<vmem>>, vector<2x64xf32>
    %31 = arith.truncf %10 : vector<2x16xf32> to vector<2x16xbf16>
    %cst_16 = arith.constant dense<0.000000e+00> : vector<2x64xf32>
    %32 = tpu.matmul %31, %9, %cst_16 {dimension_numbers = #tpu.dot_dimension_numbers<[1], [0], [0], [1], [0, 0, 1, 1], [], []>} : vector<2x16xbf16>, vector<16x64xbf16>, vector<2x64xf32> -> vector<2x64xf32>
    %33 = arith.addf %30, %32 : vector<2x64xf32>
    %34 = arith.negf %33 : vector<2x64xf32>
    %35 = math.exp %34 : vector<2x64xf32>
    %cst_17 = arith.constant 1.000000e+00 : f32
    %36 = vector.broadcast %cst_17 : f32 to vector<2x64xf32>
    %37 = arith.addf %36, %35 : vector<2x64xf32>
    %38 = arith.divf %36, %37 : vector<2x64xf32>
    %39 = vector.extract_strided_slice %33 {offsets = [0, 32], sizes = [2, 16], strides = [1, 1]} : vector<2x64xf32> to vector<2x16xf32>
    %40 = math.tanh %39 : vector<2x16xf32>
    %41 = vector.extract_strided_slice %38 {offsets = [0, 16], sizes = [2, 16], strides = [1, 1]} : vector<2x64xf32> to vector<2x16xf32>
    %42 = arith.mulf %41, %10 : vector<2x16xf32>
    %43 = vector.extract_strided_slice %38 {offsets = [0, 0], sizes = [2, 16], strides = [1, 1]} : vector<2x64xf32> to vector<2x16xf32>
    %44 = arith.mulf %43, %40 : vector<2x16xf32>
    %45 = arith.addf %42, %44 : vector<2x16xf32>
    %46 = vector.extract_strided_slice %38 {offsets = [0, 48], sizes = [2, 16], strides = [1, 1]} : vector<2x64xf32> to vector<2x16xf32>
    %47 = math.tanh %45 : vector<2x16xf32>
    %48 = arith.mulf %46, %47 : vector<2x16xf32>
    %c0_18 = arith.constant 0 : index
    %c0_19 = arith.constant 0 : index
    %49 = vector.load %arg5[%c0_18, %c0_19] : memref<16x32xf32, #tpu.memory_space<vmem>>, vector<2x16xf32>
    tpu.vector_store %arg5[%c0_18, %c0_19], %29 {strides = array<i32>} : memref<16x32xf32, #tpu.memory_space<vmem>>, vector<2x16xf32>,
    %c14_20 = arith.constant 14 : index
    %c16 = arith.constant 16 : index
    %50 = vector.load %arg5[%c14_20, %c16] : memref<16x32xf32, #tpu.memory_space<vmem>>, vector<2x16xf32>
    tpu.vector_store %arg5[%c14_20, %c16], %48 {strides = array<i32>} : memref<16x32xf32, #tpu.memory_space<vmem>>, vector<2x16xf32>,
    %c2 = arith.constant 2 : index
    %c0_21 = arith.constant 0 : index
    %51 = vector.load %arg6[%c2, %c0_21] : memref<16x128xf32, #tpu.memory_space<vmem>>, vector<2x64xf32>
    %52 = arith.truncf %29 : vector<2x16xf32> to vector<2x16xbf16>
    %cst_22 = arith.constant dense<0.000000e+00> : vector<2x64xf32>
    %53 = tpu.matmul %52, %8, %cst_22 {dimension_numbers = #tpu.dot_dimension_numbers<[1], [0], [0], [1], [0, 0, 1, 1], [], []>} : vector<2x16xbf16>, vector<16x64xbf16>, vector<2x64xf32> -> vector<2x64xf32>
    %54 = arith.addf %51, %53 : vector<2x64xf32>
    %55 = arith.negf %54 : vector<2x64xf32>
    %56 = math.exp %55 : vector<2x64xf32>
    %cst_23 = arith.constant 1.000000e+00 : f32
    %57 = vector.broadcast %cst_23 : f32 to vector<2x64xf32>
    %58 = arith.addf %57, %56 : vector<2x64xf32>
    %59 = arith.divf %57, %58 : vector<2x64xf32>
    %60 = vector.extract_strided_slice %54 {offsets = [0, 32], sizes = [2, 16], strides = [1, 1]} : vector<2x64xf32> to vector<2x16xf32>
    %61 = math.tanh %60 : vector<2x16xf32>
    %62 = vector.extract_strided_slice %59 {offsets = [0, 16], sizes = [2, 16], strides = [1, 1]} : vector<2x64xf32> to vector<2x16xf32>
    %63 = arith.mulf %62, %26 : vector<2x16xf32>
    %64 = vector.extract_strided_slice %59 {offsets = [0, 0], sizes = [2, 16], strides = [1, 1]} : vector<2x64xf32> to vector<2x16xf32>
    %65 = arith.mulf %64, %61 : vector<2x16xf32>
    %66 = arith.addf %63, %65 : vector<2x16xf32>
    %67 = vector.extract_strided_slice %59 {offsets = [0, 48], sizes = [2, 16], strides = [1, 1]} : vector<2x64xf32> to vector<2x16xf32>
    %68 = math.tanh %66 : vector<2x16xf32>
    %69 = arith.mulf %67, %68 : vector<2x16xf32>
    %c12 = arith.constant 12 : index
    %c64_24 = arith.constant 64 : index
    %70 = vector.load %arg6[%c12, %c64_24] : memref<16x128xf32, #tpu.memory_space<vmem>>, vector<2x64xf32>
    %71 = arith.truncf %48 : vector<2x16xf32> to vector<2x16xbf16>
    %cst_25 = arith.constant dense<0.000000e+00> : vector<2x64xf32>
    %72 = tpu.matmul %71, %9, %cst_25 {dimension_numbers = #tpu.dot_dimension_numbers<[1], [0], [0], [1], [0, 0, 1, 1], [], []>} : vector<2x16xbf16>, vector<16x64xbf16>, vector<2x64xf32> -> vector<2x64xf32>
    %73 = arith.addf %70, %72 : vector<2x64xf32>
    %74 = arith.negf %73 : vector<2x64xf32>
    %75 = math.exp %74 : vector<2x64xf32>
    %cst_26 = arith.constant 1.000000e+00 : f32
    %76 = vector.broadcast %cst_26 : f32 to vector<2x64xf32>
    %77 = arith.addf %76, %75 : vector<2x64xf32>
    %78 = arith.divf %76, %77 : vector<2x64xf32>
    %79 = vector.extract_strided_slice %73 {offsets = [0, 32], sizes = [2, 16], strides = [1, 1]} : vector<2x64xf32> to vector<2x16xf32>
    %80 = math.tanh %79 : vector<2x16xf32>
    %81 = vector.extract_strided_slice %78 {offsets = [0, 16], sizes = [2, 16], strides = [1, 1]} : vector<2x64xf32> to vector<2x16xf32>
    %82 = arith.mulf %81, %45 : vector<2x16xf32>
    %83 = vector.extract_strided_slice %78 {offsets = [0, 0], sizes = [2, 16], strides = [1, 1]} : vector<2x64xf32> to vector<2x16xf32>
    %84 = arith.mulf %83, %80 : vector<2x16xf32>
    %85 = arith.addf %82, %84 : vector<2x16xf32>
    %86 = vector.extract_strided_slice %78 {offsets = [0, 48], sizes = [2, 16], strides = [1, 1]} : vector<2x64xf32> to vector<2x16xf32>
    %87 = math.tanh %85 : vector<2x16xf32>
    %88 = arith.mulf %86, %87 : vector<2x16xf32>
    %c2_27 = arith.constant 2 : index
    %c0_28 = arith.constant 0 : index
    %89 = vector.load %arg5[%c2_27, %c0_28] : memref<16x32xf32, #tpu.memory_space<vmem>>, vector<2x16xf32>
    tpu.vector_store %arg5[%c2_27, %c0_28], %69 {strides = array<i32>} : memref<16x32xf32, #tpu.memory_space<vmem>>, vector<2x16xf32>,
    %c12_29 = arith.constant 12 : index
    %c16_30 = arith.constant 16 : index
    %90 = vector.load %arg5[%c12_29, %c16_30] : memref<16x32xf32, #tpu.memory_space<vmem>>, vector<2x16xf32>
    tpu.vector_store %arg5[%c12_29, %c16_30], %88 {strides = array<i32>} : memref<16x32xf32, #tpu.memory_space<vmem>>, vector<2x16xf32>,
    %c4 = arith.constant 4 : index
    %c0_31 = arith.constant 0 : index
    %91 = vector.load %arg6[%c4, %c0_31] : memref<16x128xf32, #tpu.memory_space<vmem>>, vector<2x64xf32>
    %92 = arith.truncf %69 : vector<2x16xf32> to vector<2x16xbf16>
    %cst_32 = arith.constant dense<0.000000e+00> : vector<2x64xf32>
    %93 = tpu.matmul %92, %8, %cst_32 {dimension_numbers = #tpu.dot_dimension_numbers<[1], [0], [0], [1], [0, 0, 1, 1], [], []>} : vector<2x16xbf16>, vector<16x64xbf16>, vector<2x64xf32> -> vector<2x64xf32>
    %94 = arith.addf %91, %93 : vector<2x64xf32>
    %95 = arith.negf %94 : vector<2x64xf32>
    %96 = math.exp %95 : vector<2x64xf32>
    %cst_33 = arith.constant 1.000000e+00 : f32
    %97 = vector.broadcast %cst_33 : f32 to vector<2x64xf32>
    %98 = arith.addf %97, %96 : vector<2x64xf32>
    %99 = arith.divf %97, %98 : vector<2x64xf32>
    %100 = vector.extract_strided_slice %94 {offsets = [0, 32], sizes = [2, 16], strides = [1, 1]} : vector<2x64xf32> to vector<2x16xf32>
    %101 = math.tanh %100 : vector<2x16xf32>
    %102 = vector.extract_strided_slice %99 {offsets = [0, 16], sizes = [2, 16], strides = [1, 1]} : vector<2x64xf32> to vector<2x16xf32>
    %103 = arith.mulf %102, %66 : vector<2x16xf32>
    %104 = vector.extract_strided_slice %99 {offsets = [0, 0], sizes = [2, 16], strides = [1, 1]} : vector<2x64xf32> to vector<2x16xf32>
    %105 = arith.mulf %104, %101 : vector<2x16xf32>
    %106 = arith.addf %103, %105 : vector<2x16xf32>
    %107 = vector.extract_strided_slice %99 {offsets = [0, 48], sizes = [2, 16], strides = [1, 1]} : vector<2x64xf32> to vector<2x16xf32>
    %108 = math.tanh %106 : vector<2x16xf32>
    %109 = arith.mulf %107, %108 : vector<2x16xf32>
    %c10 = arith.constant 10 : index
    %c64_34 = arith.constant 64 : index
    %110 = vector.load %arg6[%c10, %c64_34] : memref<16x128xf32, #tpu.memory_space<vmem>>, vector<2x64xf32>
    %111 = arith.truncf %88 : vector<2x16xf32> to vector<2x16xbf16>
    %cst_35 = arith.constant dense<0.000000e+00> : vector<2x64xf32>
    %112 = tpu.matmul %111, %9, %cst_35 {dimension_numbers = #tpu.dot_dimension_numbers<[1], [0], [0], [1], [0, 0, 1, 1], [], []>} : vector<2x16xbf16>, vector<16x64xbf16>, vector<2x64xf32> -> vector<2x64xf32>
    %113 = arith.addf %110, %112 : vector<2x64xf32>
    %114 = arith.negf %113 : vector<2x64xf32>
    %115 = math.exp %114 : vector<2x64xf32>
    %cst_36 = arith.constant 1.000000e+00 : f32
    %116 = vector.broadcast %cst_36 : f32 to vector<2x64xf32>
    %117 = arith.addf %116, %115 : vector<2x64xf32>
    %118 = arith.divf %116, %117 : vector<2x64xf32>
    %119 = vector.extract_strided_slice %113 {offsets = [0, 32], sizes = [2, 16], strides = [1, 1]} : vector<2x64xf32> to vector<2x16xf32>
    %120 = math.tanh %119 : vector<2x16xf32>
    %121 = vector.extract_strided_slice %118 {offsets = [0, 16], sizes = [2, 16], strides = [1, 1]} : vector<2x64xf32> to vector<2x16xf32>
    %122 = arith.mulf %121, %85 : vector<2x16xf32>
    %123 = vector.extract_strided_slice %118 {offsets = [0, 0], sizes = [2, 16], strides = [1, 1]} : vector<2x64xf32> to vector<2x16xf32>
    %124 = arith.mulf %123, %120 : vector<2x16xf32>
    %125 = arith.addf %122, %124 : vector<2x16xf32>
    %126 = vector.extract_strided_slice %118 {offsets = [0, 48], sizes = [2, 16], strides = [1, 1]} : vector<2x64xf32> to vector<2x16xf32>
    %127 = math.tanh %125 : vector<2x16xf32>
    %128 = arith.mulf %126, %127 : vector<2x16xf32>
    %c4_37 = arith.constant 4 : index
    %c0_38 = arith.constant 0 : index
    %129 = vector.load %arg5[%c4_37, %c0_38] : memref<16x32xf32, #tpu.memory_space<vmem>>, vector<2x16xf32>
    tpu.vector_store %arg5[%c4_37, %c0_38], %109 {strides = array<i32>} : memref<16x32xf32, #tpu.memory_space<vmem>>, vector<2x16xf32>,
    %c10_39 = arith.constant 10 : index
    %c16_40 = arith.constant 16 : index
    %130 = vector.load %arg5[%c10_39, %c16_40] : memref<16x32xf32, #tpu.memory_space<vmem>>, vector<2x16xf32>
    tpu.vector_store %arg5[%c10_39, %c16_40], %128 {strides = array<i32>} : memref<16x32xf32, #tpu.memory_space<vmem>>, vector<2x16xf32>,
    %c6 = arith.constant 6 : index
    %c0_41 = arith.constant 0 : index
    %131 = vector.load %arg6[%c6, %c0_41] : memref<16x128xf32, #tpu.memory_space<vmem>>, vector<2x64xf32>
    %132 = arith.truncf %109 : vector<2x16xf32> to vector<2x16xbf16>
    %cst_42 = arith.constant dense<0.000000e+00> : vector<2x64xf32>
    %133 = tpu.matmul %132, %8, %cst_42 {dimension_numbers = #tpu.dot_dimension_numbers<[1], [0], [0], [1], [0, 0, 1, 1], [], []>} : vector<2x16xbf16>, vector<16x64xbf16>, vector<2x64xf32> -> vector<2x64xf32>
    %134 = arith.addf %131, %133 : vector<2x64xf32>
    %135 = arith.negf %134 : vector<2x64xf32>
    %136 = math.exp %135 : vector<2x64xf32>
    %cst_43 = arith.constant 1.000000e+00 : f32
    %137 = vector.broadcast %cst_43 : f32 to vector<2x64xf32>
    %138 = arith.addf %137, %136 : vector<2x64xf32>
    %139 = arith.divf %137, %138 : vector<2x64xf32>
    %140 = vector.extract_strided_slice %134 {offsets = [0, 32], sizes = [2, 16], strides = [1, 1]} : vector<2x64xf32> to vector<2x16xf32>
    %141 = math.tanh %140 : vector<2x16xf32>
    %142 = vector.extract_strided_slice %139 {offsets = [0, 16], sizes = [2, 16], strides = [1, 1]} : vector<2x64xf32> to vector<2x16xf32>
    %143 = arith.mulf %142, %106 : vector<2x16xf32>
    %144 = vector.extract_strided_slice %139 {offsets = [0, 0], sizes = [2, 16], strides = [1, 1]} : vector<2x64xf32> to vector<2x16xf32>
    %145 = arith.mulf %144, %141 : vector<2x16xf32>
    %146 = arith.addf %143, %145 : vector<2x16xf32>
    %147 = vector.extract_strided_slice %139 {offsets = [0, 48], sizes = [2, 16], strides = [1, 1]} : vector<2x64xf32> to vector<2x16xf32>
    %148 = math.tanh %146 : vector<2x16xf32>
    %149 = arith.mulf %147, %148 : vector<2x16xf32>
    %c8 = arith.constant 8 : index
    %c64_44 = arith.constant 64 : index
    %150 = vector.load %arg6[%c8, %c64_44] : memref<16x128xf32, #tpu.memory_space<vmem>>, vector<2x64xf32>
    %151 = arith.truncf %128 : vector<2x16xf32> to vector<2x16xbf16>
    %cst_45 = arith.constant dense<0.000000e+00> : vector<2x64xf32>
    %152 = tpu.matmul %151, %9, %cst_45 {dimension_numbers = #tpu.dot_dimension_numbers<[1], [0], [0], [1], [0, 0, 1, 1], [], []>} : vector<2x16xbf16>, vector<16x64xbf16>, vector<2x64xf32> -> vector<2x64xf32>
    %153 = arith.addf %150, %152 : vector<2x64xf32>
    %154 = arith.negf %153 : vector<2x64xf32>
    %155 = math.exp %154 : vector<2x64xf32>
    %cst_46 = arith.constant 1.000000e+00 : f32
    %156 = vector.broadcast %cst_46 : f32 to vector<2x64xf32>
    %157 = arith.addf %156, %155 : vector<2x64xf32>
    %158 = arith.divf %156, %157 : vector<2x64xf32>
    %159 = vector.extract_strided_slice %153 {offsets = [0, 32], sizes = [2, 16], strides = [1, 1]} : vector<2x64xf32> to vector<2x16xf32>
    %160 = math.tanh %159 : vector<2x16xf32>
    %161 = vector.extract_strided_slice %158 {offsets = [0, 16], sizes = [2, 16], strides = [1, 1]} : vector<2x64xf32> to vector<2x16xf32>
    %162 = arith.mulf %161, %125 : vector<2x16xf32>
    %163 = vector.extract_strided_slice %158 {offsets = [0, 0], sizes = [2, 16], strides = [1, 1]} : vector<2x64xf32> to vector<2x16xf32>
    %164 = arith.mulf %163, %160 : vector<2x16xf32>
    %165 = arith.addf %162, %164 : vector<2x16xf32>
    %166 = vector.extract_strided_slice %158 {offsets = [0, 48], sizes = [2, 16], strides = [1, 1]} : vector<2x64xf32> to vector<2x16xf32>
    %167 = math.tanh %165 : vector<2x16xf32>
    %168 = arith.mulf %166, %167 : vector<2x16xf32>
    %c6_47 = arith.constant 6 : index
    %c0_48 = arith.constant 0 : index
    %169 = vector.load %arg5[%c6_47, %c0_48] : memref<16x32xf32, #tpu.memory_space<vmem>>, vector<2x16xf32>
    tpu.vector_store %arg5[%c6_47, %c0_48], %149 {strides = array<i32>} : memref<16x32xf32, #tpu.memory_space<vmem>>, vector<2x16xf32>,
    %c8_49 = arith.constant 8 : index
    %c16_50 = arith.constant 16 : index
    %170 = vector.load %arg5[%c8_49, %c16_50] : memref<16x32xf32, #tpu.memory_space<vmem>>, vector<2x16xf32>
    tpu.vector_store %arg5[%c8_49, %c16_50], %168 {strides = array<i32>} : memref<16x32xf32, #tpu.memory_space<vmem>>, vector<2x16xf32>,
    %c8_51 = arith.constant 8 : index
    %c0_52 = arith.constant 0 : index
    %171 = vector.load %arg6[%c8_51, %c0_52] : memref<16x128xf32, #tpu.memory_space<vmem>>, vector<2x64xf32>
    %172 = arith.truncf %149 : vector<2x16xf32> to vector<2x16xbf16>
    %cst_53 = arith.constant dense<0.000000e+00> : vector<2x64xf32>
    %173 = tpu.matmul %172, %8, %cst_53 {dimension_numbers = #tpu.dot_dimension_numbers<[1], [0], [0], [1], [0, 0, 1, 1], [], []>} : vector<2x16xbf16>, vector<16x64xbf16>, vector<2x64xf32> -> vector<2x64xf32>
    %174 = arith.addf %171, %173 : vector<2x64xf32>
    %175 = arith.negf %174 : vector<2x64xf32>
    %176 = math.exp %175 : vector<2x64xf32>
    %cst_54 = arith.constant 1.000000e+00 : f32
    %177 = vector.broadcast %cst_54 : f32 to vector<2x64xf32>
    %178 = arith.addf %177, %176 : vector<2x64xf32>
    %179 = arith.divf %177, %178 : vector<2x64xf32>
    %180 = vector.extract_strided_slice %174 {offsets = [0, 32], sizes = [2, 16], strides = [1, 1]} : vector<2x64xf32> to vector<2x16xf32>
    %181 = math.tanh %180 : vector<2x16xf32>
    %182 = vector.extract_strided_slice %179 {offsets = [0, 16], sizes = [2, 16], strides = [1, 1]} : vector<2x64xf32> to vector<2x16xf32>
    %183 = arith.mulf %182, %146 : vector<2x16xf32>
    %184 = vector.extract_strided_slice %179 {offsets = [0, 0], sizes = [2, 16], strides = [1, 1]} : vector<2x64xf32> to vector<2x16xf32>
    %185 = arith.mulf %184, %181 : vector<2x16xf32>
    %186 = arith.addf %183, %185 : vector<2x16xf32>
    %187 = vector.extract_strided_slice %179 {offsets = [0, 48], sizes = [2, 16], strides = [1, 1]} : vector<2x64xf32> to vector<2x16xf32>
    %188 = math.tanh %186 : vector<2x16xf32>
    %189 = arith.mulf %187, %188 : vector<2x16xf32>
    %c6_55 = arith.constant 6 : index
    %c64_56 = arith.constant 64 : index
    %190 = vector.load %arg6[%c6_55, %c64_56] : memref<16x128xf32, #tpu.memory_space<vmem>>, vector<2x64xf32>
    %191 = arith.truncf %168 : vector<2x16xf32> to vector<2x16xbf16>
    %cst_57 = arith.constant dense<0.000000e+00> : vector<2x64xf32>
    %192 = tpu.matmul %191, %9, %cst_57 {dimension_numbers = #tpu.dot_dimension_numbers<[1], [0], [0], [1], [0, 0, 1, 1], [], []>} : vector<2x16xbf16>, vector<16x64xbf16>, vector<2x64xf32> -> vector<2x64xf32>
    %193 = arith.addf %190, %192 : vector<2x64xf32>
    %194 = arith.negf %193 : vector<2x64xf32>
    %195 = math.exp %194 : vector<2x64xf32>
    %cst_58 = arith.constant 1.000000e+00 : f32
    %196 = vector.broadcast %cst_58 : f32 to vector<2x64xf32>
    %197 = arith.addf %196, %195 : vector<2x64xf32>
    %198 = arith.divf %196, %197 : vector<2x64xf32>
    %199 = vector.extract_strided_slice %193 {offsets = [0, 32], sizes = [2, 16], strides = [1, 1]} : vector<2x64xf32> to vector<2x16xf32>
    %200 = math.tanh %199 : vector<2x16xf32>
    %201 = vector.extract_strided_slice %198 {offsets = [0, 16], sizes = [2, 16], strides = [1, 1]} : vector<2x64xf32> to vector<2x16xf32>
    %202 = arith.mulf %201, %165 : vector<2x16xf32>
    %203 = vector.extract_strided_slice %198 {offsets = [0, 0], sizes = [2, 16], strides = [1, 1]} : vector<2x64xf32> to vector<2x16xf32>
    %204 = arith.mulf %203, %200 : vector<2x16xf32>
    %205 = arith.addf %202, %204 : vector<2x16xf32>
    %206 = vector.extract_strided_slice %198 {offsets = [0, 48], sizes = [2, 16], strides = [1, 1]} : vector<2x64xf32> to vector<2x16xf32>
    %207 = math.tanh %205 : vector<2x16xf32>
    %208 = arith.mulf %206, %207 : vector<2x16xf32>
    %c8_59 = arith.constant 8 : index
    %c0_60 = arith.constant 0 : index
    %209 = vector.load %arg5[%c8_59, %c0_60] : memref<16x32xf32, #tpu.memory_space<vmem>>, vector<2x16xf32>
    tpu.vector_store %arg5[%c8_59, %c0_60], %189 {strides = array<i32>} : memref<16x32xf32, #tpu.memory_space<vmem>>, vector<2x16xf32>,
    %c6_61 = arith.constant 6 : index
    %c16_62 = arith.constant 16 : index
    %210 = vector.load %arg5[%c6_61, %c16_62] : memref<16x32xf32, #tpu.memory_space<vmem>>, vector<2x16xf32>
    tpu.vector_store %arg5[%c6_61, %c16_62], %208 {strides = array<i32>} : memref<16x32xf32, #tpu.memory_space<vmem>>, vector<2x16xf32>,
    %c10_63 = arith.constant 10 : index
    %c0_64 = arith.constant 0 : index
    %211 = vector.load %arg6[%c10_63, %c0_64] : memref<16x128xf32, #tpu.memory_space<vmem>>, vector<2x64xf32>
    %212 = arith.truncf %189 : vector<2x16xf32> to vector<2x16xbf16>
    %cst_65 = arith.constant dense<0.000000e+00> : vector<2x64xf32>
    %213 = tpu.matmul %212, %8, %cst_65 {dimension_numbers = #tpu.dot_dimension_numbers<[1], [0], [0], [1], [0, 0, 1, 1], [], []>} : vector<2x16xbf16>, vector<16x64xbf16>, vector<2x64xf32> -> vector<2x64xf32>
    %214 = arith.addf %211, %213 : vector<2x64xf32>
    %215 = arith.negf %214 : vector<2x64xf32>
    %216 = math.exp %215 : vector<2x64xf32>
    %cst_66 = arith.constant 1.000000e+00 : f32
    %217 = vector.broadcast %cst_66 : f32 to vector<2x64xf32>
    %218 = arith.addf %217, %216 : vector<2x64xf32>
    %219 = arith.divf %217, %218 : vector<2x64xf32>
    %220 = vector.extract_strided_slice %214 {offsets = [0, 32], sizes = [2, 16], strides = [1, 1]} : vector<2x64xf32> to vector<2x16xf32>
    %221 = math.tanh %220 : vector<2x16xf32>
    %222 = vector.extract_strided_slice %219 {offsets = [0, 16], sizes = [2, 16], strides = [1, 1]} : vector<2x64xf32> to vector<2x16xf32>
    %223 = arith.mulf %222, %186 : vector<2x16xf32>
    %224 = vector.extract_strided_slice %219 {offsets = [0, 0], sizes = [2, 16], strides = [1, 1]} : vector<2x64xf32> to vector<2x16xf32>
    %225 = arith.mulf %224, %221 : vector<2x16xf32>
    %226 = arith.addf %223, %225 : vector<2x16xf32>
    %227 = vector.extract_strided_slice %219 {offsets = [0, 48], sizes = [2, 16], strides = [1, 1]} : vector<2x64xf32> to vector<2x16xf32>
    %228 = math.tanh %226 : vector<2x16xf32>
    %229 = arith.mulf %227, %228 : vector<2x16xf32>
    %c4_67 = arith.constant 4 : index
    %c64_68 = arith.constant 64 : index
    %230 = vector.load %arg6[%c4_67, %c64_68] : memref<16x128xf32, #tpu.memory_space<vmem>>, vector<2x64xf32>
    %231 = arith.truncf %208 : vector<2x16xf32> to vector<2x16xbf16>
    %cst_69 = arith.constant dense<0.000000e+00> : vector<2x64xf32>
    %232 = tpu.matmul %231, %9, %cst_69 {dimension_numbers = #tpu.dot_dimension_numbers<[1], [0], [0], [1], [0, 0, 1, 1], [], []>} : vector<2x16xbf16>, vector<16x64xbf16>, vector<2x64xf32> -> vector<2x64xf32>
    %233 = arith.addf %230, %232 : vector<2x64xf32>
    %234 = arith.negf %233 : vector<2x64xf32>
    %235 = math.exp %234 : vector<2x64xf32>
    %cst_70 = arith.constant 1.000000e+00 : f32
    %236 = vector.broadcast %cst_70 : f32 to vector<2x64xf32>
    %237 = arith.addf %236, %235 : vector<2x64xf32>
    %238 = arith.divf %236, %237 : vector<2x64xf32>
    %239 = vector.extract_strided_slice %233 {offsets = [0, 32], sizes = [2, 16], strides = [1, 1]} : vector<2x64xf32> to vector<2x16xf32>
    %240 = math.tanh %239 : vector<2x16xf32>
    %241 = vector.extract_strided_slice %238 {offsets = [0, 16], sizes = [2, 16], strides = [1, 1]} : vector<2x64xf32> to vector<2x16xf32>
    %242 = arith.mulf %241, %205 : vector<2x16xf32>
    %243 = vector.extract_strided_slice %238 {offsets = [0, 0], sizes = [2, 16], strides = [1, 1]} : vector<2x64xf32> to vector<2x16xf32>
    %244 = arith.mulf %243, %240 : vector<2x16xf32>
    %245 = arith.addf %242, %244 : vector<2x16xf32>
    %246 = vector.extract_strided_slice %238 {offsets = [0, 48], sizes = [2, 16], strides = [1, 1]} : vector<2x64xf32> to vector<2x16xf32>
    %247 = math.tanh %245 : vector<2x16xf32>
    %248 = arith.mulf %246, %247 : vector<2x16xf32>
    %c10_71 = arith.constant 10 : index
    %c0_72 = arith.constant 0 : index
    %249 = vector.load %arg5[%c10_71, %c0_72] : memref<16x32xf32, #tpu.memory_space<vmem>>, vector<2x16xf32>
    tpu.vector_store %arg5[%c10_71, %c0_72], %229 {strides = array<i32>} : memref<16x32xf32, #tpu.memory_space<vmem>>, vector<2x16xf32>,
    %c4_73 = arith.constant 4 : index
    %c16_74 = arith.constant 16 : index
    %250 = vector.load %arg5[%c4_73, %c16_74] : memref<16x32xf32, #tpu.memory_space<vmem>>, vector<2x16xf32>
    tpu.vector_store %arg5[%c4_73, %c16_74], %248 {strides = array<i32>} : memref<16x32xf32, #tpu.memory_space<vmem>>, vector<2x16xf32>,
    %c12_75 = arith.constant 12 : index
    %c0_76 = arith.constant 0 : index
    %251 = vector.load %arg6[%c12_75, %c0_76] : memref<16x128xf32, #tpu.memory_space<vmem>>, vector<2x64xf32>
    %252 = arith.truncf %229 : vector<2x16xf32> to vector<2x16xbf16>
    %cst_77 = arith.constant dense<0.000000e+00> : vector<2x64xf32>
    %253 = tpu.matmul %252, %8, %cst_77 {dimension_numbers = #tpu.dot_dimension_numbers<[1], [0], [0], [1], [0, 0, 1, 1], [], []>} : vector<2x16xbf16>, vector<16x64xbf16>, vector<2x64xf32> -> vector<2x64xf32>
    %254 = arith.addf %251, %253 : vector<2x64xf32>
    %255 = arith.negf %254 : vector<2x64xf32>
    %256 = math.exp %255 : vector<2x64xf32>
    %cst_78 = arith.constant 1.000000e+00 : f32
    %257 = vector.broadcast %cst_78 : f32 to vector<2x64xf32>
    %258 = arith.addf %257, %256 : vector<2x64xf32>
    %259 = arith.divf %257, %258 : vector<2x64xf32>
    %260 = vector.extract_strided_slice %254 {offsets = [0, 32], sizes = [2, 16], strides = [1, 1]} : vector<2x64xf32> to vector<2x16xf32>
    %261 = math.tanh %260 : vector<2x16xf32>
    %262 = vector.extract_strided_slice %259 {offsets = [0, 16], sizes = [2, 16], strides = [1, 1]} : vector<2x64xf32> to vector<2x16xf32>
    %263 = arith.mulf %262, %226 : vector<2x16xf32>
    %264 = vector.extract_strided_slice %259 {offsets = [0, 0], sizes = [2, 16], strides = [1, 1]} : vector<2x64xf32> to vector<2x16xf32>
    %265 = arith.mulf %264, %261 : vector<2x16xf32>
    %266 = arith.addf %263, %265 : vector<2x16xf32>
    %267 = vector.extract_strided_slice %259 {offsets = [0, 48], sizes = [2, 16], strides = [1, 1]} : vector<2x64xf32> to vector<2x16xf32>
    %268 = math.tanh %266 : vector<2x16xf32>
    %269 = arith.mulf %267, %268 : vector<2x16xf32>
    %c2_79 = arith.constant 2 : index
    %c64_80 = arith.constant 64 : index
    %270 = vector.load %arg6[%c2_79, %c64_80] : memref<16x128xf32, #tpu.memory_space<vmem>>, vector<2x64xf32>
    %271 = arith.truncf %248 : vector<2x16xf32> to vector<2x16xbf16>
    %cst_81 = arith.constant dense<0.000000e+00> : vector<2x64xf32>
    %272 = tpu.matmul %271, %9, %cst_81 {dimension_numbers = #tpu.dot_dimension_numbers<[1], [0], [0], [1], [0, 0, 1, 1], [], []>} : vector<2x16xbf16>, vector<16x64xbf16>, vector<2x64xf32> -> vector<2x64xf32>
    %273 = arith.addf %270, %272 : vector<2x64xf32>
    %274 = arith.negf %273 : vector<2x64xf32>
    %275 = math.exp %274 : vector<2x64xf32>
    %cst_82 = arith.constant 1.000000e+00 : f32
    %276 = vector.broadcast %cst_82 : f32 to vector<2x64xf32>
    %277 = arith.addf %276, %275 : vector<2x64xf32>
    %278 = arith.divf %276, %277 : vector<2x64xf32>
    %279 = vector.extract_strided_slice %273 {offsets = [0, 32], sizes = [2, 16], strides = [1, 1]} : vector<2x64xf32> to vector<2x16xf32>
    %280 = math.tanh %279 : vector<2x16xf32>
    %281 = vector.extract_strided_slice %278 {offsets = [0, 16], sizes = [2, 16], strides = [1, 1]} : vector<2x64xf32> to vector<2x16xf32>
    %282 = arith.mulf %281, %245 : vector<2x16xf32>
    %283 = vector.extract_strided_slice %278 {offsets = [0, 0], sizes = [2, 16], strides = [1, 1]} : vector<2x64xf32> to vector<2x16xf32>
    %284 = arith.mulf %283, %280 : vector<2x16xf32>
    %285 = arith.addf %282, %284 : vector<2x16xf32>
    %286 = vector.extract_strided_slice %278 {offsets = [0, 48], sizes = [2, 16], strides = [1, 1]} : vector<2x64xf32> to vector<2x16xf32>
    %287 = math.tanh %285 : vector<2x16xf32>
    %288 = arith.mulf %286, %287 : vector<2x16xf32>
    %c12_83 = arith.constant 12 : index
    %c0_84 = arith.constant 0 : index
    %289 = vector.load %arg5[%c12_83, %c0_84] : memref<16x32xf32, #tpu.memory_space<vmem>>, vector<2x16xf32>
    tpu.vector_store %arg5[%c12_83, %c0_84], %269 {strides = array<i32>} : memref<16x32xf32, #tpu.memory_space<vmem>>, vector<2x16xf32>,
    %c2_85 = arith.constant 2 : index
    %c16_86 = arith.constant 16 : index
    %290 = vector.load %arg5[%c2_85, %c16_86] : memref<16x32xf32, #tpu.memory_space<vmem>>, vector<2x16xf32>
    tpu.vector_store %arg5[%c2_85, %c16_86], %288 {strides = array<i32>} : memref<16x32xf32, #tpu.memory_space<vmem>>, vector<2x16xf32>,
    %c14_87 = arith.constant 14 : index
    %c0_88 = arith.constant 0 : index
    %291 = vector.load %arg6[%c14_87, %c0_88] : memref<16x128xf32, #tpu.memory_space<vmem>>, vector<2x64xf32>
    %292 = arith.truncf %269 : vector<2x16xf32> to vector<2x16xbf16>
    %cst_89 = arith.constant dense<0.000000e+00> : vector<2x64xf32>
    %293 = tpu.matmul %292, %8, %cst_89 {dimension_numbers = #tpu.dot_dimension_numbers<[1], [0], [0], [1], [0, 0, 1, 1], [], []>} : vector<2x16xbf16>, vector<16x64xbf16>, vector<2x64xf32> -> vector<2x64xf32>
    %294 = arith.addf %291, %293 : vector<2x64xf32>
    %295 = arith.negf %294 : vector<2x64xf32>
    %296 = math.exp %295 : vector<2x64xf32>
    %cst_90 = arith.constant 1.000000e+00 : f32
    %297 = vector.broadcast %cst_90 : f32 to vector<2x64xf32>
    %298 = arith.addf %297, %296 : vector<2x64xf32>
    %299 = arith.divf %297, %298 : vector<2x64xf32>
    %300 = vector.extract_strided_slice %294 {offsets = [0, 32], sizes = [2, 16], strides = [1, 1]} : vector<2x64xf32> to vector<2x16xf32>
    %301 = math.tanh %300 : vector<2x16xf32>
    %302 = vector.extract_strided_slice %299 {offsets = [0, 16], sizes = [2, 16], strides = [1, 1]} : vector<2x64xf32> to vector<2x16xf32>
    %303 = arith.mulf %302, %266 : vector<2x16xf32>
    %304 = vector.extract_strided_slice %299 {offsets = [0, 0], sizes = [2, 16], strides = [1, 1]} : vector<2x64xf32> to vector<2x16xf32>
    %305 = arith.mulf %304, %301 : vector<2x16xf32>
    %306 = arith.addf %303, %305 : vector<2x16xf32>
    %307 = vector.extract_strided_slice %299 {offsets = [0, 48], sizes = [2, 16], strides = [1, 1]} : vector<2x64xf32> to vector<2x16xf32>
    %308 = math.tanh %306 : vector<2x16xf32>
    %309 = arith.mulf %307, %308 : vector<2x16xf32>
    %c0_91 = arith.constant 0 : index
    %c64_92 = arith.constant 64 : index
    %310 = vector.load %arg6[%c0_91, %c64_92] : memref<16x128xf32, #tpu.memory_space<vmem>>, vector<2x64xf32>
    %311 = arith.truncf %288 : vector<2x16xf32> to vector<2x16xbf16>
    %cst_93 = arith.constant dense<0.000000e+00> : vector<2x64xf32>
    %312 = tpu.matmul %311, %9, %cst_93 {dimension_numbers = #tpu.dot_dimension_numbers<[1], [0], [0], [1], [0, 0, 1, 1], [], []>} : vector<2x16xbf16>, vector<16x64xbf16>, vector<2x64xf32> -> vector<2x64xf32>
    %313 = arith.addf %310, %312 : vector<2x64xf32>
    %314 = arith.negf %313 : vector<2x64xf32>
    %315 = math.exp %314 : vector<2x64xf32>
    %cst_94 = arith.constant 1.000000e+00 : f32
    %316 = vector.broadcast %cst_94 : f32 to vector<2x64xf32>
    %317 = arith.addf %316, %315 : vector<2x64xf32>
    %318 = arith.divf %316, %317 : vector<2x64xf32>
    %319 = vector.extract_strided_slice %313 {offsets = [0, 32], sizes = [2, 16], strides = [1, 1]} : vector<2x64xf32> to vector<2x16xf32>
    %320 = math.tanh %319 : vector<2x16xf32>
    %321 = vector.extract_strided_slice %318 {offsets = [0, 16], sizes = [2, 16], strides = [1, 1]} : vector<2x64xf32> to vector<2x16xf32>
    %322 = arith.mulf %321, %285 : vector<2x16xf32>
    %323 = vector.extract_strided_slice %318 {offsets = [0, 0], sizes = [2, 16], strides = [1, 1]} : vector<2x64xf32> to vector<2x16xf32>
    %324 = arith.mulf %323, %320 : vector<2x16xf32>
    %325 = arith.addf %322, %324 : vector<2x16xf32>
    %326 = vector.extract_strided_slice %318 {offsets = [0, 48], sizes = [2, 16], strides = [1, 1]} : vector<2x64xf32> to vector<2x16xf32>
    %327 = math.tanh %325 : vector<2x16xf32>
    %328 = arith.mulf %326, %327 : vector<2x16xf32>
    %c14_95 = arith.constant 14 : index
    %c0_96 = arith.constant 0 : index
    %329 = vector.load %arg5[%c14_95, %c0_96] : memref<16x32xf32, #tpu.memory_space<vmem>>, vector<2x16xf32>
    tpu.vector_store %arg5[%c14_95, %c0_96], %309 {strides = array<i32>} : memref<16x32xf32, #tpu.memory_space<vmem>>, vector<2x16xf32>,
    %c0_97 = arith.constant 0 : index
    %c16_98 = arith.constant 16 : index
    %330 = vector.load %arg5[%c0_97, %c16_98] : memref<16x32xf32, #tpu.memory_space<vmem>>, vector<2x16xf32>
    tpu.vector_store %arg5[%c0_97, %c16_98], %328 {strides = array<i32>} : memref<16x32xf32, #tpu.memory_space<vmem>>, vector<2x16xf32>,
    return
  }
}

</mosaic_0001>

<bundles_post_ra>
// kernel: modeling_layer_forward.3
= control target key start
LH: loop header
LB: loop body
LE: loop exit
PB: predicated region body
PF: predicated region fallthrough
CT: control target
= control target key end

     0   :  { %8 = vsyncpa [#allocation3], 0  ;;  %s270_s0 = inlined_call_operand.hbm [shape: f32[2,8,32], index: 0, kind: input, shape index: {}]   ;;  %s271_s1 = inlined_call_operand.hbm [shape: f32[2,8,32], index: 1, kind: input, shape index: {}]   ;;  %s272_s2 = inlined_call_operand.hbm [shape: f32[2,8,32], index: 2, kind: input, shape index: {}]   ;;  %s273_s3 = inlined_call_operand.vmem [shape: f32[2,8,128], index: 3, kind: output, shape index: {}]  }
   0x1   :  { %9 = vsyncpa [#allocation5], 0  ;;  %s184_s12 = smov [#allocation4]   ;;  %s185_s14 = smov [#allocation2]  }
   0x2   :  { %s27_s13 = sshll.u32 %s184_s12, 4  ;;  %s15_s15 = sshll.u32 %s185_s14, 4  ;;  %s28_s13 = int_to_ptr.vmem [resolvable:$true] %s27_s13  ;;  %s212_s15 = int_to_ptr.vmem [resolvable:$true] %s15_s15 }
   0x3   :  { %s114_s18 = scalar_lea.hbm %s271_s1, 256 }
   0x4   :  { %p115_p0 = scmp.ne.s32.totalorder %s271_s1, %s114_s18  ;;  %p118_p1 = scmp.lt.u32.totalorder %s114_s18, %s271_s1 }
   0x6   :  { %p120_p2 = pnand %p118_p1, %p115_p0 }
   0x8   :  { %123 = shalt.err (!%p120_p2)
}
   0x9   :  { %s124_s23 = scalar_lea.vmem %s28_s13, 256  ;;  %p129_p4 = scmp.lt.s32.totalorder %s28_s13, %s28_s13 }
   0xa   :  { %p125_p3 = scmp.ne.s32.totalorder %s28_s13, %s124_s23  ;;  %p130_p5 = scmp.lt.s32.totalorder %s124_s23, %s124_s23 }
   0xc   :  { %p131_p6 = por %p130_p5, %p129_p4 }
   0xe   :  { %p132_p7 = pnand %p131_p6, %p125_p3 }
  0x10   :  { %135 = shalt.err (!%p132_p7)
}
  0x11   :  { %s186_s24 = smov 128   ;;  %s187_s25 = smov 8  }
  0x12   :  { %33 = dma.hbm_to_vmem [thread:$0]  %s271_s1, 256, %s28_s13, [#allocation5], %s186_s24, %s186_s24, %s187_s25  }
  0x13   :  { %s136_s30 = scalar_lea.hbm %s270_s0, 256 }
  0x14   :  { %p137_p8 = scmp.ne.s32.totalorder %s270_s0, %s136_s30  ;;  %p140_p9 = scmp.lt.u32.totalorder %s136_s30, %s270_s0 }
  0x16   :  { %p142_p10 = pnand %p140_p9, %p137_p8 }
  0x18   :  { %145 = shalt.err (!%p142_p10)
}
  0x19   :  { %s146_s8 = scalar_lea.vmem %s212_s15, 256  ;;  %p151_p12 = scmp.lt.s32.totalorder %s212_s15, %s212_s15 }
  0x1a   :  { %p147_p11 = scmp.ne.s32.totalorder %s212_s15, %s146_s8  ;;  %p152_p13 = scmp.lt.s32.totalorder %s146_s8, %s146_s8 }
  0x1c   :  { %p153_p0 = por %p152_p13, %p151_p12 }
  0x1e   :  { %p154_p1 = pnand %p153_p0, %p147_p11 }
  0x20   :  { %157 = shalt.err (!%p154_p1)
}
  0x21   :  { %21 = dma.hbm_to_vmem [thread:$0]  %s270_s0, 256, %s212_s15, [#allocation3], %s186_s24, %s186_s24, %s187_s25  }
  0x22   :  { %s188_s10 = smov [#allocation6]   ;;  %s158_s14 = scalar_lea.hbm %s272_s2, 256 }
  0x23   :  { %s39_s11 = sshll.u32 %s188_s10, 4  ;;  %p159_p2 = scmp.ne.s32.totalorder %s272_s2, %s158_s14  ;;  %s40_s11 = int_to_ptr.vmem [resolvable:$true] %s39_s11 }
  0x24   :  { %p162_p3 = scmp.lt.u32.totalorder %s158_s14, %s272_s2 }
  0x26   :  { %p164_p4 = pnand %p162_p3, %p159_p2 }
  0x28   :  { %167 = shalt.err (!%p164_p4)
}
  0x29   :  { %s168_s20 = scalar_lea.vmem %s40_s11, 256  ;;  %p173_p6 = scmp.lt.s32.totalorder %s40_s11, %s40_s11 }
  0x2a   :  { %p169_p5 = scmp.ne.s32.totalorder %s40_s11, %s168_s20  ;;  %p174_p7 = scmp.lt.s32.totalorder %s168_s20, %s168_s20 }
  0x2c   :  { %p175_p8 = por %p174_p7, %p173_p6 }
  0x2e   :  { %p176_p9 = pnand %p175_p8, %p169_p5 }
  0x30   :  { %179 = shalt.err (!%p176_p9)
}
  0x31   :  { %45 = dma.hbm_to_vmem [thread:$0]  %s272_s2, 256, %s40_s11, [#allocation5], %s186_s24, %s186_s24, %s187_s25  }
  0x32   :  { %180 = dma.done.wait [#allocation3], 256  }
  0x33   :  { %181 = vsyncadd [#allocation3], 4294967040 }
  0x34   :  { %182 = dma.done.wait [#allocation5], 512  }
  0x35   :  { %183 = vsyncadd [#allocation5], 4294966784  ;;  %v57_v0 = vld [vmem:[#allocation4] sm:$0xff]  ;;  %v55_v1 = vld [vmem:[#allocation2] sm:$0xff]  ;;  %s189_s21 = smov 32   ;;  %s190_s22 = smov 64  }
  0x36   :  { %v58_v2 = vld [vmem:[#allocation4 + $0x8] sm:$0xff]  ;;  %67 = vrot.lane.b32.xlu0 %v57_v0, %s189_s21  ;;  %v61_v3 = vmul.f32 %v57_v0, %v55_v1  ;;  %v56_v4 = vld [vmem:[#allocation2 + $0x8] sm:$0xff]  ;;  %v59_v5 = vld [vmem:[#allocation6] sm:$0xff]  ;;  %s191_s2 = smov 96   ;;  %vm89_vm0 = vcmask 261120   ;;  %vm92_vm1 = vcmask 523264  }
  0x37   :  { %v62_v6 = vmul.f32 %v58_v2, %v56_v4  ;;  %v60_v7 = vld [vmem:[#allocation6 + $0x8] sm:$0xff]  ;;  %v63_v8 = vmul.f32 %v59_v5, %v55_v1  ;;  %vm95_vm2 = vcmask 785408  }
  0x38   :  { %75 = vrot.lane.b32.xlu1 %v61_v3, %s190_s22  ;;  %v64_v9 = vmul.f32 %v60_v7, %v56_v4 }
  0x3a   :  { %69 = vrot.lane.b32.xlu0 %v58_v2, %s189_s21 }
  0x3c   :  { %77 = vrot.lane.b32.xlu1 %v62_v6, %s190_s22 }
  0x3e   :  { %83 = vrot.lane.b32.xlu0 %v63_v8, %s191_s2 }
  0x40   :  { %85 = vrot.lane.b32.xlu1 %v64_v9, %s191_s2 }
  0xa8   :  { %v68_v10 = vpop.permute.xlu0 %67 }
  0xa9   :  { %v90_v13 = vsel %vm89_vm0, %v55_v1, %v68_v10 }
  0xaa   :  { %v76_v11 = vpop.permute.xlu1 %75 }
  0xab   :  { %v93_v16 = vsel %vm92_vm1, %v90_v13, %v76_v11 }
  0xac   :  { %v70_v12 = vpop.permute.xlu0 %69 }
  0xad   :  { %v91_v15 = vsel %vm89_vm0, %v56_v4, %v70_v12 }
  0xae   :  { %v78_v14 = vpop.permute.xlu1 %77 }
  0xaf   :  { %v94_v19 = vsel %vm92_vm1, %v91_v15, %v78_v14 }
  0xb0   :  { %v84_v17 = vpop.permute.xlu0 %83 }
  0xb1   :  { %v96_v18 = vsel %vm95_vm2, %v93_v16, %v84_v17 }
  0xb2   :  { %98 = vst [vmem:[%s273_s3] sm:$0xff] %v96_v18  ;;  %v86_v20 = vpop.permute.xlu1 %85 }
  0xb3   :  { %v97_v21 = vsel %vm95_vm2, %v94_v19, %v86_v20 }
  0xb4   :  { %99 = vst [vmem:[%s273_s3 + $0x8] sm:$0xff] %v97_v21 }
  0xb5   :  { %104 = vsyncpa [#allocation3], 1 }
  0xb6   :  { %105 = vsyncpa [#allocation5], 1 }

// kernel: modeling_layer_forward.5
= control target key start
LH: loop header
LB: loop body
LE: loop exit
PB: predicated region body
PF: predicated region fallthrough
CT: control target
= control target key end

     0   :  { %v1701_v0 = vmov 0.0   ;;  %vm1702_vm0 = vmmov 0   ;;  %v1703_v8 = vmov 0   ;;  %vm47_vm1 = vcmask 261120   ;;  %s1706_s29 = smov 16   ;;  %s1707_s30 = smov 32   ;;  %s2101_s1 = inlined_call_operand.vmem [shape: bf16[32,128], index: 1, kind: input, shape index: {}]   ;;  %s2102_s2 = inlined_call_operand.vmem [shape: bf16[16,64], index: 2, kind: input, shape index: {}]   ;;  %s2103_s3 = inlined_call_operand.vmem [shape: bf16[16,64], index: 3, kind: input, shape index: {}]   ;;  %s2104_s0 = inlined_call_operand.vmem [shape: f32[16,32], index: 0, kind: input, shape index: {}]   ;;  %s2105_s4 = inlined_call_operand.vmem [shape: f32[1,128], index: 4, kind: input, shape index: {}]   ;;  %s2106_s5 = inlined_call_operand.vmem [shape: f32[16,32], index: 5, kind: output, shape index: {}]  }
   0x1   :  { %1457 = vmatprep.subr.bf16.mxu0 %v1701_v0  ;;  %1465 = vmatprep.subr.bf16.mxu1 %v1701_v0  ;;  %v1569_v1 = vld [vmem:[%s2101_s1] sm:$0xff]   ;;  %v1571_v3 = vld [vmem:[%s2101_s1 + $0x8] sm:$0xff]   ;;  %vm105_vm2 = vcmask 130048   ;;  %s1708_s6 = smov 80   ;;  %vm254_vm3 = vcmask 123904   ;;  %vm260_vm4 = vcmask 255104  }
   0x2   :  { %v1747_v2 = vld [vmem:[%s2102_s2] sm:$0xff]   ;;  %1467 = vmatprep.mubr.msk.bf16.mxu1 %vm1702_vm0, %v1701_v0  ;;  %1461 = vmatprep.mubr.msk.bf16.mxu0 %vm1702_vm0, %v1701_v0  ;;  %v22_v6 = vld [vmem:[%s2104_s0 + $0x8] sm:$0xff] }
   0x3   :  { %1458 = vmatpush3.bf16.msra.mxu0 %v1569_v1  ;;  %1466 = vmatpush3.bf16.msra.mxu1 %v1747_v2  ;;  %v1761_v4 = vld [vmem:[%s2103_s3] sm:$0xff]   ;;  %s1704_s3 = smov 64  }
   0x4   :  { %1459 = vmatprep.subr.bf16.mxu0 %v1701_v0  ;;  %1471 = vmatprep.subr.bf16.mxu1 %v1701_v0  ;;  %v21_v5 = vld [vmem:[%s2104_s0] sm:$0xff] }
   0x5   :  { %v23_v7 = vpack.c.bf16 %v22_v6, %v21_v5  ;;  %v1386_v11 = vld [vmem:[%s2105_s4] ss:$0 sm:$0xff]  ;;  %s1705_s4 = smov 96  }
   0x6   :  { %1468 = vmatmul.mubr.bf16.vlgmr.msra.gmra.mrb[0].mxu1 %v1703_v8 }
   0x7   :  { %1460 = vmatpush3.bf16.msra.mxu0 %v1571_v3  ;;  %1472 = vmatpush3.bf16.msra.mxu1 %v1761_v4 }
   0x8   :  { %1473 = vmatprep.mubr.msk.bf16.mxu1 %vm1702_vm0, %v1701_v0  ;;  %1483 = vmatprep.subr.bf16.mxu1 %v1701_v0 }
   0x9   :  { %1477 = vmatprep.subr.bf16.mxu0 %v1701_v0 }
   0xa   :  { %1462 = vmatmul.mubr.msk.bf16.vlgmr.msra.gmra.mrb[0].mxu0 %vm47_vm1, %v23_v7 }
   0xb   :  { %1478 = vmatpush3.bf16.msra.mxu0 %v1747_v2  ;;  %1479 = vmatprep.mubr.msk.bf16.mxu0 %vm1702_vm0, %v1701_v0 }
   0xc   :  { %1489 = vmatprep.subr.bf16.mxu0 %v1701_v0 }
   0xe   :  { %1474 = vmatmul.mubr.bf16.vlgmr.msra.gmra.mrb[4].mxu1 %v1703_v8 }
   0xf   :  { %1484 = vmatpush3.bf16.msra.mxu1 %v1761_v4  ;;  %1485 = vmatprep.mubr.msk.bf16.mxu1 %vm1702_vm0, %v1701_v0 }
  0x10   :  { %1495 = vmatprep.subr.bf16.mxu1 %v1701_v0 }
  0xd9   :  { %v143_v9 = vpop.f32.mrb[0].mxu1 }
  0xda   :  { %v1469_v10 = vpop.f32.mrb[1].mxu1 }
  0xdb   :  { %v146_v12 = vpop.f32.mrb[2].mxu1 }
  0xdc   :  { %v1470_v13 = vpop.f32.mrb[3].mxu1 }
  0xdd   :  { %v85_v14 = vpop.f32.mrb[0].mxu0 }
  0xde   :  { %v86_v15 = vadd.f32 %v1386_v11, %v85_v14  ;;  %v1463_v16 = vpop.f32.mrb[1].mxu0 }
  0xdf   :  { %v88_v17 = vpop.f32.mrb[2].mxu0 }
  0xe0   :  { %92 = vst [vmem:[#allocation2] sm:$0xff] %v86_v15  ;;  %v89_v18 = vadd.f32 %v1386_v11, %v88_v17  ;;  %v1464_v19 = vpop.f32.mrb[3].mxu0 }
  0xe1   :  { %v215_v20 = vpop.f32.mrb[4].mxu1 }
  0xe2   :  { %93 = vst [vmem:[#allocation2 + $0x8] sm:$0xff] %v89_v18  ;;  %222 = vrot.lane.b32.xlu0 %v215_v20, %s1704_s3  ;;  %v1475_v21 = vpop.f32.mrb[5].mxu1 }
  0xe3   :  { %v218_v22 = vpop.f32.mrb[6].mxu1 }
  0xe4   :  { %v1476_v23 = vpop.f32.mrb[7].mxu1 }
  0xe7   :  { %v98_v36 = vld [vmem:[#allocation2] sm:$0x3]  ;;  %v262_v19 = vld [vmem:[#allocation2 + $0x2] sm:$0x3] }
  0xe8   :  { %v149_v38 = vadd.f32 %v143_v9, %v98_v36 }
  0xe9   :  { %v174_v25 = vld [vmem:[#allocation2 + $0xe] sm:$0x3]  ;;  %v335_v63 = vld [vmem:[#allocation2 + $0xc] sm:$0x3] }
  0xea   :  { %v1391_v41 = vmul.f32 -1.442695, %v149_v38 }
 0x154   :  { %v223_v24 = vpop.permute.xlu0 %222 }
 0x155   :  { %v225_v26 = vadd.f32 %v223_v24, %v174_v25 }
 0x157   :  { %1573 = vtanh.f32 %v225_v26  ;;  %v1393_v28 = vmul.f32 -1.442695, %v225_v26 }
 0x159   :  { %1575 = vpow2.f32 %v1393_v28 }
 0x161   :  { %v1574_v27 = vpop.eup %1573 }
 0x162   :  { %235 = vrot.lane.b32.xlu0 %v1574_v27, %s1705_s4 }
 0x163   :  { %v1576_v29 = vpop.eup %1575 }
 0x164   :  { %v229_v30 = vadd.f32 1.0, %v1576_v29 }
 0x166   :  { %1577 = vrcp.f32 %v229_v30 }
 0x170   :  { %v1578_v31 = vpop.eup %1577 }
 0x171   :  { %v233_v34 = vmul.f32 0.0, %v1578_v31 }
 0x1d4   :  { %v236_v32 = vpop.permute.xlu0 %235 }
 0x1d5   :  { %v238_v33 = vmul.f32 %v1578_v31, %v236_v32 }
 0x1d7   :  { %240 = vrot.lane.b32.xlu1 %v238_v33, %s1706_s29 }
 0x249   :  { %v241_v35 = vpop.permute.xlu1 %240 }
 0x24a   :  { %v1789_v37 = vadd.f32 %v241_v35, %v233_v34 }
 0x24c   :  { %1579 = vtanh.f32 %v1789_v37 }
 0x24d   :  { %1581 = vtanh.f32 %v149_v38 }
 0x24e   :  { %1583 = vpow2.f32 %v1391_v41 }
 0x256   :  { %v1580_v39 = vpop.eup %1579 }
 0x257   :  { %246 = vrot.lane.b32.xlu1 %v1580_v39, %s1707_s30  ;;  %v1582_v40 = vpop.eup %1581 }
 0x258   :  { %v1584_v42 = vpop.eup %1583 }
 0x259   :  { %v153_v43 = vadd.f32 1.0, %v1584_v42 }
 0x25b   :  { %159 = vrot.lane.b32.xlu1 %v1582_v40, %s1705_s4  ;;  %1585 = vrcp.f32 %v153_v43 }
 0x265   :  { %v1586_v47 = vpop.eup %1585 }
 0x266   :  { %v157_v51 = vmul.f32 0.0, %v1586_v47 }
 0x2c9   :  { %v247_v44 = vpop.permute.xlu1 %246 }
 0x2ca   :  { %v1794_v45 = vmul.f32 %v1578_v31, %v247_v44 }
 0x2cc   :  { %v336_v46 = vpack.c.bf16 %v1794_v45, %v1794_v45 }
 0x2cd   :  { %v160_v48 = vpop.permute.xlu1 %159 }
 0x2ce   :  { %v162_v49 = vmul.f32 %v1586_v47, %v160_v48  ;;  %338 = vrot.lane.b32.xlu0 %v336_v46, %s1706_s29  ;;  %v495_v46 = vld [vmem:[#allocation2 + $0xa] sm:$0x3] }
 0x2d0   :  { %164 = vrot.lane.b32.xlu1 %v162_v49, %s1706_s29 }
 0x340   :  { %v339_v50 = vpop.permute.xlu0 %338 }
 0x341   :  { %1486 = vmatmul.mubr.msk.bf16.vlgmr.msra.gmra.mrb[8].mxu1 %vm105_vm2, %v339_v50 }
 0x342   :  { %v165_v52 = vpop.permute.xlu1 %164  ;;  %1496 = vmatpush3.bf16.msra.mxu1 %v1761_v4  ;;  %1497 = vmatprep.mubr.msk.bf16.mxu1 %vm1702_vm0, %v1701_v0 }
 0x343   :  { %v1804_v53 = vadd.f32 %v165_v52, %v157_v51  ;;  %1507 = vmatprep.subr.bf16.mxu1 %v1701_v0 }
 0x345   :  { %1587 = vtanh.f32 %v1804_v53 }
 0x34f   :  { %v1588_v54 = vpop.eup %1587 }
 0x350   :  { %170 = vrot.lane.b32.xlu1 %v1588_v54, %s1707_s30 }
 0x3c2   :  { %v171_v55 = vpop.permute.xlu1 %170 }
 0x3c3   :  { %v1809_v56 = vmul.f32 %v1586_v47, %v171_v55 }
 0x3c5   :  { %v263_v57 = vpack.c.bf16 %v1809_v56, %v1809_v56 }
 0x3c7   :  { %265 = vrot.lane.b32.xlu1 %v263_v57, %s1708_s6 }
 0x414   :  { %v377_v58 = vpop.f32.mrb[8].mxu1 }
 0x415   :  { %384 = vrot.lane.b32.xlu0 %v377_v58, %s1704_s3  ;;  %v1487_v59 = vpop.f32.mrb[9].mxu1 }
 0x416   :  { %v380_v60 = vpop.f32.mrb[10].mxu1 }
 0x417   :  { %v1488_v61 = vpop.f32.mrb[11].mxu1 }
 0x439   :  { %v266_v62 = vpop.permute.xlu1 %265 }
 0x43a   :  { %1480 = vmatmul.mubr.msk.bf16.vlgmr.msra.gmra.mrb[4].mxu0 %vm105_vm2, %v266_v62 }
 0x43b   :  { %1490 = vmatpush3.bf16.msra.mxu0 %v1747_v2  ;;  %1491 = vmatprep.mubr.msk.bf16.mxu0 %vm1702_vm0, %v1701_v0 }
 0x43c   :  { %1501 = vmatprep.subr.bf16.mxu0 %v1701_v0 }
 0x487   :  { %v385_v1 = vpop.permute.xlu0 %384 }
 0x488   :  { %v387_v3 = vadd.f32 %v385_v1, %v335_v63  ;;  %v422_v1 = vld [vmem:[#allocation2 + $0x4] sm:$0x3] }
 0x48a   :  { %1589 = vtanh.f32 %v387_v3  ;;  %v1397_v6 = vmul.f32 -1.442695, %v387_v3 }
 0x48c   :  { %1591 = vpow2.f32 %v1397_v6 }
 0x494   :  { %v1590_v5 = vpop.eup %1589 }
 0x495   :  { %397 = vrot.lane.b32.xlu0 %v1590_v5, %s1705_s4 }
 0x496   :  { %v1592_v7 = vpop.eup %1591 }
 0x497   :  { %v391_v8 = vadd.f32 1.0, %v1592_v7 }
 0x499   :  { %1593 = vrcp.f32 %v391_v8 }
 0x4a3   :  { %v1594_v9 = vpop.eup %1593 }
 0x4a4   :  { %v395_v16 = vmul.f32 %v1594_v9, %v1789_v37 }
 0x507   :  { %v398_v10 = vpop.permute.xlu0 %397 }
 0x508   :  { %v400_v11 = vmul.f32 %v1594_v9, %v398_v10 }
 0x50a   :  { %402 = vrot.lane.b32.xlu0 %v400_v11, %s1706_s29 }
 0x50d   :  { %v304_v12 = vpop.f32.mrb[4].mxu0 }
 0x50e   :  { %v1481_v13 = vpop.f32.mrb[5].mxu0  ;;  %v310_v20 = vadd.f32 %v304_v12, %v262_v19 }
 0x50f   :  { %v307_v14 = vpop.f32.mrb[6].mxu0 }
 0x510   :  { %v1482_v15 = vpop.f32.mrb[7].mxu0  ;;  %v1395_v23 = vmul.f32 -1.442695, %v310_v20 }
 0x57c   :  { %v403_v17 = vpop.permute.xlu0 %402 }
 0x57d   :  { %v1823_v18 = vadd.f32 %v403_v17, %v395_v16 }
 0x57f   :  { %1595 = vtanh.f32 %v1823_v18 }
 0x580   :  { %1597 = vtanh.f32 %v310_v20 }
 0x581   :  { %1599 = vpow2.f32 %v1395_v23 }
 0x589   :  { %v1596_v21 = vpop.eup %1595 }
 0x58a   :  { %408 = vrot.lane.b32.xlu0 %v1596_v21, %s1707_s30  ;;  %v1598_v22 = vpop.eup %1597 }
 0x58b   :  { %v1600_v24 = vpop.eup %1599 }
 0x58c   :  { %v314_v25 = vadd.f32 1.0, %v1600_v24 }
 0x58e   :  { %320 = vrot.lane.b32.xlu0 %v1598_v22, %s1705_s4  ;;  %1601 = vrcp.f32 %v314_v25 }
 0x598   :  { %v1602_v30 = vpop.eup %1601 }
 0x599   :  { %v318_v33 = vmul.f32 %v1602_v30, %v1804_v53 }
 0x5fc   :  { %v409_v26 = vpop.permute.xlu0 %408 }
 0x5fd   :  { %v1828_v27 = vmul.f32 %v1594_v9, %v409_v26 }
 0x5ff   :  { %v496_v28 = vpack.c.bf16 %v1828_v27, %v1828_v27 }
 0x600   :  { %v321_v29 = vpop.permute.xlu0 %320 }
 0x601   :  { %498 = vrot.lane.b32.xlu1 %v496_v28, %s1706_s29  ;;  %v323_v31 = vmul.f32 %v1602_v30, %v321_v29 }
 0x605   :  { %325 = vrot.lane.b32.xlu1 %v323_v31, %s1706_s29 }
 0x673   :  { %v499_v32 = vpop.permute.xlu1 %498 }
 0x674   :  { %1498 = vmatmul.mubr.msk.bf16.vlgmr.msra.gmra.mrb[12].mxu1 %vm105_vm2, %v499_v32 }
 0x675   :  { %1508 = vmatpush3.bf16.msra.mxu1 %v1761_v4  ;;  %1509 = vmatprep.mubr.msk.bf16.mxu1 %vm1702_vm0, %v1701_v0 }
 0x676   :  { %1519 = vmatprep.subr.bf16.mxu1 %v1701_v0 }
 0x677   :  { %v326_v34 = vpop.permute.xlu1 %325 }
 0x678   :  { %v1840_v35 = vadd.f32 %v326_v34, %v318_v33 }
 0x67a   :  { %1603 = vtanh.f32 %v1840_v35 }
 0x684   :  { %v1604_v36 = vpop.eup %1603 }
 0x685   :  { %331 = vrot.lane.b32.xlu1 %v1604_v36, %s1707_s30 }
 0x6f7   :  { %v332_v37 = vpop.permute.xlu1 %331 }
 0x6f8   :  { %v1844_v38 = vmul.f32 %v1602_v30, %v332_v37  ;;  %v655_v30 = vld [vmem:[#allocation2 + $0x8] sm:$0x3] }
 0x6fa   :  { %v423_v39 = vpack.c.bf16 %v1844_v38, %v1844_v38 }
 0x6fc   :  { %425 = vrot.lane.b32.xlu1 %v423_v39, %s1708_s6 }
 0x747   :  { %v537_v40 = vpop.f32.mrb[12].mxu1 }
 0x748   :  { %v1499_v41 = vpop.f32.mrb[13].mxu1  ;;  %544 = vrot.lane.b32.xlu0 %v537_v40, %s1704_s3 }
 0x749   :  { %v540_v42 = vpop.f32.mrb[14].mxu1 }
 0x74a   :  { %v1500_v43 = vpop.f32.mrb[15].mxu1 }
 0x76e   :  { %v426_v44 = vpop.permute.xlu1 %425 }
 0x76f   :  { %1492 = vmatmul.mubr.msk.bf16.vlgmr.msra.gmra.mrb[8].mxu0 %vm105_vm2, %v426_v44 }
 0x770   :  { %1502 = vmatpush3.bf16.msra.mxu0 %v1747_v2  ;;  %1503 = vmatprep.mubr.msk.bf16.mxu0 %vm1702_vm0, %v1701_v0 }
 0x771   :  { %1513 = vmatprep.subr.bf16.mxu0 %v1701_v0 }
 0x7ba   :  { %v545_v47 = vpop.permute.xlu0 %544 }
 0x7bb   :  { %v547_v48 = vadd.f32 %v545_v47, %v495_v46 }
 0x7bd   :  { %1605 = vtanh.f32 %v547_v48  ;;  %v1401_v50 = vmul.f32 -1.442695, %v547_v48 }
 0x7bf   :  { %1607 = vpow2.f32 %v1401_v50 }
 0x7c7   :  { %v1606_v49 = vpop.eup %1605 }
 0x7c8   :  { %557 = vrot.lane.b32.xlu0 %v1606_v49, %s1705_s4  ;;  %v582_v49 = vld [vmem:[#allocation2 + $0x6] sm:$0x3] }
 0x7c9   :  { %v1608_v51 = vpop.eup %1607 }
 0x7ca   :  { %v551_v52 = vadd.f32 1.0, %v1608_v51 }
 0x7cc   :  { %1609 = vrcp.f32 %v551_v52 }
 0x7d6   :  { %v1610_v53 = vpop.eup %1609 }
 0x7d7   :  { %v555_v61 = vmul.f32 %v1610_v53, %v1823_v18 }
 0x83a   :  { %v558_v54 = vpop.permute.xlu0 %557 }
 0x83b   :  { %v560_v55 = vmul.f32 %v1610_v53, %v558_v54 }
 0x83d   :  { %562 = vrot.lane.b32.xlu0 %v560_v55, %s1706_s29 }
 0x842   :  { %v464_v57 = vpop.f32.mrb[8].mxu0 }
 0x843   :  { %v1493_v58 = vpop.f32.mrb[9].mxu0  ;;  %v470_v3 = vadd.f32 %v464_v57, %v422_v1 }
 0x844   :  { %v467_v59 = vpop.f32.mrb[10].mxu0 }
 0x845   :  { %v1494_v60 = vpop.f32.mrb[11].mxu0  ;;  %v1399_v7 = vmul.f32 -1.442695, %v470_v3 }
 0x8af   :  { %v563_v62 = vpop.permute.xlu0 %562 }
 0x8b0   :  { %v1858_v63 = vadd.f32 %v563_v62, %v555_v61 }
 0x8b2   :  { %1611 = vtanh.f32 %v1858_v63 }
 0x8b3   :  { %1613 = vtanh.f32 %v470_v3 }
 0x8b4   :  { %1615 = vpow2.f32 %v1399_v7 }
 0x8bc   :  { %v1612_v5 = vpop.eup %1611 }
 0x8bd   :  { %568 = vrot.lane.b32.xlu1 %v1612_v5, %s1707_s30  ;;  %v1614_v6 = vpop.eup %1613 }
 0x8be   :  { %v1616_v8 = vpop.eup %1615 }
 0x8bf   :  { %v474_v9 = vadd.f32 1.0, %v1616_v8 }
 0x8c1   :  { %480 = vrot.lane.b32.xlu1 %v1614_v6, %s1705_s4  ;;  %1617 = vrcp.f32 %v474_v9 }
 0x8cb   :  { %v1618_v14 = vpop.eup %1617 }
 0x8cc   :  { %v478_v17 = vmul.f32 %v1618_v14, %v1840_v35 }
 0x92f   :  { %v569_v10 = vpop.permute.xlu1 %568 }
 0x930   :  { %v1863_v11 = vmul.f32 %v1610_v53, %v569_v10 }
 0x932   :  { %v656_v12 = vpack.c.bf16 %v1863_v11, %v1863_v11 }
 0x933   :  { %v481_v13 = vpop.permute.xlu1 %480 }
 0x934   :  { %658 = vrot.lane.b32.xlu0 %v656_v12, %s1706_s29  ;;  %v483_v15 = vmul.f32 %v1618_v14, %v481_v13 }
 0x938   :  { %485 = vrot.lane.b32.xlu0 %v483_v15, %s1706_s29 }
 0x9a6   :  { %v659_v16 = vpop.permute.xlu0 %658 }
 0x9a7   :  { %1510 = vmatmul.mubr.msk.bf16.vlgmr.msra.gmra.mrb[16].mxu1 %vm105_vm2, %v659_v16  ;;  %v815_v16 = vld [vmem:[#allocation2 + $0x6] sm:$0x3] }
 0x9a8   :  { %1520 = vmatpush3.bf16.msra.mxu1 %v1761_v4  ;;  %1521 = vmatprep.mubr.msk.bf16.mxu1 %vm1702_vm0, %v1701_v0 }
 0x9a9   :  { %1531 = vmatprep.subr.bf16.mxu1 %v1701_v0 }
 0x9aa   :  { %v486_v18 = vpop.permute.xlu0 %485 }
 0x9ab   :  { %v1875_v19 = vadd.f32 %v486_v18, %v478_v17 }
 0x9ad   :  { %1619 = vtanh.f32 %v1875_v19 }
 0x9b7   :  { %v1620_v20 = vpop.eup %1619 }
 0x9b8   :  { %491 = vrot.lane.b32.xlu1 %v1620_v20, %s1707_s30 }
 0xa2a   :  { %v492_v21 = vpop.permute.xlu1 %491 }
 0xa2b   :  { %v1879_v22 = vmul.f32 %v1618_v14, %v492_v21 }
 0xa2d   :  { %v583_v23 = vpack.c.bf16 %v1879_v22, %v1879_v22 }
 0xa2f   :  { %585 = vrot.lane.b32.xlu1 %v583_v23, %s1708_s6 }
 0xa7a   :  { %v697_v24 = vpop.f32.mrb[16].mxu1 }
 0xa7b   :  { %v1511_v25 = vpop.f32.mrb[17].mxu1  ;;  %704 = vrot.lane.b32.xlu0 %v697_v24, %s1704_s3 }
 0xa7c   :  { %v700_v26 = vpop.f32.mrb[18].mxu1 }
 0xa7d   :  { %v1512_v28 = vpop.f32.mrb[19].mxu1 }
 0xa7e   :  { %v742_v28 = vld [vmem:[#allocation2 + $0x8] sm:$0x3] }
 0xaa1   :  { %v586_v29 = vpop.permute.xlu1 %585 }
 0xaa2   :  { %1504 = vmatmul.mubr.msk.bf16.vlgmr.msra.gmra.mrb[12].mxu0 %vm105_vm2, %v586_v29 }
 0xaa3   :  { %1514 = vmatpush3.bf16.msra.mxu0 %v1747_v2  ;;  %1515 = vmatprep.mubr.msk.bf16.mxu0 %vm1702_vm0, %v1701_v0 }
 0xaa4   :  { %1525 = vmatprep.subr.bf16.mxu0 %v1701_v0 }
 0xaed   :  { %v705_v31 = vpop.permute.xlu0 %704 }
 0xaee   :  { %v707_v32 = vadd.f32 %v705_v31, %v655_v30 }
 0xaf0   :  { %1621 = vtanh.f32 %v707_v32  ;;  %v1405_v34 = vmul.f32 -1.442695, %v707_v32 }
 0xaf2   :  { %1623 = vpow2.f32 %v1405_v34 }
 0xafa   :  { %v1622_v33 = vpop.eup %1621 }
 0xafb   :  { %717 = vrot.lane.b32.xlu0 %v1622_v33, %s1705_s4 }
 0xafc   :  { %v1624_v35 = vpop.eup %1623 }
 0xafd   :  { %v711_v36 = vadd.f32 1.0, %v1624_v35 }
 0xaff   :  { %1625 = vrcp.f32 %v711_v36 }
 0xb09   :  { %v1626_v37 = vpop.eup %1625 }
 0xb0a   :  { %v715_v46 = vmul.f32 %v1626_v37, %v1858_v63 }
 0xb6d   :  { %v718_v39 = vpop.permute.xlu0 %717 }
 0xb6e   :  { %v720_v40 = vmul.f32 %v1626_v37, %v718_v39 }
 0xb70   :  { %722 = vrot.lane.b32.xlu1 %v720_v40, %s1706_s29 }
 0xb75   :  { %v624_v41 = vpop.f32.mrb[12].mxu0 }
 0xb76   :  { %v1505_v42 = vpop.f32.mrb[13].mxu0  ;;  %v630_v50 = vadd.f32 %v624_v41, %v582_v49 }
 0xb77   :  { %v627_v43 = vpop.f32.mrb[14].mxu0 }
 0xb78   :  { %v1506_v44 = vpop.f32.mrb[15].mxu0  ;;  %v1403_v53 = vmul.f32 -1.442695, %v630_v50 }
 0xbe2   :  { %v723_v47 = vpop.permute.xlu1 %722 }
 0xbe3   :  { %v1893_v48 = vadd.f32 %v723_v47, %v715_v46 }
 0xbe5   :  { %1627 = vtanh.f32 %v1893_v48 }
 0xbe6   :  { %1629 = vtanh.f32 %v630_v50 }
 0xbe7   :  { %1631 = vpow2.f32 %v1403_v53 }
 0xbef   :  { %v1628_v51 = vpop.eup %1627 }
 0xbf0   :  { %728 = vrot.lane.b32.xlu0 %v1628_v51, %s1707_s30  ;;  %v1630_v52 = vpop.eup %1629 }
 0xbf1   :  { %v1632_v54 = vpop.eup %1631 }
 0xbf2   :  { %v634_v55 = vadd.f32 1.0, %v1632_v54 }
 0xbf4   :  { %640 = vrot.lane.b32.xlu0 %v1630_v52, %s1705_s4  ;;  %1633 = vrcp.f32 %v634_v55 }
 0xbfe   :  { %v1634_v61 = vpop.eup %1633 }
 0xbff   :  { %v638_v1 = vmul.f32 %v1634_v61, %v1875_v19 }
 0xc62   :  { %v729_v57 = vpop.permute.xlu0 %728 }
 0xc63   :  { %v1898_v58 = vmul.f32 %v1626_v37, %v729_v57 }
 0xc65   :  { %v816_v59 = vpack.c.bf16 %v1898_v58, %v1898_v58 }
 0xc66   :  { %v641_v60 = vpop.permute.xlu0 %640 }
 0xc67   :  { %818 = vrot.lane.b32.xlu1 %v816_v59, %s1706_s29  ;;  %v643_v62 = vmul.f32 %v1634_v61, %v641_v60 }
 0xc6b   :  { %645 = vrot.lane.b32.xlu1 %v643_v62, %s1706_s29 }
 0xcd9   :  { %v819_v63 = vpop.permute.xlu1 %818 }
 0xcda   :  { %1522 = vmatmul.mubr.msk.bf16.vlgmr.msra.gmra.mrb[20].mxu1 %vm105_vm2, %v819_v63 }
 0xcdb   :  { %1532 = vmatpush3.bf16.msra.mxu1 %v1761_v4  ;;  %1533 = vmatprep.mubr.msk.bf16.mxu1 %vm1702_vm0, %v1701_v0 }
 0xcdc   :  { %1543 = vmatprep.subr.bf16.mxu1 %v1701_v0 }
 0xcdd   :  { %v646_v3 = vpop.permute.xlu1 %645 }
 0xcde   :  { %v648_v5 = vadd.f32 %v646_v3, %v638_v1  ;;  %v975_v3 = vld [vmem:[#allocation2 + $0x4] sm:$0x3] }
 0xce0   :  { %1635 = vtanh.f32 %v648_v5 }
 0xcea   :  { %v1636_v6 = vpop.eup %1635 }
 0xceb   :  { %651 = vrot.lane.b32.xlu0 %v1636_v6, %s1707_s30 }
 0xd5d   :  { %v652_v7 = vpop.permute.xlu0 %651 }
 0xd5e   :  { %v1911_v8 = vmul.f32 %v1634_v61, %v652_v7 }
 0xd60   :  { %v743_v9 = vpack.c.bf16 %v1911_v8, %v1911_v8 }
 0xd62   :  { %745 = vrot.lane.b32.xlu1 %v743_v9, %s1708_s6  ;;  %v902_v9 = vld [vmem:[#allocation2 + $0xa] sm:$0x3] }
 0xdad   :  { %v857_v10 = vpop.f32.mrb[20].mxu1 }
 0xdae   :  { %v1523_v12 = vpop.f32.mrb[21].mxu1  ;;  %864 = vrot.lane.b32.xlu0 %v857_v10, %s1704_s3 }
 0xdaf   :  { %v860_v13 = vpop.f32.mrb[22].mxu1 }
 0xdb0   :  { %v1524_v14 = vpop.f32.mrb[23].mxu1 }
 0xdd4   :  { %v746_v15 = vpop.permute.xlu1 %745 }
 0xdd5   :  { %1516 = vmatmul.mubr.msk.bf16.vlgmr.msra.gmra.mrb[16].mxu0 %vm105_vm2, %v746_v15 }
 0xdd6   :  { %1526 = vmatpush3.bf16.msra.mxu0 %v1747_v2  ;;  %1527 = vmatprep.mubr.msk.bf16.mxu0 %vm1702_vm0, %v1701_v0 }
 0xdd7   :  { %1537 = vmatprep.subr.bf16.mxu0 %v1701_v0 }
 0xe20   :  { %v865_v17 = vpop.permute.xlu0 %864 }
 0xe21   :  { %v867_v18 = vadd.f32 %v865_v17, %v815_v16 }
 0xe23   :  { %1637 = vtanh.f32 %v867_v18  ;;  %v1409_v20 = vmul.f32 -1.442695, %v867_v18 }
 0xe25   :  { %1639 = vpow2.f32 %v1409_v20 }
 0xe2d   :  { %v1638_v19 = vpop.eup %1637 }
 0xe2e   :  { %877 = vrot.lane.b32.xlu1 %v1638_v19, %s1705_s4 }
 0xe2f   :  { %v1640_v21 = vpop.eup %1639 }
 0xe30   :  { %v871_v23 = vadd.f32 1.0, %v1640_v21 }
 0xe32   :  { %1641 = vrcp.f32 %v871_v23 }
 0xe3c   :  { %v1642_v24 = vpop.eup %1641 }
 0xe3d   :  { %v875_v36 = vmul.f32 %v1642_v24, %v1893_v48 }
 0xea0   :  { %v878_v25 = vpop.permute.xlu1 %877 }
 0xea1   :  { %v880_v26 = vmul.f32 %v1642_v24, %v878_v25 }
 0xea3   :  { %882 = vrot.lane.b32.xlu0 %v880_v26, %s1706_s29 }
 0xea8   :  { %v784_v29 = vpop.f32.mrb[16].mxu0 }
 0xea9   :  { %v790_v30 = vadd.f32 %v784_v29, %v742_v28  ;;  %v1517_v31 = vpop.f32.mrb[17].mxu0 }
 0xeaa   :  { %v787_v32 = vpop.f32.mrb[18].mxu0 }
 0xeab   :  { %1643 = vtanh.f32 %v790_v30  ;;  %v1518_v33 = vpop.f32.mrb[19].mxu0  ;;  %v1407_v35 = vmul.f32 -1.442695, %v790_v30 }
 0xead   :  { %1645 = vpow2.f32 %v1407_v35 }
 0xeb5   :  { %v1644_v34 = vpop.eup %1643 }
 0xeb6   :  { %800 = vrot.lane.b32.xlu0 %v1644_v34, %s1705_s4 }
 0xeb7   :  { %v1646_v40 = vpop.eup %1645 }
 0xeb8   :  { %v794_v41 = vadd.f32 1.0, %v1646_v40 }
 0xf15   :  { %v883_v37 = vpop.permute.xlu0 %882 }
 0xf16   :  { %v1926_v39 = vadd.f32 %v883_v37, %v875_v36 }
 0xf18   :  { %1647 = vtanh.f32 %v1926_v39 }
 0xf19   :  { %1649 = vrcp.f32 %v794_v41 }
 0xf22   :  { %v1648_v42 = vpop.eup %1647 }
 0xf23   :  { %888 = vrot.lane.b32.xlu1 %v1648_v42, %s1707_s30  ;;  %v1650_v43 = vpop.eup %1649 }
 0xf24   :  { %v798_v50 = vmul.f32 %v1650_v43, %v648_v5 }
 0xf28   :  { %v801_v44 = vpop.permute.xlu0 %800 }
 0xf29   :  { %v803_v46 = vmul.f32 %v1650_v43, %v801_v44 }
 0xf2b   :  { %805 = vrot.lane.b32.xlu0 %v803_v46, %s1706_s29 }
 0xf95   :  { %v889_v47 = vpop.permute.xlu1 %888 }
 0xf96   :  { %v1931_v49 = vmul.f32 %v1642_v24, %v889_v47 }
 0xf98   :  { %v976_v48 = vpack.c.bf16 %v1931_v49, %v1931_v49 }
 0xf9a   :  { %978 = vrot.lane.b32.xlu1 %v976_v48, %s1706_s29 }
 0xf9d   :  { %v806_v51 = vpop.permute.xlu0 %805 }
 0xf9e   :  { %v808_v52 = vadd.f32 %v806_v51, %v798_v50 }
 0xfa0   :  { %1651 = vtanh.f32 %v808_v52 }
 0xfaa   :  { %v1652_v53 = vpop.eup %1651 }
 0xfab   :  { %811 = vrot.lane.b32.xlu1 %v1652_v53, %s1707_s30 }
0x100c   :  { %v979_v54 = vpop.permute.xlu1 %978 }
0x100d   :  { %1534 = vmatmul.mubr.msk.bf16.vlgmr.msra.gmra.mrb[24].mxu1 %vm105_vm2, %v979_v54  ;;  %v1062_v54 = vld [vmem:[#allocation2 + $0xc] sm:$0x3] }
0x100e   :  { %1544 = vmatpush3.bf16.msra.mxu1 %v1761_v4  ;;  %1545 = vmatprep.mubr.msk.bf16.mxu1 %vm1702_vm0, %v1701_v0 }
0x100f   :  { %1555 = vmatprep.subr.bf16.mxu1 %v1701_v0 }
0x101d   :  { %v812_v55 = vpop.permute.xlu1 %811 }
0x101e   :  { %v1942_v57 = vmul.f32 %v1650_v43, %v812_v55 }
0x1020   :  { %v903_v59 = vpack.c.bf16 %v1942_v57, %v1942_v57 }
0x1022   :  { %905 = vrot.lane.b32.xlu0 %v903_v59, %s1708_s6 }
0x1094   :  { %v906_v60 = vpop.permute.xlu0 %905 }
0x1095   :  { %1528 = vmatmul.mubr.msk.bf16.vlgmr.msra.gmra.mrb[20].mxu0 %vm105_vm2, %v906_v60 }
0x1096   :  { %1538 = vmatpush3.bf16.msra.mxu0 %v1747_v2  ;;  %1539 = vmatprep.mubr.msk.bf16.mxu0 %vm1702_vm0, %v1701_v0 }
0x1097   :  { %1549 = vmatprep.subr.bf16.mxu0 %v1701_v0 }
0x10e0   :  { %v1017_v61 = vpop.f32.mrb[24].mxu1 }
0x10e1   :  { %v1535_v62 = vpop.f32.mrb[25].mxu1  ;;  %1024 = vrot.lane.b32.xlu1 %v1017_v61, %s1704_s3 }
0x10e2   :  { %v1020_v63 = vpop.f32.mrb[26].mxu1 }
0x10e3   :  { %v1536_v1 = vpop.f32.mrb[27].mxu1 }
0x1153   :  { %v1025_v5 = vpop.permute.xlu1 %1024 }
0x1154   :  { %v1027_v6 = vadd.f32 %v1025_v5, %v975_v3 }
0x1156   :  { %1653 = vtanh.f32 %v1027_v6  ;;  %v1413_v17 = vmul.f32 -1.442695, %v1027_v6 }
0x1160   :  { %v1654_v7 = vpop.eup %1653 }
0x1161   :  { %1037 = vrot.lane.b32.xlu0 %v1654_v7, %s1705_s4 }
0x1168   :  { %v944_v10 = vpop.f32.mrb[20].mxu0 }
0x1169   :  { %v950_v12 = vadd.f32 %v944_v10, %v902_v9  ;;  %v1529_v13 = vpop.f32.mrb[21].mxu0 }
0x116a   :  { %v947_v14 = vpop.f32.mrb[22].mxu0 }
0x116b   :  { %1655 = vtanh.f32 %v950_v12  ;;  %v1530_v15 = vpop.f32.mrb[23].mxu0  ;;  %v1411_v20 = vmul.f32 -1.442695, %v950_v12 }
0x116c   :  { %1657 = vpow2.f32 %v1413_v17 }
0x1175   :  { %v1656_v16 = vpop.eup %1655 }
0x1176   :  { %960 = vrot.lane.b32.xlu0 %v1656_v16, %s1705_s4  ;;  %v1658_v18 = vpop.eup %1657 }
0x1177   :  { %v1031_v19 = vadd.f32 1.0, %v1658_v18 }
0x1179   :  { %1659 = vrcp.f32 %v1031_v19 }
0x117a   :  { %1661 = vpow2.f32 %v1411_v20 }
0x1183   :  { %v1660_v21 = vpop.eup %1659 }
0x1184   :  { %v1662_v25 = vpop.eup %1661  ;;  %v1035_v31 = vmul.f32 %v1660_v21, %v1926_v39 }
0x1185   :  { %v954_v26 = vadd.f32 1.0, %v1662_v25 }
0x1187   :  { %1663 = vrcp.f32 %v954_v26 }
0x1191   :  { %v1664_v28 = vpop.eup %1663 }
0x1192   :  { %v958_v35 = vmul.f32 %v1664_v28, %v808_v52 }
0x11d3   :  { %v1038_v23 = vpop.permute.xlu0 %1037 }
0x11d4   :  { %v1040_v24 = vmul.f32 %v1660_v21, %v1038_v23 }
0x11d6   :  { %1042 = vrot.lane.b32.xlu1 %v1040_v24, %s1706_s29 }
0x11e8   :  { %v961_v29 = vpop.permute.xlu0 %960 }
0x11e9   :  { %v963_v30 = vmul.f32 %v1664_v28, %v961_v29 }
0x11eb   :  { %965 = vrot.lane.b32.xlu0 %v963_v30, %s1706_s29 }
0x1248   :  { %v1043_v32 = vpop.permute.xlu1 %1042 }
0x1249   :  { %v1958_v33 = vadd.f32 %v1043_v32, %v1035_v31 }
0x124b   :  { %1665 = vtanh.f32 %v1958_v33 }
0x1255   :  { %v1666_v34 = vpop.eup %1665 }
0x1256   :  { %1048 = vrot.lane.b32.xlu1 %v1666_v34, %s1707_s30 }
0x125d   :  { %v966_v36 = vpop.permute.xlu0 %965 }
0x125e   :  { %v968_v37 = vadd.f32 %v966_v36, %v958_v35  ;;  %v1222_v36 = vld [vmem:[#allocation2 + $0xe] sm:$0x3] }
0x1260   :  { %1667 = vtanh.f32 %v968_v37 }
0x126a   :  { %v1668_v40 = vpop.eup %1667 }
0x126b   :  { %971 = vrot.lane.b32.xlu0 %v1668_v40, %s1707_s30 }
0x12c8   :  { %v1049_v41 = vpop.permute.xlu1 %1048 }
0x12c9   :  { %v1963_v42 = vmul.f32 %v1660_v21, %v1049_v41 }
0x12cb   :  { %v1136_v39 = vpack.c.bf16 %v1963_v42, %v1963_v42 }
0x12cd   :  { %1138 = vrot.lane.b32.xlu1 %v1136_v39, %s1706_s29 }
0x12dd   :  { %v972_v43 = vpop.permute.xlu0 %971 }
0x12de   :  { %v1968_v44 = vmul.f32 %v1664_v28, %v972_v43 }
0x12e0   :  { %v1063_v46 = vpack.c.bf16 %v1968_v44, %v1968_v44 }
0x12e2   :  { %1065 = vrot.lane.b32.xlu1 %v1063_v46, %s1708_s6 }
0x133f   :  { %v1139_v47 = vpop.permute.xlu1 %1138 }
0x1340   :  { %1546 = vmatmul.mubr.msk.bf16.vlgmr.msra.gmra.mrb[28].mxu1 %vm105_vm2, %v1139_v47 }
0x1341   :  { %1556 = vmatpush3.bf16.msra.mxu1 %v1761_v4  ;;  %1557 = vmatprep.mubr.msk.bf16.mxu1 %vm1702_vm0, %v1701_v0 }
0x1354   :  { %v1066_v48 = vpop.permute.xlu1 %1065 }
0x1355   :  { %1540 = vmatmul.mubr.msk.bf16.vlgmr.msra.gmra.mrb[24].mxu0 %vm105_vm2, %v1066_v48 }
0x1356   :  { %1550 = vmatpush3.bf16.msra.mxu0 %v1747_v2  ;;  %1551 = vmatprep.mubr.msk.bf16.mxu0 %vm1702_vm0, %v1701_v0  ;;  %v1135_v2 = vld [vmem:[#allocation2 + $0x2] sm:$0x3] }
0x1413   :  { %v1177_v50 = vpop.f32.mrb[28].mxu1 }
0x1414   :  { %v1547_v51 = vpop.f32.mrb[29].mxu1  ;;  %1184 = vrot.lane.b32.xlu0 %v1177_v50, %s1704_s3 }
0x1415   :  { %v1180_v52 = vpop.f32.mrb[30].mxu1 }
0x1416   :  { %v1548_v53 = vpop.f32.mrb[31].mxu1 }
0x1428   :  { %v1104_v55 = vpop.f32.mrb[24].mxu0 }
0x1429   :  { %v1110_v4 = vadd.f32 %v1104_v55, %v1062_v54  ;;  %v1541_v59 = vpop.f32.mrb[25].mxu0 }
0x142a   :  { %v1107_v60 = vpop.f32.mrb[26].mxu0 }
0x142b   :  { %1669 = vtanh.f32 %v1110_v4  ;;  %v1542_v61 = vpop.f32.mrb[27].mxu0  ;;  %v1415_v0 = vmul.f32 -1.442695, %v1110_v4  ;;  %v1295_v60 = vld [vmem:[#allocation2] sm:$0x3] }
0x1435   :  { %v1670_v62 = vpop.eup %1669 }
0x1436   :  { %1120 = vrot.lane.b32.xlu0 %v1670_v62, %s1705_s4 }
0x1486   :  { %v1185_v63 = vpop.permute.xlu0 %1184 }
0x1487   :  { %v1187_v1 = vadd.f32 %v1185_v63, %v1135_v2 }
0x1489   :  { %1671 = vtanh.f32 %v1187_v1  ;;  %v1417_v12 = vmul.f32 -1.442695, %v1187_v1 }
0x148a   :  { %1673 = vpow2.f32 %v1415_v0 }
0x1493   :  { %v1672_v3 = vpop.eup %1671 }
0x1494   :  { %1197 = vrot.lane.b32.xlu1 %v1672_v3, %s1705_s4  ;;  %v1674_v5 = vpop.eup %1673 }
0x1495   :  { %v1114_v6 = vadd.f32 1.0, %v1674_v5 }
0x1497   :  { %1675 = vrcp.f32 %v1114_v6 }
0x1498   :  { %1677 = vpow2.f32 %v1417_v12 }
0x14a1   :  { %v1676_v7 = vpop.eup %1675 }
0x14a2   :  { %v1678_v13 = vpop.eup %1677  ;;  %v1118_v18 = vmul.f32 %v1676_v7, %v968_v37 }
0x14a3   :  { %v1191_v14 = vadd.f32 1.0, %v1678_v13 }
0x14a5   :  { %1679 = vrcp.f32 %v1191_v14 }
0x14a8   :  { %v1121_v9 = vpop.permute.xlu0 %1120 }
0x14a9   :  { %v1123_v10 = vmul.f32 %v1676_v7, %v1121_v9 }
0x14ab   :  { %1125 = vrot.lane.b32.xlu0 %v1123_v10, %s1706_s29 }
0x14af   :  { %v1680_v15 = vpop.eup %1679 }
0x14b0   :  { %v1195_v23 = vmul.f32 %v1680_v15, %v1958_v33 }
0x1506   :  { %v1198_v16 = vpop.permute.xlu1 %1197 }
0x1507   :  { %v1200_v17 = vmul.f32 %v1680_v15, %v1198_v16 }
0x1509   :  { %1202 = vrot.lane.b32.xlu1 %v1200_v17, %s1706_s29 }
0x151d   :  { %v1126_v19 = vpop.permute.xlu0 %1125 }
0x151e   :  { %v1128_v20 = vadd.f32 %v1126_v19, %v1118_v18 }
0x1520   :  { %1681 = vtanh.f32 %v1128_v20 }
0x152a   :  { %v1682_v21 = vpop.eup %1681 }
0x152b   :  { %1131 = vrot.lane.b32.xlu0 %v1682_v21, %s1707_s30 }
0x157b   :  { %v1203_v24 = vpop.permute.xlu1 %1202 }
0x157c   :  { %v1988_v25 = vadd.f32 %v1203_v24, %v1195_v23 }
0x157e   :  { %1683 = vtanh.f32 %v1988_v25 }
0x1588   :  { %v1684_v26 = vpop.eup %1683 }
0x1589   :  { %1208 = vrot.lane.b32.xlu1 %v1684_v26, %s1707_s30 }
0x159d   :  { %v1132_v28 = vpop.permute.xlu0 %1131 }
0x159e   :  { %v1134_v29 = vmul.f32 %v1676_v7, %v1132_v28 }
0x15a0   :  { %v1223_v30 = vpack.c.bf16 %v1134_v29, %v1134_v29 }
0x15a2   :  { %1225 = vrot.lane.b32.xlu0 %v1223_v30, %s1708_s6 }
0x15fb   :  { %v1209_v31 = vpop.permute.xlu1 %1208 }
0x15fc   :  { %v1993_v32 = vmul.f32 %v1680_v15, %v1209_v31 }
0x15fe   :  { %v1296_v34 = vpack.c.bf16 %v1993_v32, %v1993_v32 }
0x1600   :  { %1298 = vrot.lane.b32.xlu1 %v1296_v34, %s1706_s29 }
0x1614   :  { %v1226_v33 = vpop.permute.xlu0 %1225 }
0x1615   :  { %1552 = vmatmul.mubr.msk.bf16.vlgmr.msra.gmra.mrb[28].mxu0 %vm105_vm2, %v1226_v33 }
0x1672   :  { %v1299_v35 = vpop.permute.xlu1 %1298 }
0x1673   :  { %1558 = vmatmul.mubr.msk.bf16.vlgmr.msra.gmra.mrb[32].mxu1 %vm105_vm2, %v1299_v35 }
0x16e8   :  { %v1264_v37 = vpop.f32.mrb[28].mxu0 }
0x16e9   :  { %v1270_v40 = vadd.f32 %v1264_v37, %v1222_v36  ;;  %v1553_v41 = vpop.f32.mrb[29].mxu0 }
0x16ea   :  { %v1267_v39 = vpop.f32.mrb[30].mxu0 }
0x16eb   :  { %1685 = vtanh.f32 %v1270_v40  ;;  %v1554_v43 = vpop.f32.mrb[31].mxu0  ;;  %v1419_v51 = vmul.f32 -1.442695, %v1270_v40 }
0x16ed   :  { %1687 = vpow2.f32 %v1419_v51 }
0x16f5   :  { %v1686_v46 = vpop.eup %1685 }
0x16f6   :  { %1280 = vrot.lane.b32.xlu0 %v1686_v46, %s1705_s4 }
0x16f7   :  { %v1688_v53 = vpop.eup %1687 }
0x16f8   :  { %v1274_v54 = vadd.f32 1.0, %v1688_v53 }
0x16fa   :  { %1689 = vrcp.f32 %v1274_v54 }
0x1704   :  { %v1690_v55 = vpop.eup %1689 }
0x1705   :  { %v1278_v63 = vmul.f32 %v1690_v55, %v1128_v20 }
0x1746   :  { %v1337_v47 = vpop.f32.mrb[32].mxu1 }
0x1747   :  { %1344 = vrot.lane.b32.xlu1 %v1337_v47, %s1704_s3  ;;  %v1559_v48 = vpop.f32.mrb[33].mxu1 }
0x1748   :  { %v1340_v50 = vpop.f32.mrb[34].mxu1 }
0x1749   :  { %v1560_v52 = vpop.f32.mrb[35].mxu1 }
0x1768   :  { %v1281_v4 = vpop.permute.xlu0 %1280 }
0x1769   :  { %v1283_v59 = vmul.f32 %v1690_v55, %v1281_v4 }
0x176b   :  { %1285 = vrot.lane.b32.xlu0 %v1283_v59, %s1706_s29 }
0x17b9   :  { %v1345_v61 = vpop.permute.xlu1 %1344 }
0x17ba   :  { %v1347_v62 = vadd.f32 %v1345_v61, %v1295_v60 }
0x17bc   :  { %1691 = vtanh.f32 %v1347_v62  ;;  %v1421_v5 = vmul.f32 -1.442695, %v1347_v62 }
0x17c6   :  { %v1692_v2 = vpop.eup %1691 }
0x17c7   :  { %1357 = vrot.lane.b32.xlu1 %v1692_v2, %s1705_s4 }
0x17dd   :  { %v1286_v1 = vpop.permute.xlu0 %1285 }
0x17de   :  { %v1288_v0 = vadd.f32 %v1286_v1, %v1278_v63 }
0x17e0   :  { %1693 = vtanh.f32 %v1288_v0 }
0x17e1   :  { %1695 = vpow2.f32 %v1421_v5 }
0x17ea   :  { %v1694_v3 = vpop.eup %1693 }
0x17eb   :  { %1291 = vrot.lane.b32.xlu0 %v1694_v3, %s1707_s30 }
0x17ef   :  { %251 = vrot.lane.b32.xlu0 %v1809_v56, %s1708_s6  ;;  %v1696_v56 = vpop.eup %1695 }
0x17f0   :  { %v1351_v6 = vadd.f32 1.0, %v1696_v56 }
0x17f2   :  { %1697 = vrcp.f32 %v1351_v6 }
0x17f3   :  { %413 = vrot.lane.b32.xlu0 %v1844_v38, %s1708_s6 }
0x17f7   :  { %573 = vrot.lane.b32.xlu0 %v1879_v22, %s1708_s6 }
0x17fb   :  { %733 = vrot.lane.b32.xlu0 %v1911_v8, %s1708_s6 }
0x17fc   :  { %v1698_v38 = vpop.eup %1697 }
0x17fd   :  { %v1355_v13 = vmul.f32 %v1698_v38, %v1988_v25 }
0x17ff   :  { %893 = vrot.lane.b32.xlu0 %v1942_v57, %s1708_s6 }
0x1803   :  { %1053 = vrot.lane.b32.xlu0 %v1968_v44, %s1708_s6 }
0x1807   :  { %1213 = vrot.lane.b32.xlu0 %v1134_v29, %s1708_s6 }
0x1839   :  { %v1358_v7 = vpop.permute.xlu1 %1357 }
0x183a   :  { %v1360_v9 = vmul.f32 %v1698_v38, %v1358_v7 }
0x183c   :  { %1362 = vrot.lane.b32.xlu1 %v1360_v9, %s1706_s29 }
0x185d   :  { %v1292_v22 = vpop.permute.xlu0 %1291 }
0x185e   :  { %v1294_v8 = vmul.f32 %v1690_v55, %v1292_v22 }
0x1860   :  { %1373 = vrot.lane.b32.xlu0 %v1294_v8, %s1708_s6 }
0x1861   :  { %v252_v57 = vpop.permute.xlu0 %251 }
0x1862   :  { %255 = vst.msk [vmem:[%s2106_s5] sm:$0x3] %vm254_vm3, %v252_v57 }
0x1865   :  { %v414_v44 = vpop.permute.xlu0 %413 }
0x1866   :  { %416 = vst.msk [vmem:[%s2106_s5 + $0x2] sm:$0x3] %vm254_vm3, %v414_v44 }
0x1869   :  { %v574_v10 = vpop.permute.xlu0 %573 }
0x186a   :  { %576 = vst.msk [vmem:[%s2106_s5 + $0x4] sm:$0x3] %vm254_vm3, %v574_v10 }
0x186d   :  { %v734_v12 = vpop.permute.xlu0 %733 }
0x186e   :  { %736 = vst.msk [vmem:[%s2106_s5 + $0x6] sm:$0x3] %vm254_vm3, %v734_v12 }
0x1871   :  { %v894_v17 = vpop.permute.xlu0 %893 }
0x18ae   :  { %v1363_v14 = vpop.permute.xlu1 %1362 }
0x18af   :  { %v1365_v15 = vadd.f32 %v1363_v14, %v1355_v13 }
0x18b1   :  { %1699 = vtanh.f32 %v1365_v15 }
0x18bb   :  { %v1700_v16 = vpop.eup %1699 }
0x18bc   :  { %1368 = vrot.lane.b32.xlu1 %v1700_v16, %s1707_s30 }
0x18c0   :  { %257 = vrot.lane.b32.xlu1 %v1794_v45, %s1707_s30  ;;  %v1054_v45 = vpop.permute.xlu0 %1053 }
0x18c4   :  { %418 = vrot.lane.b32.xlu1 %v1828_v27, %s1707_s30  ;;  %v1214_v19 = vpop.permute.xlu0 %1213 }
0x18c8   :  { %578 = vrot.lane.b32.xlu1 %v1863_v11, %s1707_s30 }
0x18cc   :  { %738 = vrot.lane.b32.xlu1 %v1898_v58, %s1707_s30 }
0x18d0   :  { %898 = vrot.lane.b32.xlu1 %v1931_v49, %s1707_s30 }
0x18d2   :  { %v1374_v20 = vpop.permute.xlu0 %1373 }
0x18d4   :  { %1058 = vrot.lane.b32.xlu1 %v1963_v42, %s1707_s30 }
0x18d8   :  { %1218 = vrot.lane.b32.xlu1 %v1993_v32, %s1707_s30 }
0x192e   :  { %v1369_v18 = vpop.permute.xlu1 %1368 }
0x192f   :  { %v1371_v27 = vmul.f32 %v1698_v38, %v1369_v18 }
0x1931   :  { %1378 = vrot.lane.b32.xlu1 %v1371_v27, %s1707_s30 }
0x1932   :  { %v258_v11 = vpop.permute.xlu1 %257 }
0x1933   :  { %261 = vst.msk [vmem:[%s2106_s5 + $0xe] sm:$0x3] %vm260_vm4, %v258_v11 }
0x1934   :  { %1376 = vst.msk [vmem:[%s2106_s5 + $0xe] sm:$0x3] %vm254_vm3, %v1374_v20 }
0x1936   :  { %v419_v58 = vpop.permute.xlu1 %418 }
0x1937   :  { %421 = vst.msk [vmem:[%s2106_s5 + $0xc] sm:$0x3] %vm260_vm4, %v419_v58 }
0x1938   :  { %1216 = vst.msk [vmem:[%s2106_s5 + $0xc] sm:$0x3] %vm254_vm3, %v1214_v19 }
0x193a   :  { %v579_v49 = vpop.permute.xlu1 %578 }
0x193b   :  { %581 = vst.msk [vmem:[%s2106_s5 + $0xa] sm:$0x3] %vm260_vm4, %v579_v49 }
0x193c   :  { %1056 = vst.msk [vmem:[%s2106_s5 + $0xa] sm:$0x3] %vm254_vm3, %v1054_v45 }
0x193e   :  { %v739_v42 = vpop.permute.xlu1 %738 }
0x193f   :  { %741 = vst.msk [vmem:[%s2106_s5 + $0x8] sm:$0x3] %vm260_vm4, %v739_v42 }
0x1940   :  { %896 = vst.msk [vmem:[%s2106_s5 + $0x8] sm:$0x3] %vm254_vm3, %v894_v17 }
0x1942   :  { %v899_v21 = vpop.permute.xlu1 %898 }
0x1943   :  { %901 = vst.msk [vmem:[%s2106_s5 + $0x6] sm:$0x3] %vm260_vm4, %v899_v21 }
0x1946   :  { %v1059_v23 = vpop.permute.xlu1 %1058 }
0x1947   :  { %1061 = vst.msk [vmem:[%s2106_s5 + $0x4] sm:$0x3] %vm260_vm4, %v1059_v23 }
0x194a   :  { %v1219_v24 = vpop.permute.xlu1 %1218 }
0x194b   :  { %1221 = vst.msk [vmem:[%s2106_s5 + $0x2] sm:$0x3] %vm260_vm4, %v1219_v24 }
0x19a3   :  { %v1379_v25 = vpop.permute.xlu1 %1378 }
0x19a4   :  { %1381 = vst.msk [vmem:[%s2106_s5] sm:$0x3] %vm260_vm4, %v1379_v25 }

// kernel: modeling_layer_forward.4
= control target key start
LH: loop header
LB: loop body
LE: loop exit
PB: predicated region body
PF: predicated region fallthrough
CT: control target
= control target key end

     0   :  { %v1774_v0 = vmov 0.0   ;;  %vm1775_vm0 = vmmov 0   ;;  %v1776_v5 = vmov 0   ;;  %s1778_s16 = smov 96   ;;  %s1780_s17 = smov 32   ;;  %vm149_vm1 = vcmask 130048   ;;  %s2194_s1 = inlined_call_operand.vmem [shape: bf16[128,128], index: 1, kind: input, shape index: {}]   ;;  %s2195_s2 = inlined_call_operand.vmem [shape: bf16[16,64], index: 2, kind: input, shape index: {}]   ;;  %s2196_s3 = inlined_call_operand.vmem [shape: bf16[16,64], index: 3, kind: input, shape index: {}]   ;;  %s2197_s0 = inlined_call_operand.vmem [shape: f32[16,128], index: 0, kind: input, shape index: {}]   ;;  %s2198_s4 = inlined_call_operand.vmem [shape: f32[1,128], index: 4, kind: input, shape index: {}]   ;;  %s2199_s5 = inlined_call_operand.vmem [shape: f32[16,32], index: 5, kind: output, shape index: {}]  }
   0x1   :  { %1512 = vmatprep.subr.bf16.mxu0 %v1774_v0  ;;  %1532 = vmatprep.subr.bf16.mxu1 %v1774_v0  ;;  %v1636_v1 = vld [vmem:[%s2194_s1] sm:$0xff]   ;;  %v1638_v3 = vld [vmem:[%s2194_s1 + $0x8] sm:$0xff]   ;;  %v1640_v6 = vld [vmem:[%s2194_s1 + $0x10] sm:$0xff]   ;;  %s1781_s18 = smov 80   ;;  %vm298_vm2 = vcmask 123904   ;;  %vm304_vm3 = vcmask 255104  }
   0x2   :  { %v1820_v2 = vld [vmem:[%s2195_s2] sm:$0xff]   ;;  %1534 = vmatprep.mubr.msk.bf16.mxu1 %vm1775_vm0, %v1774_v0  ;;  %1528 = vmatprep.mubr.msk.bf16.mxu0 %vm1775_vm0, %v1774_v0  ;;  %v1641_v7 = vld [vmem:[%s2194_s1 + $0x18] sm:$0xff]   ;;  %v1643_v9 = vld [vmem:[%s2194_s1 + $0x28] sm:$0xff]  }
   0x3   :  { %1513 = vmatpush3.bf16.msra.mxu0 %v1636_v1  ;;  %1533 = vmatpush3.bf16.msra.mxu1 %v1820_v2  ;;  %v1834_v4 = vld [vmem:[%s2196_s3] sm:$0xff]   ;;  %v1644_v10 = vld [vmem:[%s2194_s1 + $0x30] sm:$0xff]   ;;  %v1645_v11 = vld [vmem:[%s2194_s1 + $0x38] sm:$0xff]  }
   0x4   :  { %1514 = vmatprep.subr.bf16.mxu0 %v1774_v0  ;;  %1538 = vmatprep.subr.bf16.mxu1 %v1774_v0  ;;  %v1642_v8 = vld [vmem:[%s2194_s1 + $0x20] sm:$0xff]   ;;  %v22_v13 = vld [vmem:[%s2197_s0 + $0x8] sm:$0xff] }
   0x5   :  { %v21_v12 = vld [vmem:[%s2197_s0] sm:$0xff]  ;;  %s1777_s0 = smov 64  }
   0x6   :  { %1535 = vmatmul.mubr.bf16.vlgmr.msra.gmra.mrb[0].mxu1 %v1776_v5  ;;  %v23_v14 = vpack.c.bf16 %v22_v13, %v21_v12  ;;  %v1430_v23 = vld [vmem:[%s2198_s4] ss:$0 sm:$0xff]  ;;  %s1779_s4 = smov 16  }
   0x7   :  { %1515 = vmatpush3.bf16.msra.mxu0 %v1638_v3  ;;  %1539 = vmatpush3.bf16.msra.mxu1 %v1834_v4 }
   0x8   :  { %1516 = vmatprep.subr.bf16.mxu0 %v1774_v0  ;;  %1540 = vmatprep.mubr.msk.bf16.mxu1 %vm1775_vm0, %v1774_v0 }
   0x9   :  { %1544 = vmatprep.subr.bf16.mxu1 %v1774_v0 }
   0xb   :  { %1517 = vmatpush3.bf16.msra.mxu0 %v1640_v6 }
   0xc   :  { %1518 = vmatprep.subr.bf16.mxu0 %v1774_v0 }
   0xe   :  { %1541 = vmatmul.mubr.bf16.vlgmr.msra.gmra.mrb[4].mxu1 %v1776_v5 }
   0xf   :  { %1519 = vmatpush3.bf16.msra.mxu0 %v1641_v7  ;;  %1545 = vmatpush3.bf16.msra.mxu1 %v1820_v2 }
  0x10   :  { %1520 = vmatprep.subr.bf16.mxu0 %v1774_v0  ;;  %1546 = vmatprep.mubr.msk.bf16.mxu1 %vm1775_vm0, %v1774_v0 }
  0x11   :  { %1550 = vmatprep.subr.bf16.mxu1 %v1774_v0 }
  0x13   :  { %1521 = vmatpush3.bf16.msra.mxu0 %v1642_v8 }
  0x14   :  { %1522 = vmatprep.subr.bf16.mxu0 %v1774_v0 }
  0x17   :  { %1523 = vmatpush3.bf16.msra.mxu0 %v1643_v9 }
  0x18   :  { %1524 = vmatprep.subr.bf16.mxu0 %v1774_v0 }
  0x1b   :  { %1525 = vmatpush3.bf16.msra.mxu0 %v1644_v10 }
  0x1c   :  { %1526 = vmatprep.subr.bf16.mxu0 %v1774_v0 }
  0x1f   :  { %1527 = vmatpush3.bf16.msra.mxu0 %v1645_v11 }
  0x20   :  { %1562 = vmatprep.subr.bf16.mxu0 %v1774_v0 }
  0x22   :  { %1529 = vmatmul.mubr.bf16.vlgmr.msra.gmra.mrb[0].mxu0 %v23_v14 }
  0x23   :  { %1563 = vmatpush3.bf16.msra.mxu0 %v1834_v4  ;;  %1564 = vmatprep.mubr.msk.bf16.mxu0 %vm1775_vm0, %v1774_v0 }
  0x24   :  { %1574 = vmatprep.subr.bf16.mxu0 %v1774_v0 }
  0xd9   :  { %v187_v15 = vpop.f32.mrb[0].mxu1 }
  0xda   :  { %v1536_v16 = vpop.f32.mrb[1].mxu1 }
  0xdb   :  { %v190_v17 = vpop.f32.mrb[2].mxu1 }
  0xdc   :  { %v1537_v18 = vpop.f32.mrb[3].mxu1 }
  0xe1   :  { %v259_v19 = vpop.f32.mrb[4].mxu1 }
  0xe2   :  { %266 = vrot.lane.b32.xlu0 %v259_v19, %s1777_s0  ;;  %v1542_v20 = vpop.f32.mrb[5].mxu1 }
  0xe3   :  { %v262_v21 = vpop.f32.mrb[6].mxu1 }
  0xe4   :  { %v1543_v22 = vpop.f32.mrb[7].mxu1 }
  0xf5   :  { %v129_v24 = vpop.f32.mrb[0].mxu0 }
  0xf6   :  { %v130_v25 = vadd.f32 %v1430_v23, %v129_v24  ;;  %v1530_v26 = vpop.f32.mrb[1].mxu0 }
  0xf7   :  { %v132_v27 = vpop.f32.mrb[2].mxu0 }
  0xf8   :  { %136 = vst [vmem:[#allocation2] sm:$0xff] %v130_v25  ;;  %v133_v28 = vadd.f32 %v1430_v23, %v132_v27  ;;  %v1531_v29 = vpop.f32.mrb[3].mxu0 }
  0xfa   :  { %137 = vst [vmem:[#allocation2 + $0x8] sm:$0xff] %v133_v28 }
  0xff   :  { %v142_v30 = vld [vmem:[#allocation2] sm:$0x3]  ;;  %v306_v25 = vld [vmem:[#allocation2 + $0x2] sm:$0x3] }
 0x100   :  { %v193_v31 = vadd.f32 %v187_v15, %v142_v30 }
 0x101   :  { %v218_v34 = vld [vmem:[#allocation2 + $0xe] sm:$0x3]  ;;  %v379_v12 = vld [vmem:[#allocation2 + $0xc] sm:$0x3] }
 0x102   :  { %1646 = vtanh.f32 %v193_v31  ;;  %v1440_v36 = vmul.f32 -1.442695, %v193_v31 }
 0x10c   :  { %v1647_v32 = vpop.eup %1646 }
 0x10d   :  { %203 = vrot.lane.b32.xlu0 %v1647_v32, %s1778_s16 }
 0x154   :  { %v267_v33 = vpop.permute.xlu0 %266 }
 0x155   :  { %v269_v35 = vadd.f32 %v267_v33, %v218_v34 }
 0x157   :  { %1648 = vtanh.f32 %v269_v35  ;;  %v1442_v43 = vmul.f32 -1.442695, %v269_v35 }
 0x158   :  { %1650 = vpow2.f32 %v1440_v36 }
 0x161   :  { %v1649_v37 = vpop.eup %1648 }
 0x162   :  { %279 = vrot.lane.b32.xlu1 %v1649_v37, %s1778_s16  ;;  %v1651_v38 = vpop.eup %1650 }
 0x163   :  { %v197_v39 = vadd.f32 1.0, %v1651_v38 }
 0x165   :  { %1652 = vrcp.f32 %v197_v39 }
 0x166   :  { %1654 = vpow2.f32 %v1442_v43 }
 0x16f   :  { %v1653_v40 = vpop.eup %1652 }
 0x170   :  { %v1655_v44 = vpop.eup %1654  ;;  %v201_v49 = vmul.f32 0.0, %v1653_v40 }
 0x171   :  { %v273_v45 = vadd.f32 1.0, %v1655_v44 }
 0x173   :  { %1656 = vrcp.f32 %v273_v45 }
 0x17d   :  { %v1657_v46 = vpop.eup %1656 }
 0x17e   :  { %v277_v53 = vmul.f32 0.0, %v1657_v46 }
 0x17f   :  { %v204_v41 = vpop.permute.xlu0 %203 }
 0x180   :  { %v206_v42 = vmul.f32 %v1653_v40, %v204_v41 }
 0x182   :  { %208 = vrot.lane.b32.xlu1 %v206_v42, %s1779_s4 }
 0x1d4   :  { %v280_v47 = vpop.permute.xlu1 %279 }
 0x1d5   :  { %v282_v48 = vmul.f32 %v1657_v46, %v280_v47 }
 0x1d7   :  { %284 = vrot.lane.b32.xlu0 %v282_v48, %s1779_s4 }
 0x1f4   :  { %v209_v50 = vpop.permute.xlu1 %208 }
 0x1f5   :  { %v1888_v51 = vadd.f32 %v209_v50, %v201_v49 }
 0x1f7   :  { %1658 = vtanh.f32 %v1888_v51 }
 0x201   :  { %v1659_v52 = vpop.eup %1658 }
 0x202   :  { %214 = vrot.lane.b32.xlu1 %v1659_v52, %s1780_s17 }
 0x249   :  { %v285_v54 = vpop.permute.xlu0 %284 }
 0x24a   :  { %v287_v55 = vadd.f32 %v285_v54, %v277_v53 }
 0x24c   :  { %1660 = vtanh.f32 %v287_v55 }
 0x256   :  { %v1661_v56 = vpop.eup %1660 }
 0x257   :  { %290 = vrot.lane.b32.xlu0 %v1661_v56, %s1780_s17 }
 0x274   :  { %v215_v57 = vpop.permute.xlu1 %214 }
 0x275   :  { %v1893_v58 = vmul.f32 %v1653_v40, %v215_v57 }
 0x277   :  { %v307_v59 = vpack.c.bf16 %v1893_v58, %v1893_v58 }
 0x279   :  { %309 = vrot.lane.b32.xlu1 %v307_v59, %s1781_s18 }
 0x2c9   :  { %v291_v60 = vpop.permute.xlu0 %290 }
 0x2ca   :  { %v1898_v61 = vmul.f32 %v1657_v46, %v291_v60 }
 0x2cc   :  { %v380_v62 = vpack.c.bf16 %v1898_v61, %v1898_v61 }
 0x2ce   :  { %382 = vrot.lane.b32.xlu0 %v380_v62, %s1779_s4 }
 0x2eb   :  { %v310_v63 = vpop.permute.xlu1 %309 }
 0x2ec   :  { %1547 = vmatmul.mubr.msk.bf16.vlgmr.msra.gmra.mrb[8].mxu1 %vm149_vm1, %v310_v63 }
 0x2ed   :  { %1551 = vmatpush3.bf16.msra.mxu1 %v1834_v4  ;;  %1552 = vmatprep.mubr.msk.bf16.mxu1 %vm1775_vm0, %v1774_v0 }
 0x2ee   :  { %1556 = vmatprep.subr.bf16.mxu1 %v1774_v0 }
 0x340   :  { %v383_v1 = vpop.permute.xlu0 %382 }
 0x341   :  { %1553 = vmatmul.mubr.msk.bf16.vlgmr.msra.gmra.mrb[12].mxu1 %vm149_vm1, %v383_v1 }
 0x342   :  { %1557 = vmatpush3.bf16.msra.mxu1 %v1820_v2  ;;  %1558 = vmatprep.mubr.msk.bf16.mxu1 %vm1775_vm0, %v1774_v0 }
 0x343   :  { %1568 = vmatprep.subr.bf16.mxu1 %v1774_v0 }
 0x3bf   :  { %v348_v3 = vpop.f32.mrb[8].mxu1 }
 0x3c0   :  { %v1548_v5 = vpop.f32.mrb[9].mxu1  ;;  %v354_v26 = vadd.f32 %v348_v3, %v306_v25 }
 0x3c1   :  { %v351_v6 = vpop.f32.mrb[10].mxu1 }
 0x3c2   :  { %v1549_v7 = vpop.f32.mrb[11].mxu1  ;;  %v1444_v29 = vmul.f32 -1.442695, %v354_v26 }
 0x414   :  { %v421_v8 = vpop.f32.mrb[12].mxu1 }
 0x415   :  { %428 = vrot.lane.b32.xlu1 %v421_v8, %s1777_s0  ;;  %v1554_v9 = vpop.f32.mrb[13].mxu1 }
 0x416   :  { %v424_v10 = vpop.f32.mrb[14].mxu1  ;;  %v466_v9 = vld [vmem:[#allocation2 + $0x4] sm:$0x3] }
 0x417   :  { %v1555_v11 = vpop.f32.mrb[15].mxu1 }
 0x487   :  { %v429_v13 = vpop.permute.xlu1 %428 }
 0x488   :  { %v431_v14 = vadd.f32 %v429_v13, %v379_v12 }
 0x48a   :  { %1662 = vtanh.f32 %v431_v14  ;;  %v1446_v16 = vmul.f32 -1.442695, %v431_v14 }
 0x48c   :  { %1664 = vpow2.f32 %v1446_v16 }
 0x494   :  { %v1663_v15 = vpop.eup %1662 }
 0x495   :  { %441 = vrot.lane.b32.xlu0 %v1663_v15, %s1778_s16 }
 0x496   :  { %v1665_v17 = vpop.eup %1664 }
 0x497   :  { %v435_v18 = vadd.f32 1.0, %v1665_v17 }
 0x499   :  { %1666 = vrcp.f32 %v435_v18 }
 0x4a3   :  { %v1667_v19 = vpop.eup %1666 }
 0x4a4   :  { %v439_v22 = vmul.f32 %v1667_v19, %v287_v55 }
 0x507   :  { %v442_v20 = vpop.permute.xlu0 %441 }
 0x508   :  { %v444_v21 = vmul.f32 %v1667_v19, %v442_v20 }
 0x50a   :  { %446 = vrot.lane.b32.xlu1 %v444_v21, %s1779_s4 }
 0x57c   :  { %v447_v23 = vpop.permute.xlu1 %446 }
 0x57d   :  { %v1916_v24 = vadd.f32 %v447_v23, %v439_v22 }
 0x57f   :  { %1668 = vtanh.f32 %v1916_v24 }
 0x580   :  { %1670 = vtanh.f32 %v354_v26 }
 0x581   :  { %1672 = vpow2.f32 %v1444_v29 }
 0x589   :  { %v1669_v27 = vpop.eup %1668 }
 0x58a   :  { %452 = vrot.lane.b32.xlu0 %v1669_v27, %s1780_s17  ;;  %v1671_v28 = vpop.eup %1670 }
 0x58b   :  { %v1673_v30 = vpop.eup %1672 }
 0x58c   :  { %v358_v31 = vadd.f32 1.0, %v1673_v30 }
 0x58e   :  { %364 = vrot.lane.b32.xlu0 %v1671_v28, %s1778_s16  ;;  %1674 = vrcp.f32 %v358_v31 }
 0x598   :  { %v1675_v36 = vpop.eup %1674 }
 0x599   :  { %v362_v39 = vmul.f32 %v1675_v36, %v1888_v51  ;;  %v539_v51 = vld [vmem:[#allocation2 + $0xa] sm:$0x3] }
 0x5fc   :  { %v453_v32 = vpop.permute.xlu0 %452 }
 0x5fd   :  { %v1921_v33 = vmul.f32 %v1667_v19, %v453_v32 }
 0x5ff   :  { %v540_v34 = vpack.c.bf16 %v1921_v33, %v1921_v33 }
 0x600   :  { %v365_v35 = vpop.permute.xlu0 %364 }
 0x601   :  { %542 = vrot.lane.b32.xlu1 %v540_v34, %s1779_s4  ;;  %v367_v37 = vmul.f32 %v1675_v36, %v365_v35 }
 0x605   :  { %369 = vrot.lane.b32.xlu1 %v367_v37, %s1779_s4 }
 0x673   :  { %v543_v38 = vpop.permute.xlu1 %542 }
 0x674   :  { %1565 = vmatmul.mubr.msk.bf16.vlgmr.msra.gmra.mrb[4].mxu0 %vm149_vm1, %v543_v38 }
 0x675   :  { %1575 = vmatpush3.bf16.msra.mxu0 %v1834_v4  ;;  %1576 = vmatprep.mubr.msk.bf16.mxu0 %vm1775_vm0, %v1774_v0 }
 0x676   :  { %1586 = vmatprep.subr.bf16.mxu0 %v1774_v0 }
 0x677   :  { %v370_v40 = vpop.permute.xlu1 %369 }
 0x678   :  { %v1933_v41 = vadd.f32 %v370_v40, %v362_v39 }
 0x67a   :  { %1676 = vtanh.f32 %v1933_v41 }
 0x684   :  { %v1677_v42 = vpop.eup %1676 }
 0x685   :  { %375 = vrot.lane.b32.xlu1 %v1677_v42, %s1780_s17 }
 0x6f7   :  { %v376_v43 = vpop.permute.xlu1 %375 }
 0x6f8   :  { %v1937_v44 = vmul.f32 %v1675_v36, %v376_v43  ;;  %v699_v36 = vld [vmem:[#allocation2 + $0x8] sm:$0x3] }
 0x6fa   :  { %v467_v45 = vpack.c.bf16 %v1937_v44, %v1937_v44 }
 0x6fc   :  { %469 = vrot.lane.b32.xlu1 %v467_v45, %s1781_s18 }
 0x747   :  { %v581_v46 = vpop.f32.mrb[4].mxu0 }
 0x748   :  { %588 = vrot.lane.b32.xlu0 %v581_v46, %s1777_s0  ;;  %v1566_v47 = vpop.f32.mrb[5].mxu0 }
 0x749   :  { %v584_v48 = vpop.f32.mrb[6].mxu0 }
 0x74a   :  { %v1567_v49 = vpop.f32.mrb[7].mxu0 }
 0x76e   :  { %v470_v50 = vpop.permute.xlu1 %469 }
 0x76f   :  { %1559 = vmatmul.mubr.msk.bf16.vlgmr.msra.gmra.mrb[16].mxu1 %vm149_vm1, %v470_v50 }
 0x770   :  { %1569 = vmatpush3.bf16.msra.mxu1 %v1820_v2  ;;  %1570 = vmatprep.mubr.msk.bf16.mxu1 %vm1775_vm0, %v1774_v0 }
 0x771   :  { %1580 = vmatprep.subr.bf16.mxu1 %v1774_v0 }
 0x7ba   :  { %v589_v52 = vpop.permute.xlu0 %588 }
 0x7bb   :  { %v591_v53 = vadd.f32 %v589_v52, %v539_v51 }
 0x7bd   :  { %1678 = vtanh.f32 %v591_v53  ;;  %v1450_v55 = vmul.f32 -1.442695, %v591_v53 }
 0x7bf   :  { %1680 = vpow2.f32 %v1450_v55 }
 0x7c7   :  { %v1679_v54 = vpop.eup %1678 }
 0x7c8   :  { %601 = vrot.lane.b32.xlu0 %v1679_v54, %s1778_s16  ;;  %v626_v54 = vld [vmem:[#allocation2 + $0x6] sm:$0x3] }
 0x7c9   :  { %v1681_v56 = vpop.eup %1680 }
 0x7ca   :  { %v595_v57 = vadd.f32 1.0, %v1681_v56 }
 0x7cc   :  { %1682 = vrcp.f32 %v595_v57 }
 0x7d6   :  { %v1683_v59 = vpop.eup %1682 }
 0x7d7   :  { %v599_v6 = vmul.f32 %v1683_v59, %v1916_v24 }
 0x83a   :  { %v602_v60 = vpop.permute.xlu0 %601 }
 0x83b   :  { %v604_v62 = vmul.f32 %v1683_v59, %v602_v60 }
 0x83d   :  { %606 = vrot.lane.b32.xlu0 %v604_v62, %s1779_s4 }
 0x842   :  { %v508_v63 = vpop.f32.mrb[16].mxu1 }
 0x843   :  { %v1560_v1 = vpop.f32.mrb[17].mxu1  ;;  %v514_v10 = vadd.f32 %v508_v63, %v466_v9 }
 0x844   :  { %v511_v3 = vpop.f32.mrb[18].mxu1 }
 0x845   :  { %v1561_v5 = vpop.f32.mrb[19].mxu1  ;;  %v1448_v13 = vmul.f32 -1.442695, %v514_v10 }
 0x8af   :  { %v607_v7 = vpop.permute.xlu0 %606 }
 0x8b0   :  { %v1951_v8 = vadd.f32 %v607_v7, %v599_v6 }
 0x8b2   :  { %1684 = vtanh.f32 %v1951_v8 }
 0x8b3   :  { %1686 = vtanh.f32 %v514_v10 }
 0x8b4   :  { %1688 = vpow2.f32 %v1448_v13 }
 0x8bc   :  { %v1685_v11 = vpop.eup %1684 }
 0x8bd   :  { %612 = vrot.lane.b32.xlu1 %v1685_v11, %s1780_s17  ;;  %v1687_v12 = vpop.eup %1686 }
 0x8be   :  { %v1689_v14 = vpop.eup %1688 }
 0x8bf   :  { %v518_v15 = vadd.f32 1.0, %v1689_v14 }
 0x8c1   :  { %524 = vrot.lane.b32.xlu1 %v1687_v12, %s1778_s16  ;;  %1690 = vrcp.f32 %v518_v15 }
 0x8cb   :  { %v1691_v20 = vpop.eup %1690 }
 0x8cc   :  { %v522_v23 = vmul.f32 %v1691_v20, %v1933_v41 }
 0x92f   :  { %v613_v16 = vpop.permute.xlu1 %612 }
 0x930   :  { %v1956_v17 = vmul.f32 %v1683_v59, %v613_v16 }
 0x932   :  { %v700_v18 = vpack.c.bf16 %v1956_v17, %v1956_v17 }
 0x933   :  { %v525_v19 = vpop.permute.xlu1 %524 }
 0x934   :  { %702 = vrot.lane.b32.xlu0 %v700_v18, %s1779_s4  ;;  %v527_v21 = vmul.f32 %v1691_v20, %v525_v19 }
 0x938   :  { %529 = vrot.lane.b32.xlu0 %v527_v21, %s1779_s4 }
 0x9a6   :  { %v703_v22 = vpop.permute.xlu0 %702 }
 0x9a7   :  { %1577 = vmatmul.mubr.msk.bf16.vlgmr.msra.gmra.mrb[8].mxu0 %vm149_vm1, %v703_v22  ;;  %v859_v22 = vld [vmem:[#allocation2 + $0x6] sm:$0x3] }
 0x9a8   :  { %1587 = vmatpush3.bf16.msra.mxu0 %v1834_v4  ;;  %1588 = vmatprep.mubr.msk.bf16.mxu0 %vm1775_vm0, %v1774_v0 }
 0x9a9   :  { %1598 = vmatprep.subr.bf16.mxu0 %v1774_v0 }
 0x9aa   :  { %v530_v24 = vpop.permute.xlu0 %529 }
 0x9ab   :  { %v1968_v25 = vadd.f32 %v530_v24, %v522_v23 }
 0x9ad   :  { %1692 = vtanh.f32 %v1968_v25 }
 0x9b7   :  { %v1693_v26 = vpop.eup %1692 }
 0x9b8   :  { %535 = vrot.lane.b32.xlu1 %v1693_v26, %s1780_s17 }
 0xa2a   :  { %v536_v27 = vpop.permute.xlu1 %535 }
 0xa2b   :  { %v1972_v28 = vmul.f32 %v1691_v20, %v536_v27 }
 0xa2d   :  { %v627_v29 = vpack.c.bf16 %v1972_v28, %v1972_v28 }
 0xa2f   :  { %629 = vrot.lane.b32.xlu1 %v627_v29, %s1781_s18 }
 0xa7a   :  { %v741_v30 = vpop.f32.mrb[8].mxu0 }
 0xa7b   :  { %748 = vrot.lane.b32.xlu0 %v741_v30, %s1777_s0  ;;  %v1578_v31 = vpop.f32.mrb[9].mxu0 }
 0xa7c   :  { %v744_v32 = vpop.f32.mrb[10].mxu0 }
 0xa7d   :  { %v1579_v34 = vpop.f32.mrb[11].mxu0 }
 0xa7e   :  { %v786_v34 = vld [vmem:[#allocation2 + $0x8] sm:$0x3] }
 0xaa1   :  { %v630_v35 = vpop.permute.xlu1 %629 }
 0xaa2   :  { %1571 = vmatmul.mubr.msk.bf16.vlgmr.msra.gmra.mrb[20].mxu1 %vm149_vm1, %v630_v35 }
 0xaa3   :  { %1581 = vmatpush3.bf16.msra.mxu1 %v1820_v2  ;;  %1582 = vmatprep.mubr.msk.bf16.mxu1 %vm1775_vm0, %v1774_v0 }
 0xaa4   :  { %1592 = vmatprep.subr.bf16.mxu1 %v1774_v0 }
 0xaed   :  { %v749_v37 = vpop.permute.xlu0 %748 }
 0xaee   :  { %v751_v38 = vadd.f32 %v749_v37, %v699_v36 }
 0xaf0   :  { %1694 = vtanh.f32 %v751_v38  ;;  %v1454_v40 = vmul.f32 -1.442695, %v751_v38 }
 0xaf2   :  { %1696 = vpow2.f32 %v1454_v40 }
 0xafa   :  { %v1695_v39 = vpop.eup %1694 }
 0xafb   :  { %761 = vrot.lane.b32.xlu0 %v1695_v39, %s1778_s16 }
 0xafc   :  { %v1697_v41 = vpop.eup %1696 }
 0xafd   :  { %v755_v42 = vadd.f32 1.0, %v1697_v41 }
 0xaff   :  { %1698 = vrcp.f32 %v755_v42 }
 0xb09   :  { %v1699_v43 = vpop.eup %1698 }
 0xb0a   :  { %v759_v51 = vmul.f32 %v1699_v43, %v1951_v8 }
 0xb6d   :  { %v762_v45 = vpop.permute.xlu0 %761 }
 0xb6e   :  { %v764_v46 = vmul.f32 %v1699_v43, %v762_v45 }
 0xb70   :  { %766 = vrot.lane.b32.xlu1 %v764_v46, %s1779_s4 }
 0xb75   :  { %v668_v47 = vpop.f32.mrb[20].mxu1 }
 0xb76   :  { %v1572_v48 = vpop.f32.mrb[21].mxu1  ;;  %v674_v55 = vadd.f32 %v668_v47, %v626_v54 }
 0xb77   :  { %v671_v49 = vpop.f32.mrb[22].mxu1 }
 0xb78   :  { %v1573_v50 = vpop.f32.mrb[23].mxu1  ;;  %v1452_v59 = vmul.f32 -1.442695, %v674_v55 }
 0xbe2   :  { %v767_v52 = vpop.permute.xlu1 %766 }
 0xbe3   :  { %v1986_v53 = vadd.f32 %v767_v52, %v759_v51 }
 0xbe5   :  { %1700 = vtanh.f32 %v1986_v53 }
 0xbe6   :  { %1702 = vtanh.f32 %v674_v55 }
 0xbe7   :  { %1704 = vpow2.f32 %v1452_v59 }
 0xbef   :  { %v1701_v56 = vpop.eup %1700 }
 0xbf0   :  { %772 = vrot.lane.b32.xlu0 %v1701_v56, %s1780_s17  ;;  %v1703_v57 = vpop.eup %1702 }
 0xbf1   :  { %v1705_v60 = vpop.eup %1704 }
 0xbf2   :  { %v678_v62 = vadd.f32 1.0, %v1705_v60 }
 0xbf4   :  { %684 = vrot.lane.b32.xlu0 %v1703_v57, %s1778_s16  ;;  %1706 = vrcp.f32 %v678_v62 }
 0xbfe   :  { %v1707_v6 = vpop.eup %1706 }
 0xbff   :  { %v682_v9 = vmul.f32 %v1707_v6, %v1968_v25 }
 0xc62   :  { %v773_v63 = vpop.permute.xlu0 %772 }
 0xc63   :  { %v1991_v1 = vmul.f32 %v1699_v43, %v773_v63 }
 0xc65   :  { %v860_v3 = vpack.c.bf16 %v1991_v1, %v1991_v1 }
 0xc66   :  { %v685_v5 = vpop.permute.xlu0 %684 }
 0xc67   :  { %862 = vrot.lane.b32.xlu1 %v860_v3, %s1779_s4  ;;  %v687_v7 = vmul.f32 %v1707_v6, %v685_v5 }
 0xc6b   :  { %689 = vrot.lane.b32.xlu1 %v687_v7, %s1779_s4 }
 0xcd9   :  { %v863_v8 = vpop.permute.xlu1 %862 }
 0xcda   :  { %1589 = vmatmul.mubr.msk.bf16.vlgmr.msra.gmra.mrb[12].mxu0 %vm149_vm1, %v863_v8 }
 0xcdb   :  { %1599 = vmatpush3.bf16.msra.mxu0 %v1834_v4  ;;  %1600 = vmatprep.mubr.msk.bf16.mxu0 %vm1775_vm0, %v1774_v0 }
 0xcdc   :  { %1610 = vmatprep.subr.bf16.mxu0 %v1774_v0 }
 0xcdd   :  { %v690_v10 = vpop.permute.xlu1 %689 }
 0xcde   :  { %v692_v11 = vadd.f32 %v690_v10, %v682_v9  ;;  %v1019_v10 = vld [vmem:[#allocation2 + $0x4] sm:$0x3] }
 0xce0   :  { %1708 = vtanh.f32 %v692_v11 }
 0xcea   :  { %v1709_v12 = vpop.eup %1708 }
 0xceb   :  { %695 = vrot.lane.b32.xlu0 %v1709_v12, %s1780_s17 }
 0xd5d   :  { %v696_v13 = vpop.permute.xlu0 %695 }
 0xd5e   :  { %v2004_v14 = vmul.f32 %v1707_v6, %v696_v13 }
 0xd60   :  { %v787_v15 = vpack.c.bf16 %v2004_v14, %v2004_v14 }
 0xd62   :  { %789 = vrot.lane.b32.xlu1 %v787_v15, %s1781_s18  ;;  %v946_v15 = vld [vmem:[#allocation2 + $0xa] sm:$0x3] }
 0xdad   :  { %v901_v16 = vpop.f32.mrb[12].mxu0 }
 0xdae   :  { %908 = vrot.lane.b32.xlu0 %v901_v16, %s1777_s0  ;;  %v1590_v18 = vpop.f32.mrb[13].mxu0 }
 0xdaf   :  { %v904_v19 = vpop.f32.mrb[14].mxu0 }
 0xdb0   :  { %v1591_v20 = vpop.f32.mrb[15].mxu0 }
 0xdd4   :  { %v790_v21 = vpop.permute.xlu1 %789 }
 0xdd5   :  { %1583 = vmatmul.mubr.msk.bf16.vlgmr.msra.gmra.mrb[24].mxu1 %vm149_vm1, %v790_v21 }
 0xdd6   :  { %1593 = vmatpush3.bf16.msra.mxu1 %v1820_v2  ;;  %1594 = vmatprep.mubr.msk.bf16.mxu1 %vm1775_vm0, %v1774_v0 }
 0xdd7   :  { %1604 = vmatprep.subr.bf16.mxu1 %v1774_v0 }
 0xe20   :  { %v909_v23 = vpop.permute.xlu0 %908 }
 0xe21   :  { %v911_v24 = vadd.f32 %v909_v23, %v859_v22 }
 0xe23   :  { %1710 = vtanh.f32 %v911_v24  ;;  %v1458_v26 = vmul.f32 -1.442695, %v911_v24 }
 0xe25   :  { %1712 = vpow2.f32 %v1458_v26 }
 0xe2d   :  { %v1711_v25 = vpop.eup %1710 }
 0xe2e   :  { %921 = vrot.lane.b32.xlu1 %v1711_v25, %s1778_s16 }
 0xe2f   :  { %v1713_v27 = vpop.eup %1712 }
 0xe30   :  { %v915_v29 = vadd.f32 1.0, %v1713_v27 }
 0xe32   :  { %1714 = vrcp.f32 %v915_v29 }
 0xe3c   :  { %v1715_v30 = vpop.eup %1714 }
 0xe3d   :  { %v919_v42 = vmul.f32 %v1715_v30, %v1986_v53 }
 0xea0   :  { %v922_v31 = vpop.permute.xlu1 %921 }
 0xea1   :  { %v924_v32 = vmul.f32 %v1715_v30, %v922_v31 }
 0xea3   :  { %926 = vrot.lane.b32.xlu0 %v924_v32, %s1779_s4 }
 0xea8   :  { %v828_v35 = vpop.f32.mrb[24].mxu1 }
 0xea9   :  { %v834_v36 = vadd.f32 %v828_v35, %v786_v34  ;;  %v1584_v37 = vpop.f32.mrb[25].mxu1 }
 0xeaa   :  { %v831_v38 = vpop.f32.mrb[26].mxu1 }
 0xeab   :  { %1716 = vtanh.f32 %v834_v36  ;;  %v1585_v39 = vpop.f32.mrb[27].mxu1  ;;  %v1456_v41 = vmul.f32 -1.442695, %v834_v36 }
 0xead   :  { %1718 = vpow2.f32 %v1456_v41 }
 0xeb5   :  { %v1717_v40 = vpop.eup %1716 }
 0xeb6   :  { %844 = vrot.lane.b32.xlu0 %v1717_v40, %s1778_s16 }
 0xeb7   :  { %v1719_v46 = vpop.eup %1718 }
 0xeb8   :  { %v838_v47 = vadd.f32 1.0, %v1719_v46 }
 0xf15   :  { %v927_v43 = vpop.permute.xlu0 %926 }
 0xf16   :  { %v2019_v45 = vadd.f32 %v927_v43, %v919_v42 }
 0xf18   :  { %1720 = vtanh.f32 %v2019_v45 }
 0xf19   :  { %1722 = vrcp.f32 %v838_v47 }
 0xf22   :  { %v1721_v48 = vpop.eup %1720 }
 0xf23   :  { %932 = vrot.lane.b32.xlu1 %v1721_v48, %s1780_s17  ;;  %v1723_v49 = vpop.eup %1722 }
 0xf24   :  { %v842_v55 = vmul.f32 %v1723_v49, %v692_v11 }
 0xf28   :  { %v845_v50 = vpop.permute.xlu0 %844 }
 0xf29   :  { %v847_v51 = vmul.f32 %v1723_v49, %v845_v50 }
 0xf2b   :  { %849 = vrot.lane.b32.xlu0 %v847_v51, %s1779_s4 }
 0xf95   :  { %v933_v52 = vpop.permute.xlu1 %932 }
 0xf96   :  { %v2024_v54 = vmul.f32 %v1715_v30, %v933_v52 }
 0xf98   :  { %v1020_v53 = vpack.c.bf16 %v2024_v54, %v2024_v54 }
 0xf9a   :  { %1022 = vrot.lane.b32.xlu1 %v1020_v53, %s1779_s4 }
 0xf9d   :  { %v850_v56 = vpop.permute.xlu0 %849 }
 0xf9e   :  { %v852_v57 = vadd.f32 %v850_v56, %v842_v55 }
 0xfa0   :  { %1724 = vtanh.f32 %v852_v57 }
 0xfaa   :  { %v1725_v59 = vpop.eup %1724 }
 0xfab   :  { %855 = vrot.lane.b32.xlu1 %v1725_v59, %s1780_s17 }
0x100c   :  { %v1023_v60 = vpop.permute.xlu1 %1022 }
0x100d   :  { %1601 = vmatmul.mubr.msk.bf16.vlgmr.msra.gmra.mrb[16].mxu0 %vm149_vm1, %v1023_v60  ;;  %v1106_v60 = vld [vmem:[#allocation2 + $0xc] sm:$0x3] }
0x100e   :  { %1611 = vmatpush3.bf16.msra.mxu0 %v1834_v4  ;;  %1612 = vmatprep.mubr.msk.bf16.mxu0 %vm1775_vm0, %v1774_v0 }
0x100f   :  { %1622 = vmatprep.subr.bf16.mxu0 %v1774_v0 }
0x101d   :  { %v856_v62 = vpop.permute.xlu1 %855 }
0x101e   :  { %v2035_v63 = vmul.f32 %v1723_v49, %v856_v62 }
0x1020   :  { %v947_v3 = vpack.c.bf16 %v2035_v63, %v2035_v63 }
0x1022   :  { %949 = vrot.lane.b32.xlu0 %v947_v3, %s1781_s18 }
0x1094   :  { %v950_v5 = vpop.permute.xlu0 %949 }
0x1095   :  { %1595 = vmatmul.mubr.msk.bf16.vlgmr.msra.gmra.mrb[28].mxu1 %vm149_vm1, %v950_v5 }
0x1096   :  { %1605 = vmatpush3.bf16.msra.mxu1 %v1820_v2  ;;  %1606 = vmatprep.mubr.msk.bf16.mxu1 %vm1775_vm0, %v1774_v0 }
0x1097   :  { %1616 = vmatprep.subr.bf16.mxu1 %v1774_v0 }
0x10e0   :  { %v1061_v6 = vpop.f32.mrb[16].mxu0 }
0x10e1   :  { %1068 = vrot.lane.b32.xlu1 %v1061_v6, %s1777_s0  ;;  %v1602_v7 = vpop.f32.mrb[17].mxu0 }
0x10e2   :  { %v1064_v8 = vpop.f32.mrb[18].mxu0 }
0x10e3   :  { %v1603_v9 = vpop.f32.mrb[19].mxu0 }
0x1153   :  { %v1069_v11 = vpop.permute.xlu1 %1068 }
0x1154   :  { %v1071_v12 = vadd.f32 %v1069_v11, %v1019_v10 }
0x1156   :  { %1726 = vtanh.f32 %v1071_v12  ;;  %v1462_v23 = vmul.f32 -1.442695, %v1071_v12 }
0x1160   :  { %v1727_v13 = vpop.eup %1726 }
0x1161   :  { %1081 = vrot.lane.b32.xlu0 %v1727_v13, %s1778_s16 }
0x1168   :  { %v988_v16 = vpop.f32.mrb[28].mxu1 }
0x1169   :  { %v994_v18 = vadd.f32 %v988_v16, %v946_v15  ;;  %v1596_v19 = vpop.f32.mrb[29].mxu1 }
0x116a   :  { %v991_v20 = vpop.f32.mrb[30].mxu1 }
0x116b   :  { %1728 = vtanh.f32 %v994_v18  ;;  %v1597_v21 = vpop.f32.mrb[31].mxu1  ;;  %v1460_v26 = vmul.f32 -1.442695, %v994_v18 }
0x116c   :  { %1730 = vpow2.f32 %v1462_v23 }
0x1175   :  { %v1729_v22 = vpop.eup %1728 }
0x1176   :  { %1004 = vrot.lane.b32.xlu0 %v1729_v22, %s1778_s16  ;;  %v1731_v24 = vpop.eup %1730 }
0x1177   :  { %v1075_v25 = vadd.f32 1.0, %v1731_v24 }
0x1179   :  { %1732 = vrcp.f32 %v1075_v25 }
0x117a   :  { %1734 = vpow2.f32 %v1460_v26 }
0x1183   :  { %v1733_v27 = vpop.eup %1732 }
0x1184   :  { %v1735_v31 = vpop.eup %1734  ;;  %v1079_v37 = vmul.f32 %v1733_v27, %v2019_v45 }
0x1185   :  { %v998_v32 = vadd.f32 1.0, %v1735_v31 }
0x1187   :  { %1736 = vrcp.f32 %v998_v32 }
0x1191   :  { %v1737_v34 = vpop.eup %1736 }
0x1192   :  { %v1002_v41 = vmul.f32 %v1737_v34, %v852_v57 }
0x11d3   :  { %v1082_v29 = vpop.permute.xlu0 %1081 }
0x11d4   :  { %v1084_v30 = vmul.f32 %v1733_v27, %v1082_v29 }
0x11d6   :  { %1086 = vrot.lane.b32.xlu1 %v1084_v30, %s1779_s4 }
0x11e8   :  { %v1005_v35 = vpop.permute.xlu0 %1004 }
0x11e9   :  { %v1007_v36 = vmul.f32 %v1737_v34, %v1005_v35 }
0x11eb   :  { %1009 = vrot.lane.b32.xlu0 %v1007_v36, %s1779_s4 }
0x1248   :  { %v1087_v38 = vpop.permute.xlu1 %1086 }
0x1249   :  { %v2051_v39 = vadd.f32 %v1087_v38, %v1079_v37 }
0x124b   :  { %1738 = vtanh.f32 %v2051_v39 }
0x1255   :  { %v1739_v40 = vpop.eup %1738 }
0x1256   :  { %1092 = vrot.lane.b32.xlu1 %v1739_v40, %s1780_s17 }
0x125d   :  { %v1010_v42 = vpop.permute.xlu0 %1009 }
0x125e   :  { %v1012_v43 = vadd.f32 %v1010_v42, %v1002_v41  ;;  %v1266_v42 = vld [vmem:[#allocation2 + $0xe] sm:$0x3] }
0x1260   :  { %1740 = vtanh.f32 %v1012_v43 }
0x126a   :  { %v1741_v46 = vpop.eup %1740 }
0x126b   :  { %1015 = vrot.lane.b32.xlu0 %v1741_v46, %s1780_s17 }
0x12c8   :  { %v1093_v47 = vpop.permute.xlu1 %1092 }
0x12c9   :  { %v2056_v48 = vmul.f32 %v1733_v27, %v1093_v47 }
0x12cb   :  { %v1180_v45 = vpack.c.bf16 %v2056_v48, %v2056_v48 }
0x12cd   :  { %1182 = vrot.lane.b32.xlu1 %v1180_v45, %s1779_s4 }
0x12dd   :  { %v1016_v49 = vpop.permute.xlu0 %1015 }
0x12de   :  { %v2061_v50 = vmul.f32 %v1737_v34, %v1016_v49 }
0x12e0   :  { %v1107_v51 = vpack.c.bf16 %v2061_v50, %v2061_v50 }
0x12e2   :  { %1109 = vrot.lane.b32.xlu1 %v1107_v51, %s1781_s18 }
0x133f   :  { %v1183_v52 = vpop.permute.xlu1 %1182 }
0x1340   :  { %1613 = vmatmul.mubr.msk.bf16.vlgmr.msra.gmra.mrb[20].mxu0 %vm149_vm1, %v1183_v52 }
0x1341   :  { %1623 = vmatpush3.bf16.msra.mxu0 %v1834_v4  ;;  %1624 = vmatprep.mubr.msk.bf16.mxu0 %vm1775_vm0, %v1774_v0 }
0x1354   :  { %v1110_v53 = vpop.permute.xlu1 %1109 }
0x1355   :  { %1607 = vmatmul.mubr.msk.bf16.vlgmr.msra.gmra.mrb[32].mxu1 %vm149_vm1, %v1110_v53 }
0x1356   :  { %1617 = vmatpush3.bf16.msra.mxu1 %v1820_v2  ;;  %1618 = vmatprep.mubr.msk.bf16.mxu1 %vm1775_vm0, %v1774_v0  ;;  %v1179_v2 = vld [vmem:[#allocation2 + $0x2] sm:$0x3] }
0x1413   :  { %v1221_v55 = vpop.f32.mrb[20].mxu0 }
0x1414   :  { %1228 = vrot.lane.b32.xlu0 %v1221_v55, %s1777_s0  ;;  %v1614_v56 = vpop.f32.mrb[21].mxu0 }
0x1415   :  { %v1224_v57 = vpop.f32.mrb[22].mxu0 }
0x1416   :  { %v1615_v59 = vpop.f32.mrb[23].mxu0 }
0x1428   :  { %v1148_v62 = vpop.f32.mrb[32].mxu1 }
0x1429   :  { %v1154_v4 = vadd.f32 %v1148_v62, %v1106_v60  ;;  %v1608_v3 = vpop.f32.mrb[33].mxu1 }
0x142a   :  { %v1151_v5 = vpop.f32.mrb[34].mxu1 }
0x142b   :  { %1742 = vtanh.f32 %v1154_v4  ;;  %v1609_v6 = vpop.f32.mrb[35].mxu1  ;;  %v1464_v0 = vmul.f32 -1.442695, %v1154_v4  ;;  %v1339_v5 = vld [vmem:[#allocation2] sm:$0x3] }
0x1435   :  { %v1743_v7 = vpop.eup %1742 }
0x1436   :  { %1164 = vrot.lane.b32.xlu0 %v1743_v7, %s1778_s16 }
0x1486   :  { %v1229_v8 = vpop.permute.xlu0 %1228 }
0x1487   :  { %v1231_v9 = vadd.f32 %v1229_v8, %v1179_v2 }
0x1489   :  { %1744 = vtanh.f32 %v1231_v9  ;;  %v1466_v18 = vmul.f32 -1.442695, %v1231_v9 }
0x148a   :  { %1746 = vpow2.f32 %v1464_v0 }
0x1493   :  { %v1745_v10 = vpop.eup %1744 }
0x1494   :  { %1241 = vrot.lane.b32.xlu1 %v1745_v10, %s1778_s16  ;;  %v1747_v11 = vpop.eup %1746 }
0x1495   :  { %v1158_v12 = vadd.f32 1.0, %v1747_v11 }
0x1497   :  { %1748 = vrcp.f32 %v1158_v12 }
0x1498   :  { %1750 = vpow2.f32 %v1466_v18 }
0x14a1   :  { %v1749_v13 = vpop.eup %1748 }
0x14a2   :  { %v1751_v19 = vpop.eup %1750  ;;  %v1162_v24 = vmul.f32 %v1749_v13, %v1012_v43 }
0x14a3   :  { %v1235_v20 = vadd.f32 1.0, %v1751_v19 }
0x14a5   :  { %1752 = vrcp.f32 %v1235_v20 }
0x14a8   :  { %v1165_v15 = vpop.permute.xlu0 %1164 }
0x14a9   :  { %v1167_v16 = vmul.f32 %v1749_v13, %v1165_v15 }
0x14ab   :  { %1169 = vrot.lane.b32.xlu0 %v1167_v16, %s1779_s4 }
0x14af   :  { %v1753_v21 = vpop.eup %1752 }
0x14b0   :  { %v1239_v29 = vmul.f32 %v1753_v21, %v2051_v39 }
0x1506   :  { %v1242_v22 = vpop.permute.xlu1 %1241 }
0x1507   :  { %v1244_v23 = vmul.f32 %v1753_v21, %v1242_v22 }
0x1509   :  { %1246 = vrot.lane.b32.xlu1 %v1244_v23, %s1779_s4 }
0x151d   :  { %v1170_v25 = vpop.permute.xlu0 %1169 }
0x151e   :  { %v1172_v26 = vadd.f32 %v1170_v25, %v1162_v24 }
0x1520   :  { %1754 = vtanh.f32 %v1172_v26 }
0x152a   :  { %v1755_v27 = vpop.eup %1754 }
0x152b   :  { %1175 = vrot.lane.b32.xlu0 %v1755_v27, %s1780_s17 }
0x157b   :  { %v1247_v30 = vpop.permute.xlu1 %1246 }
0x157c   :  { %v2081_v31 = vadd.f32 %v1247_v30, %v1239_v29 }
0x157e   :  { %1756 = vtanh.f32 %v2081_v31 }
0x1588   :  { %v1757_v32 = vpop.eup %1756 }
0x1589   :  { %1252 = vrot.lane.b32.xlu1 %v1757_v32, %s1780_s17 }
0x159d   :  { %v1176_v34 = vpop.permute.xlu0 %1175 }
0x159e   :  { %v1178_v35 = vmul.f32 %v1749_v13, %v1176_v34 }
0x15a0   :  { %v1267_v36 = vpack.c.bf16 %v1178_v35, %v1178_v35 }
0x15a2   :  { %1269 = vrot.lane.b32.xlu0 %v1267_v36, %s1781_s18 }
0x15fb   :  { %v1253_v37 = vpop.permute.xlu1 %1252 }
0x15fc   :  { %v2086_v38 = vmul.f32 %v1753_v21, %v1253_v37 }
0x15fe   :  { %v1340_v40 = vpack.c.bf16 %v2086_v38, %v2086_v38 }
0x1600   :  { %1342 = vrot.lane.b32.xlu1 %v1340_v40, %s1779_s4 }
0x1614   :  { %v1270_v39 = vpop.permute.xlu0 %1269 }
0x1615   :  { %1619 = vmatmul.mubr.msk.bf16.vlgmr.msra.gmra.mrb[36].mxu1 %vm149_vm1, %v1270_v39 }
0x1672   :  { %v1343_v41 = vpop.permute.xlu1 %1342 }
0x1673   :  { %1625 = vmatmul.mubr.msk.bf16.vlgmr.msra.gmra.mrb[24].mxu0 %vm149_vm1, %v1343_v41 }
0x16e8   :  { %v1308_v43 = vpop.f32.mrb[36].mxu1 }
0x16e9   :  { %v1314_v46 = vadd.f32 %v1308_v43, %v1266_v42  ;;  %v1620_v47 = vpop.f32.mrb[37].mxu1 }
0x16ea   :  { %v1311_v45 = vpop.f32.mrb[38].mxu1 }
0x16eb   :  { %1758 = vtanh.f32 %v1314_v46  ;;  %v1621_v49 = vpop.f32.mrb[39].mxu1  ;;  %v1468_v56 = vmul.f32 -1.442695, %v1314_v46 }
0x16ed   :  { %1760 = vpow2.f32 %v1468_v56 }
0x16f5   :  { %v1759_v51 = vpop.eup %1758 }
0x16f6   :  { %1324 = vrot.lane.b32.xlu0 %v1759_v51, %s1778_s16 }
0x16f7   :  { %v1761_v59 = vpop.eup %1760 }
0x16f8   :  { %v1318_v60 = vadd.f32 1.0, %v1761_v59 }
0x16fa   :  { %1762 = vrcp.f32 %v1318_v60 }
0x1704   :  { %v1763_v62 = vpop.eup %1762 }
0x1705   :  { %v1322_v8 = vmul.f32 %v1763_v62, %v1172_v26 }
0x1746   :  { %v1381_v52 = vpop.f32.mrb[24].mxu0 }
0x1747   :  { %1388 = vrot.lane.b32.xlu1 %v1381_v52, %s1777_s0  ;;  %v1626_v53 = vpop.f32.mrb[25].mxu0 }
0x1748   :  { %v1384_v55 = vpop.f32.mrb[26].mxu0 }
0x1749   :  { %v1627_v57 = vpop.f32.mrb[27].mxu0 }
0x1768   :  { %v1325_v4 = vpop.permute.xlu0 %1324 }
0x1769   :  { %v1327_v3 = vmul.f32 %v1763_v62, %v1325_v4 }
0x176b   :  { %1329 = vrot.lane.b32.xlu0 %v1327_v3, %s1779_s4 }
0x17b9   :  { %v1389_v6 = vpop.permute.xlu1 %1388 }
0x17ba   :  { %v1391_v7 = vadd.f32 %v1389_v6, %v1339_v5 }
0x17bc   :  { %1764 = vtanh.f32 %v1391_v7  ;;  %v1470_v11 = vmul.f32 -1.442695, %v1391_v7 }
0x17c6   :  { %v1765_v2 = vpop.eup %1764 }
0x17c7   :  { %1401 = vrot.lane.b32.xlu1 %v1765_v2, %s1778_s16 }
0x17dd   :  { %v1330_v9 = vpop.permute.xlu0 %1329 }
0x17de   :  { %v1332_v0 = vadd.f32 %v1330_v9, %v1322_v8 }
0x17e0   :  { %1766 = vtanh.f32 %v1332_v0 }
0x17e1   :  { %1768 = vpow2.f32 %v1470_v11 }
0x17ea   :  { %v1767_v10 = vpop.eup %1766 }
0x17eb   :  { %1335 = vrot.lane.b32.xlu0 %v1767_v10, %s1780_s17 }
0x17ef   :  { %295 = vrot.lane.b32.xlu0 %v1893_v58, %s1781_s18  ;;  %v1769_v58 = vpop.eup %1768 }
0x17f0   :  { %v1395_v12 = vadd.f32 1.0, %v1769_v58 }
0x17f2   :  { %1770 = vrcp.f32 %v1395_v12 }
0x17f3   :  { %457 = vrot.lane.b32.xlu0 %v1937_v44, %s1781_s18 }
0x17f7   :  { %617 = vrot.lane.b32.xlu0 %v1972_v28, %s1781_s18 }
0x17fb   :  { %777 = vrot.lane.b32.xlu0 %v2004_v14, %s1781_s18 }
0x17fc   :  { %v1771_v44 = vpop.eup %1770 }
0x17fd   :  { %v1399_v19 = vmul.f32 %v1771_v44, %v2081_v31 }
0x17ff   :  { %937 = vrot.lane.b32.xlu0 %v2035_v63, %s1781_s18 }
0x1803   :  { %1097 = vrot.lane.b32.xlu0 %v2061_v50, %s1781_s18 }
0x1807   :  { %1257 = vrot.lane.b32.xlu0 %v1178_v35, %s1781_s18 }
0x1839   :  { %v1402_v13 = vpop.permute.xlu1 %1401 }
0x183a   :  { %v1404_v15 = vmul.f32 %v1771_v44, %v1402_v13 }
0x183c   :  { %1406 = vrot.lane.b32.xlu1 %v1404_v15, %s1779_s4 }
0x185d   :  { %v1336_v28 = vpop.permute.xlu0 %1335 }
0x185e   :  { %v1338_v14 = vmul.f32 %v1763_v62, %v1336_v28 }
0x1860   :  { %1417 = vrot.lane.b32.xlu0 %v1338_v14, %s1781_s18 }
0x1861   :  { %v296_v63 = vpop.permute.xlu0 %295 }
0x1862   :  { %299 = vst.msk [vmem:[%s2199_s5] sm:$0x3] %vm298_vm2, %v296_v63 }
0x1865   :  { %v458_v50 = vpop.permute.xlu0 %457 }
0x1866   :  { %460 = vst.msk [vmem:[%s2199_s5 + $0x2] sm:$0x3] %vm298_vm2, %v458_v50 }
0x1869   :  { %v618_v16 = vpop.permute.xlu0 %617 }
0x186a   :  { %620 = vst.msk [vmem:[%s2199_s5 + $0x4] sm:$0x3] %vm298_vm2, %v618_v16 }
0x186d   :  { %v778_v18 = vpop.permute.xlu0 %777 }
0x186e   :  { %780 = vst.msk [vmem:[%s2199_s5 + $0x6] sm:$0x3] %vm298_vm2, %v778_v18 }
0x1871   :  { %v938_v23 = vpop.permute.xlu0 %937 }
0x18ae   :  { %v1407_v20 = vpop.permute.xlu1 %1406 }
0x18af   :  { %v1409_v21 = vadd.f32 %v1407_v20, %v1399_v19 }
0x18b1   :  { %1772 = vtanh.f32 %v1409_v21 }
0x18bb   :  { %v1773_v22 = vpop.eup %1772 }
0x18bc   :  { %1412 = vrot.lane.b32.xlu1 %v1773_v22, %s1780_s17 }
0x18c0   :  { %301 = vrot.lane.b32.xlu1 %v1898_v61, %s1780_s17  ;;  %v1098_v61 = vpop.permute.xlu0 %1097 }
0x18c4   :  { %462 = vrot.lane.b32.xlu1 %v1921_v33, %s1780_s17  ;;  %v1258_v25 = vpop.permute.xlu0 %1257 }
0x18c8   :  { %622 = vrot.lane.b32.xlu1 %v1956_v17, %s1780_s17 }
0x18cc   :  { %782 = vrot.lane.b32.xlu1 %v1991_v1, %s1780_s17 }
0x18d0   :  { %942 = vrot.lane.b32.xlu1 %v2024_v54, %s1780_s17 }
0x18d2   :  { %v1418_v26 = vpop.permute.xlu0 %1417 }
0x18d4   :  { %1102 = vrot.lane.b32.xlu1 %v2056_v48, %s1780_s17 }
0x18d8   :  { %1262 = vrot.lane.b32.xlu1 %v2086_v38, %s1780_s17 }
0x192e   :  { %v1413_v24 = vpop.permute.xlu1 %1412 }
0x192f   :  { %v1415_v33 = vmul.f32 %v1771_v44, %v1413_v24 }
0x1931   :  { %1422 = vrot.lane.b32.xlu1 %v1415_v33, %s1780_s17 }
0x1932   :  { %v302_v17 = vpop.permute.xlu1 %301 }
0x1933   :  { %305 = vst.msk [vmem:[%s2199_s5 + $0xe] sm:$0x3] %vm304_vm3, %v302_v17 }
0x1934   :  { %1420 = vst.msk [vmem:[%s2199_s5 + $0xe] sm:$0x3] %vm298_vm2, %v1418_v26 }
0x1936   :  { %v463_v1 = vpop.permute.xlu1 %462 }
0x1937   :  { %465 = vst.msk [vmem:[%s2199_s5 + $0xc] sm:$0x3] %vm304_vm3, %v463_v1 }
0x1938   :  { %1260 = vst.msk [vmem:[%s2199_s5 + $0xc] sm:$0x3] %vm298_vm2, %v1258_v25 }
0x193a   :  { %v623_v54 = vpop.permute.xlu1 %622 }
0x193b   :  { %625 = vst.msk [vmem:[%s2199_s5 + $0xa] sm:$0x3] %vm304_vm3, %v623_v54 }
0x193c   :  { %1100 = vst.msk [vmem:[%s2199_s5 + $0xa] sm:$0x3] %vm298_vm2, %v1098_v61 }
0x193e   :  { %v783_v48 = vpop.permute.xlu1 %782 }
0x193f   :  { %785 = vst.msk [vmem:[%s2199_s5 + $0x8] sm:$0x3] %vm304_vm3, %v783_v48 }
0x1940   :  { %940 = vst.msk [vmem:[%s2199_s5 + $0x8] sm:$0x3] %vm298_vm2, %v938_v23 }
0x1942   :  { %v943_v27 = vpop.permute.xlu1 %942 }
0x1943   :  { %945 = vst.msk [vmem:[%s2199_s5 + $0x6] sm:$0x3] %vm304_vm3, %v943_v27 }
0x1946   :  { %v1103_v29 = vpop.permute.xlu1 %1102 }
0x1947   :  { %1105 = vst.msk [vmem:[%s2199_s5 + $0x4] sm:$0x3] %vm304_vm3, %v1103_v29 }
0x194a   :  { %v1263_v30 = vpop.permute.xlu1 %1262 }
0x194b   :  { %1265 = vst.msk [vmem:[%s2199_s5 + $0x2] sm:$0x3] %vm304_vm3, %v1263_v30 }
0x19a3   :  { %v1423_v31 = vpop.permute.xlu1 %1422 }
0x19a4   :  { %1425 = vst.msk [vmem:[%s2199_s5] sm:$0x3] %vm304_vm3, %v1423_v31 }

</bundles_post_ra>
